<compile_context>
chip_gen: v6e
topology: v6e:2x2x1
jax: 0.10.0
libtpu: 0.0.40
codegen_flags: <defaults>
</compile_context>

<pallas_src>
import functools
import math

import numpy as np
import jax
import jax.numpy as jnp
from jax.experimental import pallas as pl
from jax.experimental.pallas import tpu as pltpu


# ----------------------------------------------------------------------------
# Kernel builders
# ----------------------------------------------------------------------------
def _make_conv_valid_kernel(*, H, W, Cin, Cout, relu):
    """3x3 conv, stride 1, padding 0, on one NHWC batch element.

    Decomposition: P[r] = x[r] @ Wcat  (1x1 conv to 9*Cout channels, per row),
    then y[h] = bias + sum_{dy,dx} P[h+dy][dx:dx+Wo, tap*Cout:(tap+1)*Cout].
    """
    Ho, Wo = H - 2, W - 2

    def kernel(x_ref, w_ref, b_ref, o_ref, p_ref):
        wcat = w_ref[...]                      # (Cin, 9*Cout), VMEM resident
        bias = b_ref[...]                      # (1, Cout)

        def fill_row(r, c):
            row = x_ref[0, r, :, :]            # (W, Cin)
            if Cin == 1:
                p_ref[r, :, :] = row * wcat    # (W,1)*(1,9*Cout) outer product
            else:
                p_ref[r, :, :] = jnp.dot(row, wcat,
                                         preferred_element_type=jnp.float32)
            return c

        jax.lax.fori_loop(0, H, fill_row, 0)

        def out_row(h, c):
            acc = jnp.zeros((Wo, Cout), jnp.float32)
            for dy in range(3):
                prow = p_ref[h + dy, :, :]     # (W, 9*Cout)
                for dx in range(3):
                    t = dy * 3 + dx
                    acc = acc + prow[dx:dx + Wo, t * Cout:(t + 1) * Cout]
            y = acc + bias
            if relu:
                y = jnp.maximum(y, 0.0)
            o_ref[0, h, :, :] = y
            return c

        jax.lax.fori_loop(0, Ho, out_row, 0)

    return kernel


def _make_deconv_stage_kernel(*, H, W, F, Cout2, relu2, has_skip, relu_after_skip):
    """Fused decoder stage: ConvT3x3(pad0) + ReLU + Conv3x3(pad1) [+ReLU]
    [+skip add (+ReLU)].  The intermediate activation never leaves VMEM."""
    Hz, Wz = H + 2, W + 2                      # spatial size after ConvT / Conv(pad1)

    def kernel(*refs):
        if has_skip:
            x_ref, wt_ref, bt_ref, wc_ref, bc_ref, skip_ref, o_ref, p1_ref, p2_ref = refs
        else:
            x_ref, wt_ref, bt_ref, wc_ref, bc_ref, o_ref, p1_ref, p2_ref = refs
            skip_ref = None

        wt = wt_ref[...]                       # (F, 9*F)     ConvT-equivalent
        bt = bt_ref[...]                       # (1, F)
        wc = wc_ref[...]                       # (F, 9*Cout2)
        bc = bc_ref[...]                       # (1, Cout2)

        # Zeroed scratches realize the spatial zero-padding (pad=2 and pad=1).
        p1_ref[...] = jnp.zeros_like(p1_ref)   # (H+4, W+4, 9*F)
        p2_ref[...] = jnp.zeros_like(p2_ref)   # (H+4, W+4, 9*Cout2)

        def fill_p1(r, c):
            row = x_ref[0, r, :, :]            # (W, F)
            p1_ref[2 + r, 2:2 + W, :] = jnp.dot(
                row, wt, preferred_element_type=jnp.float32)
            return c

        jax.lax.fori_loop(0, H, fill_p1, 0)

        def mid_row(h, c):
            acc = jnp.zeros((Wz, F), jnp.float32)
            for dy in range(3):
                prow = p1_ref[h + dy, :, :]    # (W+4, 9*F)
                for dx in range(3):
                    t = dy * 3 + dx
                    acc = acc + prow[dx:dx + Wz, t * F:(t + 1) * F]
            z = jnp.maximum(acc + bt, 0.0)     # (Wz, F) ConvT output row (ReLU'd)
            p2_ref[1 + h, 1:1 + Wz, :] = jnp.dot(
                z, wc, preferred_element_type=jnp.float32)
            return c

        jax.lax.fori_loop(0, Hz, mid_row, 0)

        def out_row(h, c):
            acc = jnp.zeros((Wz, Cout2), jnp.float32)
            for dy in range(3):
                prow = p2_ref[h + dy, :, :]    # (W+4, 9*Cout2)
                for dx in range(3):
                    t = dy * 3 + dx
                    acc = acc + prow[dx:dx + Wz, t * Cout2:(t + 1) * Cout2]
            y = acc + bc
            if relu2:
                y = jnp.maximum(y, 0.0)
            if has_skip:
                y = y + skip_ref[0, h, :, :]
                if relu_after_skip:
                    y = jnp.maximum(y, 0.0)
            o_ref[0, h, :, :] = y
            return c

        jax.lax.fori_loop(0, Hz, out_row, 0)

    return kernel


def _make_subpixel_kernel(*, H, W, S):
    """Fused subpixel tail (single channel): conv3x3(pad1)+ReLU -> bilinear x S
    -> conv3x3(pad1)+ReLU -> + bilinear(residual).  Everything in one call."""
    SH, SW = S * H, S * W

    def kernel(x_ref, res_ref, rh_ref, rw_ref, w1_ref, b1_ref, w2_ref, b2_ref,
               o_ref, xp_ref, up_ref):
        rh = rh_ref[...]                       # (SH, H)
        rw = rw_ref[...]                       # (SW, W)
        w1 = w1_ref[...]                       # (9, 1)
        w2 = w2_ref[...]                       # (9, 1)

        # conv1 (pad=1) + bias + relu on the current activation
        xp_ref[...] = jnp.zeros_like(xp_ref)
        xp_ref[1:1 + H, 1:1 + W] = x_ref[0, :, :]
        xp = xp_ref[...]
        c1 = jnp.zeros((H, W), jnp.float32)
        for dy in range(3):
            for dx in range(3):
                c1 = c1 + xp[dy:dy + H, dx:dx + W] * w1[dy * 3 + dx:dy * 3 + dx + 1, :]
        c1 = jnp.maximum(c1 + b1_ref[...], 0.0)

        # bilinear upsample (align_corners=False) of the conv1 output
        t1 = jnp.dot(rh, c1, preferred_element_type=jnp.float32)          # (SH, W)
        u = jax.lax.dot_general(t1, rw, (((1,), (1,)), ((), ())),
                                preferred_element_type=jnp.float32)       # (SH, SW)

        # conv2 (pad=1) + bias + relu on the upsampled map
        up_ref[...] = jnp.zeros_like(up_ref)
        up_ref[1:1 + SH, 1:1 + SW] = u
        up = up_ref[...]
        c2 = jnp.zeros((SH, SW), jnp.float32)
        for dy in range(3):
            for dx in range(3):
                c2 = c2 + up[dy:dy + SH, dx:dx + SW] * w2[dy * 3 + dx:dy * 3 + dx + 1, :]
        c2 = jnp.maximum(c2 + b2_ref[...], 0.0)

        # residual_up = bilinear upsample of the network input; final add
        t2 = jnp.dot(rh, res_ref[0, :, :], preferred_element_type=jnp.float32)
        ru = jax.lax.dot_general(t2, rw, (((1,), (1,)), ((), ())),
                                 preferred_element_type=jnp.float32)      # (SH, SW)
        o_ref[0, :, :] = c2 + ru

    return kernel


# ----------------------------------------------------------------------------
# Pallas wrappers
# ----------------------------------------------------------------------------
def conv3x3_valid(x, wcat, b, *, relu=True):
    """3x3 conv, stride 1, padding 0, bias + optional ReLU fused. NHWC in/out."""
    N, H, W, Cin = x.shape
    assert H >= 3 and W >= 3, "spatial dims shrank below kernel size (num_layers too deep)"
    Cout = wcat.shape[1] // 9
    Ho, Wo = H - 2, W - 2
    kernel = _make_conv_valid_kernel(H=H, W=W, Cin=Cin, Cout=Cout, relu=relu)
    return pl.pallas_call(
        kernel,
        out_shape=jax.ShapeDtypeStruct((N, Ho, Wo, Cout), jnp.float32),
        grid=(N,),
        in_specs=[
            pl.BlockSpec((1, H, W, Cin), lambda n: (n, 0, 0, 0)),
            pl.BlockSpec((Cin, 9 * Cout), lambda n: (0, 0)),
            pl.BlockSpec((1, Cout), lambda n: (0, 0)),
        ],
        out_specs=pl.BlockSpec((1, Ho, Wo, Cout), lambda n: (n, 0, 0, 0)),
        scratch_shapes=[pltpu.VMEM((H, W, 9 * Cout), jnp.float32)],
        compiler_params=pltpu.CompilerParams(dimension_semantics=("parallel",)),
    )(x, wcat, b)


def deconv_stage(x, wcat_t, bt, wcat_c, bc, *, relu2, skip=None, relu_after_skip=False):
    """One fused decoder stage (ConvT3x3 pad0 + ReLU + Conv3x3 pad1 [...])."""
    N, H, W, F = x.shape
    Cout2 = wcat_c.shape[1] // 9
    Hz, Wz = H + 2, W + 2
    has_skip = skip is not None
    kernel = _make_deconv_stage_kernel(H=H, W=W, F=F, Cout2=Cout2, relu2=relu2,
                                       has_skip=has_skip,
                                       relu_after_skip=relu_after_skip)
    in_specs = [
        pl.BlockSpec((1, H, W, F), lambda n: (n, 0, 0, 0)),
        pl.BlockSpec((F, 9 * F), lambda n: (0, 0)),
        pl.BlockSpec((1, F), lambda n: (0, 0)),
        pl.BlockSpec((F, 9 * Cout2), lambda n: (0, 0)),
        pl.BlockSpec((1, Cout2), lambda n: (0, 0)),
    ]
    args = [x, wcat_t, bt, wcat_c, bc]
    if has_skip:
        in_specs.append(pl.BlockSpec((1, Hz, Wz, Cout2), lambda n: (n, 0, 0, 0)))
        args.append(skip)
    return pl.pallas_call(
        kernel,
        out_shape=jax.ShapeDtypeStruct((N, Hz, Wz, Cout2), jnp.float32),
        grid=(N,),
        in_specs=in_specs,
        out_specs=pl.BlockSpec((1, Hz, Wz, Cout2), lambda n: (n, 0, 0, 0)),
        scratch_shapes=[pltpu.VMEM((H + 4, W + 4, 9 * F), jnp.float32),
                        pltpu.VMEM((H + 4, W + 4, 9 * Cout2), jnp.float32)],
        compiler_params=pltpu.CompilerParams(dimension_semantics=("parallel",)),
    )(*args)


def subpixel_layer(x, residual, rh, rw, w1, b1, w2, b2):
    """Fused subpixel tail + residual_up add.  x / residual: (N, H, W, 1)."""
    N, H, W, C = x.shape
    assert C == 1  # TODO(synk): multi-channel subpixel/upsample path not needed (input_channels=1)
    SH, SW = rh.shape[0], rw.shape[0]
    S = SH // H
    kernel = _make_subpixel_kernel(H=H, W=W, S=S)
    out = pl.pallas_call(
        kernel,
        out_shape=jax.ShapeDtypeStruct((N, SH, SW), jnp.float32),
        grid=(N,),
        in_specs=[
            pl.BlockSpec((1, H, W), lambda n: (n, 0, 0)),
            pl.BlockSpec((1, H, W), lambda n: (n, 0, 0)),
            pl.BlockSpec((SH, H), lambda n: (0, 0)),
            pl.BlockSpec((SW, W), lambda n: (0, 0)),
            pl.BlockSpec((9, 1), lambda n: (0, 0)),
            pl.BlockSpec((1, 1), lambda n: (0, 0)),
            pl.BlockSpec((9, 1), lambda n: (0, 0)),
            pl.BlockSpec((1, 1), lambda n: (0, 0)),
        ],
        out_specs=pl.BlockSpec((1, SH, SW), lambda n: (n, 0, 0)),
        scratch_shapes=[pltpu.VMEM((H + 2, W + 2), jnp.float32),
                        pltpu.VMEM((SH + 2, SW + 2), jnp.float32)],
        compiler_params=pltpu.CompilerParams(dimension_semantics=("parallel",)),
    )(x[..., 0], residual[..., 0], rh, rw, w1, b1, w2, b2)
    return out[:, :, :, None]


def resize_matrix(n_in, n_out):
    """1-D interpolation matrix matching PyTorch bilinear, align_corners=False."""
    ratio = n_in / n_out
    dst = np.arange(n_out)
    src = (dst + 0.5) * ratio - 0.5
    src = np.maximum(src, 0.0)
    i0 = np.minimum(np.floor(src).astype(np.int64), n_in - 1)
    i1 = np.minimum(i0 + 1, n_in - 1)
    lam = (src - i0).astype(np.float32)
    R = np.zeros((n_out, n_in), np.float32)
    np.add.at(R, (dst, i0), 1.0 - lam)
    np.add.at(R, (dst, i1), lam)
    return jnp.asarray(R)


# ----------------------------------------------------------------------------
# Parameters (deterministic synthetic init, PyTorch-default-like uniform)
# ----------------------------------------------------------------------------
def _uniform(key, shape, fan_in):
    bound = 1.0 / math.sqrt(fan_in)
    return jax.random.uniform(key, shape, jnp.float32, -bound, bound)


def init_params(key, num_layers, num_features, input_channels):
    params = {"conv": [], "deconv": [], "subpixel": None}

    def nk():
        nonlocal key
        key, sub = jax.random.split(key)
        return sub

    cin = input_channels
    for _ in range(num_layers):
        cout = num_features
        fan = cin * 9
        w = _uniform(nk(), (cout, cin, 3, 3), fan)       # PyTorch Conv2d OIHW
        b = _uniform(nk(), (1, cout), fan)
        params["conv"].append((w, b))
        cin = cout

    for i in range(num_layers):
        fan_t = num_features * 9
        wt = _uniform(nk(), (num_features, num_features, 3, 3), fan_t)   # ConvT (Cin,Cout,kh,kw)
        bt = _uniform(nk(), (1, num_features), fan_t)
        conv_out = num_features if i < num_layers - 1 else input_channels
        fan_c = num_features * 9
        wc = _uniform(nk(), (conv_out, num_features, 3, 3), fan_c)
        bc = _uniform(nk(), (1, conv_out), fan_c)
        params["deconv"].append((wt, bt, wc, bc))

    fan_sp = input_channels * 9
    w1 = _uniform(nk(), (input_channels, input_channels, 3, 3), fan_sp)
    b1 = _uniform(nk(), (1, input_channels), fan_sp)
    w2 = _uniform(nk(), (input_channels, input_channels, 3, 3), fan_sp)
    b2 = _uniform(nk(), (1, input_channels), fan_sp)
    params["subpixel"] = (w1, b1, w2, b2)
    return params


def prepare_params(params):
    """One-time repack of PyTorch-layout weights into kernel-ready matrices.

    Conv2d OIHW (co,ci,kh,kw)        -> Wcat[ci, (dy*3+dx)*co_dim + co]
    ConvTranspose2d (ci,co,kh,kw)    -> flip kh,kw, same flattening (full-conv equiv.)
    Subpixel 1x1-channel convs       -> (9,1) tap vectors + (1,1) biases
    """
    prep = {"conv": [], "deconv": [], "subpixel": None}
    for (w_pt, b) in params["conv"]:
        cout, cin = w_pt.shape[0], w_pt.shape[1]
        wcat = jnp.transpose(w_pt, (1, 2, 3, 0)).reshape(cin, 9 * cout)
        prep["conv"].append((wcat, b.reshape(1, cout)))
    for (wt_pt, bt, wc_pt, bc) in params["deconv"]:
        f = wt_pt.shape[0]
        wcat_t = jnp.transpose(wt_pt[:, :, ::-1, ::-1], (0, 2, 3, 1)).reshape(f, 9 * f)
        cout2, fin = wc_pt.shape[0], wc_pt.shape[1]
        wcat_c = jnp.transpose(wc_pt, (1, 2, 3, 0)).reshape(fin, 9 * cout2)
        prep["deconv"].append((wcat_t, bt.reshape(1, f), wcat_c, bc.reshape(1, cout2)))
    w1, b1, w2, b2 = params["subpixel"]
    prep["subpixel"] = (w1[0, 0].reshape(9, 1), b1.reshape(1, 1),
                        w2[0, 0].reshape(9, 1), b2.reshape(1, 1))
    return prep


# ----------------------------------------------------------------------------
# Forward pass (mirrors YNet30_test_dem_v1.forward, use_climatology=False)
# ----------------------------------------------------------------------------
def ynet_forward(prepared, x_nchw, rh, rw, *, num_layers):
    x = jnp.transpose(x_nchw, (0, 2, 3, 1)).astype(jnp.float32)   # NCHW -> NHWC
    N, H, W, C = x.shape
    assert H - 2 * num_layers >= 1 and W - 2 * num_layers >= 1, \
        "num_layers too deep for this spatial size (encoder shrinks by 2/layer)"
    residual = x

    # ---- encoder: num_layers x (conv3x3 pad0 + ReLU), save every other feat
    conv_feats = []
    for i in range(num_layers):
        wcat, b = prepared["conv"][i]
        x = conv3x3_valid(x, wcat, b, relu=True)
        if (i + 1) % 2 == 0 and len(conv_feats) < math.ceil(num_layers / 2) - 1:
            conv_feats.append(x)

    # ---- decoder: num_layers fused stages; skip adds and the trailing
    #      "x + residual; ReLU" are fused into the corresponding stage kernel.
    conv_feats_idx = 0
    for i in range(num_layers):
        wcat_t, bt, wcat_c, bc = prepared["deconv"][i]
        is_last = i == num_layers - 1
        use_skip = (i + 1 + num_layers) % 2 == 0 and conv_feats_idx < len(conv_feats)
        assert not (use_skip and is_last)   # never coincides (see module structure)
        if use_skip:
            skip = conv_feats[-(conv_feats_idx + 1)]
            conv_feats_idx += 1
        elif is_last:
            skip = residual                 # fused "x = relu(x + residual)"
        else:
            skip = None
        x = deconv_stage(x, wcat_t, bt, wcat_c, bc,
                         relu2=not is_last,
                         skip=skip,
                         relu_after_skip=skip is not None)

    # ---- subpixel tail + residual_up, fully fused (includes both bilinears)
    w1, b1, w2, b2 = prepared["subpixel"]
    out = subpixel_layer(x, residual, rh, rw, w1, b1, w2, b2)     # (N, SH, SW, 1)

    # TODO(synk): fusion_layer branch (use_climatology=True, x2) not exercised here.
    return jnp.transpose(out, (0, 3, 1, 2))                        # NHWC -> NCHW


# ----------------------------------------------------------------------------
if __name__ == "__main__":
    NUM_LAYERS = 3       # module default is 15; smaller for fast test, same code path
    NUM_FEATURES = 16
    IN_CH = 1
    SCALE = 4
    N, H, W = 2, 16, 16

    key = jax.random.PRNGKey(0)
    pkey, xkey = jax.random.split(key)
    params = init_params(pkey, NUM_LAYERS, NUM_FEATURES, IN_CH)
    prepared = prepare_params(params)              # weight repacking hoisted (once)
    x = jax.random.normal(xkey, (N, IN_CH, H, W), jnp.float32)

    rh = resize_matrix(H, H * SCALE)
    rw = resize_matrix(W, W * SCALE)

    fwd = jax.jit(functools.partial(ynet_forward, num_layers=NUM_LAYERS))
    out = fwd(prepared, x, rh, rw)
    out = jax.block_until_ready(out)

    assert out.shape == (N, IN_CH, H * SCALE, W * SCALE), out.shape
    assert bool(jnp.all(jnp.isfinite(out)))
    print("KERNEL_OK")
</pallas_src>

<mosaic_0001>
module attributes {stable_mosaic.version = 11 : i64} {
  func.func @kernel(%arg0: i32, %arg1: memref<1x12x12x16xf32, #tpu.memory_space<vmem>>, %arg2: memref<16x144xf32, #tpu.memory_space<vmem>>, %arg3: memref<1x16xf32, #tpu.memory_space<vmem>>, %arg4: memref<1x10x10x16xf32, #tpu.memory_space<vmem>>, %arg5: memref<12x12x144xf32, #tpu.memory_space<vmem>>) attributes {dimension_semantics = [#tpu.dimension_semantics<parallel>], iteration_bounds = array<i64: 2>, scalar_prefetch = 0 : i64, scratch_operands = 1 : i64, tpu.core_type = #tpu.core_type<tc>, window_params = [{transform_indices = @transform_0, window_bounds = array<i64: 1, 12, 12, 16>}, {pipeline_mode = #tpu.pipeline_mode<synchronous>, transform_indices = @transform_1, window_bounds = array<i64: 16, 144>}, {pipeline_mode = #tpu.pipeline_mode<synchronous>, transform_indices = @transform_2, window_bounds = array<i64: 1, 16>}, {transform_indices = @transform_3, window_bounds = array<i64: 1, 10, 10, 16>}]} {
    %c0 = arith.constant 0 : index
    %c0_0 = arith.constant 0 : index
    %0 = vector.load %arg2[%c0, %c0_0] : memref<16x144xf32, #tpu.memory_space<vmem>>, vector<16x144xf32>
    %c0_1 = arith.constant 0 : index
    %c0_2 = arith.constant 0 : index
    %1 = vector.load %arg3[%c0_1, %c0_2] : memref<1x16xf32, #tpu.memory_space<vmem>>, vector<1x16xf32>
    %c0_i32 = arith.constant 0 : i32
    %c12_i32 = arith.constant 12 : i32
    %2 = arith.addi %c0_i32, %c12_i32 : i32
    %c1_i32 = arith.constant 1 : i32
    scf.for %arg6 = %c0_i32 to %2 step %c1_i32  : i32 {
      %c0_7 = arith.constant 0 : index
      %4 = arith.index_cast %arg6 : i32 to index
      %c0_8 = arith.constant 0 : index
      %c0_9 = arith.constant 0 : index
      %5 = vector.load %arg1[%c0_7, %4, %c0_8, %c0_9] : memref<1x12x12x16xf32, #tpu.memory_space<vmem>>, vector<1x1x12x16xf32>
      %6 = vector.shape_cast %5 : vector<1x1x12x16xf32> to vector<12x16xf32>
      %cst = arith.constant dense<0.000000e+00> : vector<12x144xf32>
      %7 = tpu.matmul %6, %0, %cst {dimension_numbers = #tpu.dot_dimension_numbers<[1], [0], [0], [1], [0, 0, 1, 1], [], []>} : vector<12x16xf32>, vector<16x144xf32>, vector<12x144xf32> -> vector<12x144xf32>
      %8 = arith.index_cast %arg6 : i32 to index
      %c0_10 = arith.constant 0 : index
      %c0_11 = arith.constant 0 : index
      %9 = vector.load %arg5[%8, %c0_10, %c0_11] : memref<12x12x144xf32, #tpu.memory_space<vmem>>, vector<1x12x144xf32>
      %10 = vector.shape_cast %9 : vector<1x12x144xf32> to vector<12x144xf32>
      %11 = vector.shape_cast %7 : vector<12x144xf32> to vector<1x12x144xf32>
      tpu.vector_store %arg5[%8, %c0_10, %c0_11], %11 {strides = array<i32>} : memref<12x12x144xf32, #tpu.memory_space<vmem>>, vector<1x12x144xf32>,
    }
    %c12_i32_3 = arith.constant 12 : i32
    %c0_i32_4 = arith.constant 0 : i32
    %c10_i32 = arith.constant 10 : i32
    %3 = arith.addi %c0_i32_4, %c10_i32 : i32
    %c1_i32_5 = arith.constant 1 : i32
    scf.for %arg6 = %c0_i32_4 to %3 step %c1_i32_5  : i32 {
      %cst = arith.constant 0.000000e+00 : f32
      %4 = vector.broadcast %cst : f32 to vector<10x16xf32>
      %c0_i32_7 = arith.constant 0 : i32
      %5 = arith.addi %arg6, %c0_i32_7 : i32
      %6 = arith.index_cast %5 : i32 to index
      %c0_8 = arith.constant 0 : index
      %c0_9 = arith.constant 0 : index
      %7 = vector.load %arg5[%6, %c0_8, %c0_9] : memref<12x12x144xf32, #tpu.memory_space<vmem>>, vector<1x12x144xf32>
      %8 = vector.shape_cast %7 : vector<1x12x144xf32> to vector<12x144xf32>
      %9 = vector.extract_strided_slice %8 {offsets = [0, 0], sizes = [10, 16], strides = [1, 1]} : vector<12x144xf32> to vector<10x16xf32>
      %10 = arith.addf %4, %9 : vector<10x16xf32>
      %11 = vector.extract_strided_slice %8 {offsets = [1, 16], sizes = [10, 16], strides = [1, 1]} : vector<12x144xf32> to vector<10x16xf32>
      %12 = arith.addf %10, %11 : vector<10x16xf32>
      %13 = vector.extract_strided_slice %8 {offsets = [2, 32], sizes = [10, 16], strides = [1, 1]} : vector<12x144xf32> to vector<10x16xf32>
      %14 = arith.addf %12, %13 : vector<10x16xf32>
      %c1_i32_10 = arith.constant 1 : i32
      %15 = arith.addi %arg6, %c1_i32_10 : i32
      %16 = arith.index_cast %15 : i32 to index
      %c0_11 = arith.constant 0 : index
      %c0_12 = arith.constant 0 : index
      %17 = vector.load %arg5[%16, %c0_11, %c0_12] : memref<12x12x144xf32, #tpu.memory_space<vmem>>, vector<1x12x144xf32>
      %18 = vector.shape_cast %17 : vector<1x12x144xf32> to vector<12x144xf32>
      %19 = vector.extract_strided_slice %18 {offsets = [0, 48], sizes = [10, 16], strides = [1, 1]} : vector<12x144xf32> to vector<10x16xf32>
      %20 = arith.addf %14, %19 : vector<10x16xf32>
      %21 = vector.extract_strided_slice %18 {offsets = [1, 64], sizes = [10, 16], strides = [1, 1]} : vector<12x144xf32> to vector<10x16xf32>
      %22 = arith.addf %20, %21 : vector<10x16xf32>
      %23 = vector.extract_strided_slice %18 {offsets = [2, 80], sizes = [10, 16], strides = [1, 1]} : vector<12x144xf32> to vector<10x16xf32>
      %24 = arith.addf %22, %23 : vector<10x16xf32>
      %c2_i32 = arith.constant 2 : i32
      %25 = arith.addi %arg6, %c2_i32 : i32
      %26 = arith.index_cast %25 : i32 to index
      %c0_13 = arith.constant 0 : index
      %c0_14 = arith.constant 0 : index
      %27 = vector.load %arg5[%26, %c0_13, %c0_14] : memref<12x12x144xf32, #tpu.memory_space<vmem>>, vector<1x12x144xf32>
      %28 = vector.shape_cast %27 : vector<1x12x144xf32> to vector<12x144xf32>
      %29 = vector.extract_strided_slice %28 {offsets = [0, 96], sizes = [10, 16], strides = [1, 1]} : vector<12x144xf32> to vector<10x16xf32>
      %30 = arith.addf %24, %29 : vector<10x16xf32>
      %31 = vector.extract_strided_slice %28 {offsets = [1, 112], sizes = [10, 16], strides = [1, 1]} : vector<12x144xf32> to vector<10x16xf32>
      %32 = arith.addf %30, %31 : vector<10x16xf32>
      %33 = vector.extract_strided_slice %28 {offsets = [2, 128], sizes = [10, 16], strides = [1, 1]} : vector<12x144xf32> to vector<10x16xf32>
      %34 = arith.addf %32, %33 : vector<10x16xf32>
      %35 = vector.broadcast %1 : vector<1x16xf32> to vector<10x16xf32>
      %36 = arith.addf %34, %35 : vector<10x16xf32>
      %cst_15 = arith.constant 0.000000e+00 : f32
      %37 = vector.broadcast %cst_15 : f32 to vector<10x16xf32>
      %38 = arith.maximumf %36, %37 : vector<10x16xf32>
      %c0_16 = arith.constant 0 : index
      %39 = arith.index_cast %arg6 : i32 to index
      %c0_17 = arith.constant 0 : index
      %c0_18 = arith.constant 0 : index
      %40 = vector.load %arg4[%c0_16, %39, %c0_17, %c0_18] : memref<1x10x10x16xf32, #tpu.memory_space<vmem>>, vector<1x1x10x16xf32>
      %41 = vector.shape_cast %40 : vector<1x1x10x16xf32> to vector<10x16xf32>
      %42 = vector.shape_cast %38 : vector<10x16xf32> to vector<1x1x10x16xf32>
      tpu.vector_store %arg4[%c0_16, %39, %c0_17, %c0_18], %42 {strides = array<i32>} : memref<1x10x10x16xf32, #tpu.memory_space<vmem>>, vector<1x1x10x16xf32>,
    }
    %c10_i32_6 = arith.constant 10 : i32
    return
  }
  func.func @transform_0(%arg0: i32) -> (i32, i32, i32, i32) {
    %c0_i32 = arith.constant 0 : i32
    %c0_i32_0 = arith.constant 0 : i32
    %c0_i32_1 = arith.constant 0 : i32
    %c0_i32_2 = arith.constant 0 : i32
    return %arg0, %c0_i32, %c0_i32_0, %c0_i32_1 : i32, i32, i32, i32
  }
  func.func @transform_1(%arg0: i32) -> (i32, i32) {
    %c0_i32 = arith.constant 0 : i32
    %c0_i32_0 = arith.constant 0 : i32
    %c0_i32_1 = arith.constant 0 : i32
    return %c0_i32, %c0_i32_0 : i32, i32
  }
  func.func @transform_2(%arg0: i32) -> (i32, i32) {
    %c0_i32 = arith.constant 0 : i32
    %c0_i32_0 = arith.constant 0 : i32
    %c0_i32_1 = arith.constant 0 : i32
    return %c0_i32, %c0_i32_0 : i32, i32
  }
  func.func @transform_3(%arg0: i32) -> (i32, i32, i32, i32) {
    %c0_i32 = arith.constant 0 : i32
    %c0_i32_0 = arith.constant 0 : i32
    %c0_i32_1 = arith.constant 0 : i32
    %c0_i32_2 = arith.constant 0 : i32
    return %arg0, %c0_i32, %c0_i32_0, %c0_i32_1 : i32, i32, i32, i32
  }
}

module attributes {stable_mosaic.version = 11 : i64} {
  func.func @kernel(%arg0: i32, %arg1: memref<1x14x14x16xf32, #tpu.memory_space<vmem>>, %arg2: memref<16x144xf32, #tpu.memory_space<vmem>>, %arg3: memref<1x16xf32, #tpu.memory_space<vmem>>, %arg4: memref<1x12x12x16xf32, #tpu.memory_space<vmem>>, %arg5: memref<14x14x144xf32, #tpu.memory_space<vmem>>) attributes {dimension_semantics = [#tpu.dimension_semantics<parallel>], iteration_bounds = array<i64: 2>, scalar_prefetch = 0 : i64, scratch_operands = 1 : i64, tpu.core_type = #tpu.core_type<tc>, window_params = [{transform_indices = @transform_0, window_bounds = array<i64: 1, 14, 14, 16>}, {pipeline_mode = #tpu.pipeline_mode<synchronous>, transform_indices = @transform_1, window_bounds = array<i64: 16, 144>}, {pipeline_mode = #tpu.pipeline_mode<synchronous>, transform_indices = @transform_2, window_bounds = array<i64: 1, 16>}, {transform_indices = @transform_3, window_bounds = array<i64: 1, 12, 12, 16>}]} {
    %c0 = arith.constant 0 : index
    %c0_0 = arith.constant 0 : index
    %0 = vector.load %arg2[%c0, %c0_0] : memref<16x144xf32, #tpu.memory_space<vmem>>, vector<16x144xf32>
    %c0_1 = arith.constant 0 : index
    %c0_2 = arith.constant 0 : index
    %1 = vector.load %arg3[%c0_1, %c0_2] : memref<1x16xf32, #tpu.memory_space<vmem>>, vector<1x16xf32>
    %c0_i32 = arith.constant 0 : i32
    %c14_i32 = arith.constant 14 : i32
    %2 = arith.addi %c0_i32, %c14_i32 : i32
    %c1_i32 = arith.constant 1 : i32
    scf.for %arg6 = %c0_i32 to %2 step %c1_i32  : i32 {
      %c0_7 = arith.constant 0 : index
      %4 = arith.index_cast %arg6 : i32 to index
      %c0_8 = arith.constant 0 : index
      %c0_9 = arith.constant 0 : index
      %5 = vector.load %arg1[%c0_7, %4, %c0_8, %c0_9] : memref<1x14x14x16xf32, #tpu.memory_space<vmem>>, vector<1x1x14x16xf32>
      %6 = vector.shape_cast %5 : vector<1x1x14x16xf32> to vector<14x16xf32>
      %cst = arith.constant dense<0.000000e+00> : vector<14x144xf32>
      %7 = tpu.matmul %6, %0, %cst {dimension_numbers = #tpu.dot_dimension_numbers<[1], [0], [0], [1], [0, 0, 1, 1], [], []>} : vector<14x16xf32>, vector<16x144xf32>, vector<14x144xf32> -> vector<14x144xf32>
      %8 = arith.index_cast %arg6 : i32 to index
      %c0_10 = arith.constant 0 : index
      %c0_11 = arith.constant 0 : index
      %9 = vector.load %arg5[%8, %c0_10, %c0_11] : memref<14x14x144xf32, #tpu.memory_space<vmem>>, vector<1x14x144xf32>
      %10 = vector.shape_cast %9 : vector<1x14x144xf32> to vector<14x144xf32>
      %11 = vector.shape_cast %7 : vector<14x144xf32> to vector<1x14x144xf32>
      tpu.vector_store %arg5[%8, %c0_10, %c0_11], %11 {strides = array<i32>} : memref<14x14x144xf32, #tpu.memory_space<vmem>>, vector<1x14x144xf32>,
    }
    %c14_i32_3 = arith.constant 14 : i32
    %c0_i32_4 = arith.constant 0 : i32
    %c12_i32 = arith.constant 12 : i32
    %3 = arith.addi %c0_i32_4, %c12_i32 : i32
    %c1_i32_5 = arith.constant 1 : i32
    scf.for %arg6 = %c0_i32_4 to %3 step %c1_i32_5  : i32 {
      %cst = arith.constant 0.000000e+00 : f32
      %4 = vector.broadcast %cst : f32 to vector<12x16xf32>
      %c0_i32_7 = arith.constant 0 : i32
      %5 = arith.addi %arg6, %c0_i32_7 : i32
      %6 = arith.index_cast %5 : i32 to index
      %c0_8 = arith.constant 0 : index
      %c0_9 = arith.constant 0 : index
      %7 = vector.load %arg5[%6, %c0_8, %c0_9] : memref<14x14x144xf32, #tpu.memory_space<vmem>>, vector<1x14x144xf32>
      %8 = vector.shape_cast %7 : vector<1x14x144xf32> to vector<14x144xf32>
      %9 = vector.extract_strided_slice %8 {offsets = [0, 0], sizes = [12, 16], strides = [1, 1]} : vector<14x144xf32> to vector<12x16xf32>
      %10 = arith.addf %4, %9 : vector<12x16xf32>
      %11 = vector.extract_strided_slice %8 {offsets = [1, 16], sizes = [12, 16], strides = [1, 1]} : vector<14x144xf32> to vector<12x16xf32>
      %12 = arith.addf %10, %11 : vector<12x16xf32>
      %13 = vector.extract_strided_slice %8 {offsets = [2, 32], sizes = [12, 16], strides = [1, 1]} : vector<14x144xf32> to vector<12x16xf32>
      %14 = arith.addf %12, %13 : vector<12x16xf32>
      %c1_i32_10 = arith.constant 1 : i32
      %15 = arith.addi %arg6, %c1_i32_10 : i32
      %16 = arith.index_cast %15 : i32 to index
      %c0_11 = arith.constant 0 : index
      %c0_12 = arith.constant 0 : index
      %17 = vector.load %arg5[%16, %c0_11, %c0_12] : memref<14x14x144xf32, #tpu.memory_space<vmem>>, vector<1x14x144xf32>
      %18 = vector.shape_cast %17 : vector<1x14x144xf32> to vector<14x144xf32>
      %19 = vector.extract_strided_slice %18 {offsets = [0, 48], sizes = [12, 16], strides = [1, 1]} : vector<14x144xf32> to vector<12x16xf32>
      %20 = arith.addf %14, %19 : vector<12x16xf32>
      %21 = vector.extract_strided_slice %18 {offsets = [1, 64], sizes = [12, 16], strides = [1, 1]} : vector<14x144xf32> to vector<12x16xf32>
      %22 = arith.addf %20, %21 : vector<12x16xf32>
      %23 = vector.extract_strided_slice %18 {offsets = [2, 80], sizes = [12, 16], strides = [1, 1]} : vector<14x144xf32> to vector<12x16xf32>
      %24 = arith.addf %22, %23 : vector<12x16xf32>
      %c2_i32 = arith.constant 2 : i32
      %25 = arith.addi %arg6, %c2_i32 : i32
      %26 = arith.index_cast %25 : i32 to index
      %c0_13 = arith.constant 0 : index
      %c0_14 = arith.constant 0 : index
      %27 = vector.load %arg5[%26, %c0_13, %c0_14] : memref<14x14x144xf32, #tpu.memory_space<vmem>>, vector<1x14x144xf32>
      %28 = vector.shape_cast %27 : vector<1x14x144xf32> to vector<14x144xf32>
      %29 = vector.extract_strided_slice %28 {offsets = [0, 96], sizes = [12, 16], strides = [1, 1]} : vector<14x144xf32> to vector<12x16xf32>
      %30 = arith.addf %24, %29 : vector<12x16xf32>
      %31 = vector.extract_strided_slice %28 {offsets = [1, 112], sizes = [12, 16], strides = [1, 1]} : vector<14x144xf32> to vector<12x16xf32>
      %32 = arith.addf %30, %31 : vector<12x16xf32>
      %33 = vector.extract_strided_slice %28 {offsets = [2, 128], sizes = [12, 16], strides = [1, 1]} : vector<14x144xf32> to vector<12x16xf32>
      %34 = arith.addf %32, %33 : vector<12x16xf32>
      %35 = vector.broadcast %1 : vector<1x16xf32> to vector<12x16xf32>
      %36 = arith.addf %34, %35 : vector<12x16xf32>
      %cst_15 = arith.constant 0.000000e+00 : f32
      %37 = vector.broadcast %cst_15 : f32 to vector<12x16xf32>
      %38 = arith.maximumf %36, %37 : vector<12x16xf32>
      %c0_16 = arith.constant 0 : index
      %39 = arith.index_cast %arg6 : i32 to index
      %c0_17 = arith.constant 0 : index
      %c0_18 = arith.constant 0 : index
      %40 = vector.load %arg4[%c0_16, %39, %c0_17, %c0_18] : memref<1x12x12x16xf32, #tpu.memory_space<vmem>>, vector<1x1x12x16xf32>
      %41 = vector.shape_cast %40 : vector<1x1x12x16xf32> to vector<12x16xf32>
      %42 = vector.shape_cast %38 : vector<12x16xf32> to vector<1x1x12x16xf32>
      tpu.vector_store %arg4[%c0_16, %39, %c0_17, %c0_18], %42 {strides = array<i32>} : memref<1x12x12x16xf32, #tpu.memory_space<vmem>>, vector<1x1x12x16xf32>,
    }
    %c12_i32_6 = arith.constant 12 : i32
    return
  }
  func.func @transform_0(%arg0: i32) -> (i32, i32, i32, i32) {
    %c0_i32 = arith.constant 0 : i32
    %c0_i32_0 = arith.constant 0 : i32
    %c0_i32_1 = arith.constant 0 : i32
    %c0_i32_2 = arith.constant 0 : i32
    return %arg0, %c0_i32, %c0_i32_0, %c0_i32_1 : i32, i32, i32, i32
  }
  func.func @transform_1(%arg0: i32) -> (i32, i32) {
    %c0_i32 = arith.constant 0 : i32
    %c0_i32_0 = arith.constant 0 : i32
    %c0_i32_1 = arith.constant 0 : i32
    return %c0_i32, %c0_i32_0 : i32, i32
  }
  func.func @transform_2(%arg0: i32) -> (i32, i32) {
    %c0_i32 = arith.constant 0 : i32
    %c0_i32_0 = arith.constant 0 : i32
    %c0_i32_1 = arith.constant 0 : i32
    return %c0_i32, %c0_i32_0 : i32, i32
  }
  func.func @transform_3(%arg0: i32) -> (i32, i32, i32, i32) {
    %c0_i32 = arith.constant 0 : i32
    %c0_i32_0 = arith.constant 0 : i32
    %c0_i32_1 = arith.constant 0 : i32
    %c0_i32_2 = arith.constant 0 : i32
    return %arg0, %c0_i32, %c0_i32_0, %c0_i32_1 : i32, i32, i32, i32
  }
}

module attributes {stable_mosaic.version = 11 : i64} {
  func.func @kernel(%arg0: i32, %arg1: memref<1x16x16x1xf32, #tpu.memory_space<vmem>>, %arg2: memref<1x144xf32, #tpu.memory_space<vmem>>, %arg3: memref<1x16xf32, #tpu.memory_space<vmem>>, %arg4: memref<1x14x14x16xf32, #tpu.memory_space<vmem>>, %arg5: memref<16x16x144xf32, #tpu.memory_space<vmem>>) attributes {dimension_semantics = [#tpu.dimension_semantics<parallel>], iteration_bounds = array<i64: 2>, scalar_prefetch = 0 : i64, scratch_operands = 1 : i64, tpu.core_type = #tpu.core_type<tc>, window_params = [{transform_indices = @transform_0, window_bounds = array<i64: 1, 16, 16, 1>}, {pipeline_mode = #tpu.pipeline_mode<synchronous>, transform_indices = @transform_1, window_bounds = array<i64: 1, 144>}, {pipeline_mode = #tpu.pipeline_mode<synchronous>, transform_indices = @transform_2, window_bounds = array<i64: 1, 16>}, {transform_indices = @transform_3, window_bounds = array<i64: 1, 14, 14, 16>}]} {
    %c0 = arith.constant 0 : index
    %c0_0 = arith.constant 0 : index
    %0 = vector.load %arg2[%c0, %c0_0] : memref<1x144xf32, #tpu.memory_space<vmem>>, vector<1x144xf32>
    %c0_1 = arith.constant 0 : index
    %c0_2 = arith.constant 0 : index
    %1 = vector.load %arg3[%c0_1, %c0_2] : memref<1x16xf32, #tpu.memory_space<vmem>>, vector<1x16xf32>
    %c0_i32 = arith.constant 0 : i32
    %c16_i32 = arith.constant 16 : i32
    %2 = arith.addi %c0_i32, %c16_i32 : i32
    %c1_i32 = arith.constant 1 : i32
    scf.for %arg6 = %c0_i32 to %2 step %c1_i32  : i32 {
      %c0_7 = arith.constant 0 : index
      %4 = arith.index_cast %arg6 : i32 to index
      %c0_8 = arith.constant 0 : index
      %c0_9 = arith.constant 0 : index
      %5 = vector.load %arg1[%c0_7, %4, %c0_8, %c0_9] : memref<1x16x16x1xf32, #tpu.memory_space<vmem>>, vector<1x1x16x1xf32>
      %6 = vector.shape_cast %5 : vector<1x1x16x1xf32> to vector<16x1xf32>
      %7 = vector.broadcast %6 : vector<16x1xf32> to vector<16x144xf32>
      %8 = vector.broadcast %0 : vector<1x144xf32> to vector<16x144xf32>
      %9 = arith.mulf %7, %8 : vector<16x144xf32>
      %10 = arith.index_cast %arg6 : i32 to index
      %c0_10 = arith.constant 0 : index
      %c0_11 = arith.constant 0 : index
      %11 = vector.load %arg5[%10, %c0_10, %c0_11] : memref<16x16x144xf32, #tpu.memory_space<vmem>>, vector<1x16x144xf32>
      %12 = vector.shape_cast %11 : vector<1x16x144xf32> to vector<16x144xf32>
      %13 = vector.shape_cast %9 : vector<16x144xf32> to vector<1x16x144xf32>
      tpu.vector_store %arg5[%10, %c0_10, %c0_11], %13 {strides = array<i32>} : memref<16x16x144xf32, #tpu.memory_space<vmem>>, vector<1x16x144xf32>,
    }
    %c16_i32_3 = arith.constant 16 : i32
    %c0_i32_4 = arith.constant 0 : i32
    %c14_i32 = arith.constant 14 : i32
    %3 = arith.addi %c0_i32_4, %c14_i32 : i32
    %c1_i32_5 = arith.constant 1 : i32
    scf.for %arg6 = %c0_i32_4 to %3 step %c1_i32_5  : i32 {
      %cst = arith.constant 0.000000e+00 : f32
      %4 = vector.broadcast %cst : f32 to vector<14x16xf32>
      %c0_i32_7 = arith.constant 0 : i32
      %5 = arith.addi %arg6, %c0_i32_7 : i32
      %6 = arith.index_cast %5 : i32 to index
      %c0_8 = arith.constant 0 : index
      %c0_9 = arith.constant 0 : index
      %7 = vector.load %arg5[%6, %c0_8, %c0_9] : memref<16x16x144xf32, #tpu.memory_space<vmem>>, vector<1x16x144xf32>
      %8 = vector.shape_cast %7 : vector<1x16x144xf32> to vector<16x144xf32>
      %9 = vector.extract_strided_slice %8 {offsets = [0, 0], sizes = [14, 16], strides = [1, 1]} : vector<16x144xf32> to vector<14x16xf32>
      %10 = arith.addf %4, %9 : vector<14x16xf32>
      %11 = vector.extract_strided_slice %8 {offsets = [1, 16], sizes = [14, 16], strides = [1, 1]} : vector<16x144xf32> to vector<14x16xf32>
      %12 = arith.addf %10, %11 : vector<14x16xf32>
      %13 = vector.extract_strided_slice %8 {offsets = [2, 32], sizes = [14, 16], strides = [1, 1]} : vector<16x144xf32> to vector<14x16xf32>
      %14 = arith.addf %12, %13 : vector<14x16xf32>
      %c1_i32_10 = arith.constant 1 : i32
      %15 = arith.addi %arg6, %c1_i32_10 : i32
      %16 = arith.index_cast %15 : i32 to index
      %c0_11 = arith.constant 0 : index
      %c0_12 = arith.constant 0 : index
      %17 = vector.load %arg5[%16, %c0_11, %c0_12] : memref<16x16x144xf32, #tpu.memory_space<vmem>>, vector<1x16x144xf32>
      %18 = vector.shape_cast %17 : vector<1x16x144xf32> to vector<16x144xf32>
      %19 = vector.extract_strided_slice %18 {offsets = [0, 48], sizes = [14, 16], strides = [1, 1]} : vector<16x144xf32> to vector<14x16xf32>
      %20 = arith.addf %14, %19 : vector<14x16xf32>
      %21 = vector.extract_strided_slice %18 {offsets = [1, 64], sizes = [14, 16], strides = [1, 1]} : vector<16x144xf32> to vector<14x16xf32>
      %22 = arith.addf %20, %21 : vector<14x16xf32>
      %23 = vector.extract_strided_slice %18 {offsets = [2, 80], sizes = [14, 16], strides = [1, 1]} : vector<16x144xf32> to vector<14x16xf32>
      %24 = arith.addf %22, %23 : vector<14x16xf32>
      %c2_i32 = arith.constant 2 : i32
      %25 = arith.addi %arg6, %c2_i32 : i32
      %26 = arith.index_cast %25 : i32 to index
      %c0_13 = arith.constant 0 : index
      %c0_14 = arith.constant 0 : index
      %27 = vector.load %arg5[%26, %c0_13, %c0_14] : memref<16x16x144xf32, #tpu.memory_space<vmem>>, vector<1x16x144xf32>
      %28 = vector.shape_cast %27 : vector<1x16x144xf32> to vector<16x144xf32>
      %29 = vector.extract_strided_slice %28 {offsets = [0, 96], sizes = [14, 16], strides = [1, 1]} : vector<16x144xf32> to vector<14x16xf32>
      %30 = arith.addf %24, %29 : vector<14x16xf32>
      %31 = vector.extract_strided_slice %28 {offsets = [1, 112], sizes = [14, 16], strides = [1, 1]} : vector<16x144xf32> to vector<14x16xf32>
      %32 = arith.addf %30, %31 : vector<14x16xf32>
      %33 = vector.extract_strided_slice %28 {offsets = [2, 128], sizes = [14, 16], strides = [1, 1]} : vector<16x144xf32> to vector<14x16xf32>
      %34 = arith.addf %32, %33 : vector<14x16xf32>
      %35 = vector.broadcast %1 : vector<1x16xf32> to vector<14x16xf32>
      %36 = arith.addf %34, %35 : vector<14x16xf32>
      %cst_15 = arith.constant 0.000000e+00 : f32
      %37 = vector.broadcast %cst_15 : f32 to vector<14x16xf32>
      %38 = arith.maximumf %36, %37 : vector<14x16xf32>
      %c0_16 = arith.constant 0 : index
      %39 = arith.index_cast %arg6 : i32 to index
      %c0_17 = arith.constant 0 : index
      %c0_18 = arith.constant 0 : index
      %40 = vector.load %arg4[%c0_16, %39, %c0_17, %c0_18] : memref<1x14x14x16xf32, #tpu.memory_space<vmem>>, vector<1x1x14x16xf32>
      %41 = vector.shape_cast %40 : vector<1x1x14x16xf32> to vector<14x16xf32>
      %42 = vector.shape_cast %38 : vector<14x16xf32> to vector<1x1x14x16xf32>
      tpu.vector_store %arg4[%c0_16, %39, %c0_17, %c0_18], %42 {strides = array<i32>} : memref<1x14x14x16xf32, #tpu.memory_space<vmem>>, vector<1x1x14x16xf32>,
    }
    %c14_i32_6 = arith.constant 14 : i32
    return
  }
  func.func @transform_0(%arg0: i32) -> (i32, i32, i32, i32) {
    %c0_i32 = arith.constant 0 : i32
    %c0_i32_0 = arith.constant 0 : i32
    %c0_i32_1 = arith.constant 0 : i32
    %c0_i32_2 = arith.constant 0 : i32
    return %arg0, %c0_i32, %c0_i32_0, %c0_i32_1 : i32, i32, i32, i32
  }
  func.func @transform_1(%arg0: i32) -> (i32, i32) {
    %c0_i32 = arith.constant 0 : i32
    %c0_i32_0 = arith.constant 0 : i32
    %c0_i32_1 = arith.constant 0 : i32
    return %c0_i32, %c0_i32_0 : i32, i32
  }
  func.func @transform_2(%arg0: i32) -> (i32, i32) {
    %c0_i32 = arith.constant 0 : i32
    %c0_i32_0 = arith.constant 0 : i32
    %c0_i32_1 = arith.constant 0 : i32
    return %c0_i32, %c0_i32_0 : i32, i32
  }
  func.func @transform_3(%arg0: i32) -> (i32, i32, i32, i32) {
    %c0_i32 = arith.constant 0 : i32
    %c0_i32_0 = arith.constant 0 : i32
    %c0_i32_1 = arith.constant 0 : i32
    %c0_i32_2 = arith.constant 0 : i32
    return %arg0, %c0_i32, %c0_i32_0, %c0_i32_1 : i32, i32, i32, i32
  }
}

module attributes {stable_mosaic.version = 11 : i64} {
  func.func @kernel(%arg0: i32, %arg1: memref<1x10x10x16xf32, #tpu.memory_space<vmem>>, %arg2: memref<16x144xf32, #tpu.memory_space<vmem>>, %arg3: memref<1x16xf32, #tpu.memory_space<vmem>>, %arg4: memref<16x144xf32, #tpu.memory_space<vmem>>, %arg5: memref<1x16xf32, #tpu.memory_space<vmem>>, %arg6: memref<1x12x12x16xf32, #tpu.memory_space<vmem>>, %arg7: memref<1x12x12x16xf32, #tpu.memory_space<vmem>>, %arg8: memref<14x14x144xf32, #tpu.memory_space<vmem>>, %arg9: memref<14x14x144xf32, #tpu.memory_space<vmem>>) attributes {dimension_semantics = [#tpu.dimension_semantics<parallel>], iteration_bounds = array<i64: 2>, scalar_prefetch = 0 : i64, scratch_operands = 2 : i64, tpu.core_type = #tpu.core_type<tc>, window_params = [{transform_indices = @transform_0, window_bounds = array<i64: 1, 10, 10, 16>}, {pipeline_mode = #tpu.pipeline_mode<synchronous>, transform_indices = @transform_1, window_bounds = array<i64: 16, 144>}, {pipeline_mode = #tpu.pipeline_mode<synchronous>, transform_indices = @transform_2, window_bounds = array<i64: 1, 16>}, {pipeline_mode = #tpu.pipeline_mode<synchronous>, transform_indices = @transform_3, window_bounds = array<i64: 16, 144>}, {pipeline_mode = #tpu.pipeline_mode<synchronous>, transform_indices = @transform_4, window_bounds = array<i64: 1, 16>}, {transform_indices = @transform_5, window_bounds = array<i64: 1, 12, 12, 16>}, {transform_indices = @transform_6, window_bounds = array<i64: 1, 12, 12, 16>}]} {
    %c0 = arith.constant 0 : index
    %c0_0 = arith.constant 0 : index
    %0 = vector.load %arg2[%c0, %c0_0] : memref<16x144xf32, #tpu.memory_space<vmem>>, vector<16x144xf32>
    %c0_1 = arith.constant 0 : index
    %c0_2 = arith.constant 0 : index
    %1 = vector.load %arg3[%c0_1, %c0_2] : memref<1x16xf32, #tpu.memory_space<vmem>>, vector<1x16xf32>
    %c0_3 = arith.constant 0 : index
    %c0_4 = arith.constant 0 : index
    %2 = vector.load %arg4[%c0_3, %c0_4] : memref<16x144xf32, #tpu.memory_space<vmem>>, vector<16x144xf32>
    %c0_5 = arith.constant 0 : index
    %c0_6 = arith.constant 0 : index
    %3 = vector.load %arg5[%c0_5, %c0_6] : memref<1x16xf32, #tpu.memory_space<vmem>>, vector<1x16xf32>
    %cst = arith.constant 0.000000e+00 : f32
    %4 = vector.broadcast %cst : f32 to vector<14x14x144xf32>
    %c0_7 = arith.constant 0 : index
    %c0_8 = arith.constant 0 : index
    %c0_9 = arith.constant 0 : index
    %5 = vector.load %arg8[%c0_7, %c0_8, %c0_9] : memref<14x14x144xf32, #tpu.memory_space<vmem>>, vector<14x14x144xf32>
    tpu.vector_store %arg8[%c0_7, %c0_8, %c0_9], %4 {strides = array<i32>} : memref<14x14x144xf32, #tpu.memory_space<vmem>>, vector<14x14x144xf32>,
    %cst_10 = arith.constant 0.000000e+00 : f32
    %6 = vector.broadcast %cst_10 : f32 to vector<14x14x144xf32>
    %c0_11 = arith.constant 0 : index
    %c0_12 = arith.constant 0 : index
    %c0_13 = arith.constant 0 : index
    %7 = vector.load %arg9[%c0_11, %c0_12, %c0_13] : memref<14x14x144xf32, #tpu.memory_space<vmem>>, vector<14x14x144xf32>
    tpu.vector_store %arg9[%c0_11, %c0_12, %c0_13], %6 {strides = array<i32>} : memref<14x14x144xf32, #tpu.memory_space<vmem>>, vector<14x14x144xf32>,
    %c0_i32 = arith.constant 0 : i32
    %c10_i32 = arith.constant 10 : i32
    %8 = arith.addi %c0_i32, %c10_i32 : i32
    %c1_i32 = arith.constant 1 : i32
    scf.for %arg10 = %c0_i32 to %8 step %c1_i32  : i32 {
      %c0_22 = arith.constant 0 : index
      %11 = arith.index_cast %arg10 : i32 to index
      %c0_23 = arith.constant 0 : index
      %c0_24 = arith.constant 0 : index
      %12 = vector.load %arg1[%c0_22, %11, %c0_23, %c0_24] : memref<1x10x10x16xf32, #tpu.memory_space<vmem>>, vector<1x1x10x16xf32>
      %13 = vector.shape_cast %12 : vector<1x1x10x16xf32> to vector<10x16xf32>
      %cst_25 = arith.constant dense<0.000000e+00> : vector<10x144xf32>
      %14 = tpu.matmul %13, %0, %cst_25 {dimension_numbers = #tpu.dot_dimension_numbers<[1], [0], [0], [1], [0, 0, 1, 1], [], []>} : vector<10x16xf32>, vector<16x144xf32>, vector<10x144xf32> -> vector<10x144xf32>
      %c2_i32 = arith.constant 2 : i32
      %15 = arith.addi %c2_i32, %arg10 : i32
      %16 = arith.index_cast %15 : i32 to index
      %c2 = arith.constant 2 : index
      %c0_26 = arith.constant 0 : index
      %17 = vector.load %arg8[%16, %c2, %c0_26] : memref<14x14x144xf32, #tpu.memory_space<vmem>>, vector<1x10x144xf32>
      %18 = vector.shape_cast %17 : vector<1x10x144xf32> to vector<10x144xf32>
      %19 = vector.shape_cast %14 : vector<10x144xf32> to vector<1x10x144xf32>
      tpu.vector_store %arg8[%16, %c2, %c0_26], %19 {strides = array<i32>} : memref<14x14x144xf32, #tpu.memory_space<vmem>>, vector<1x10x144xf32>,
    }
    %c10_i32_14 = arith.constant 10 : i32
    %c0_i32_15 = arith.constant 0 : i32
    %c12_i32 = arith.constant 12 : i32
    %9 = arith.addi %c0_i32_15, %c12_i32 : i32
    %c1_i32_16 = arith.constant 1 : i32
    scf.for %arg10 = %c0_i32_15 to %9 step %c1_i32_16  : i32 {
      %cst_22 = arith.constant 0.000000e+00 : f32
      %11 = vector.broadcast %cst_22 : f32 to vector<12x16xf32>
      %c0_i32_23 = arith.constant 0 : i32
      %12 = arith.addi %arg10, %c0_i32_23 : i32
      %13 = arith.index_cast %12 : i32 to index
      %c0_24 = arith.constant 0 : index
      %c0_25 = arith.constant 0 : index
      %14 = vector.load %arg8[%13, %c0_24, %c0_25] : memref<14x14x144xf32, #tpu.memory_space<vmem>>, vector<1x14x144xf32>
      %15 = vector.shape_cast %14 : vector<1x14x144xf32> to vector<14x144xf32>
      %16 = vector.extract_strided_slice %15 {offsets = [0, 0], sizes = [12, 16], strides = [1, 1]} : vector<14x144xf32> to vector<12x16xf32>
      %17 = arith.addf %11, %16 : vector<12x16xf32>
      %18 = vector.extract_strided_slice %15 {offsets = [1, 16], sizes = [12, 16], strides = [1, 1]} : vector<14x144xf32> to vector<12x16xf32>
      %19 = arith.addf %17, %18 : vector<12x16xf32>
      %20 = vector.extract_strided_slice %15 {offsets = [2, 32], sizes = [12, 16], strides = [1, 1]} : vector<14x144xf32> to vector<12x16xf32>
      %21 = arith.addf %19, %20 : vector<12x16xf32>
      %c1_i32_26 = arith.constant 1 : i32
      %22 = arith.addi %arg10, %c1_i32_26 : i32
      %23 = arith.index_cast %22 : i32 to index
      %c0_27 = arith.constant 0 : index
      %c0_28 = arith.constant 0 : index
      %24 = vector.load %arg8[%23, %c0_27, %c0_28] : memref<14x14x144xf32, #tpu.memory_space<vmem>>, vector<1x14x144xf32>
      %25 = vector.shape_cast %24 : vector<1x14x144xf32> to vector<14x144xf32>
      %26 = vector.extract_strided_slice %25 {offsets = [0, 48], sizes = [12, 16], strides = [1, 1]} : vector<14x144xf32> to vector<12x16xf32>
      %27 = arith.addf %21, %26 : vector<12x16xf32>
      %28 = vector.extract_strided_slice %25 {offsets = [1, 64], sizes = [12, 16], strides = [1, 1]} : vector<14x144xf32> to vector<12x16xf32>
      %29 = arith.addf %27, %28 : vector<12x16xf32>
      %30 = vector.extract_strided_slice %25 {offsets = [2, 80], sizes = [12, 16], strides = [1, 1]} : vector<14x144xf32> to vector<12x16xf32>
      %31 = arith.addf %29, %30 : vector<12x16xf32>
      %c2_i32 = arith.constant 2 : i32
      %32 = arith.addi %arg10, %c2_i32 : i32
      %33 = arith.index_cast %32 : i32 to index
      %c0_29 = arith.constant 0 : index
      %c0_30 = arith.constant 0 : index
      %34 = vector.load %arg8[%33, %c0_29, %c0_30] : memref<14x14x144xf32, #tpu.memory_space<vmem>>, vector<1x14x144xf32>
      %35 = vector.shape_cast %34 : vector<1x14x144xf32> to vector<14x144xf32>
      %36 = vector.extract_strided_slice %35 {offsets = [0, 96], sizes = [12, 16], strides = [1, 1]} : vector<14x144xf32> to vector<12x16xf32>
      %37 = arith.addf %31, %36 : vector<12x16xf32>
      %38 = vector.extract_strided_slice %35 {offsets = [1, 112], sizes = [12, 16], strides = [1, 1]} : vector<14x144xf32> to vector<12x16xf32>
      %39 = arith.addf %37, %38 : vector<12x16xf32>
      %40 = vector.extract_strided_slice %35 {offsets = [2, 128], sizes = [12, 16], strides = [1, 1]} : vector<14x144xf32> to vector<12x16xf32>
      %41 = arith.addf %39, %40 : vector<12x16xf32>
      %42 = vector.broadcast %1 : vector<1x16xf32> to vector<12x16xf32>
      %43 = arith.addf %41, %42 : vector<12x16xf32>
      %cst_31 = arith.constant 0.000000e+00 : f32
      %44 = vector.broadcast %cst_31 : f32 to vector<12x16xf32>
      %45 = arith.maximumf %43, %44 : vector<12x16xf32>
      %cst_32 = arith.constant dense<0.000000e+00> : vector<12x144xf32>
      %46 = tpu.matmul %45, %2, %cst_32 {dimension_numbers = #tpu.dot_dimension_numbers<[1], [0], [0], [1], [0, 0, 1, 1], [], []>} : vector<12x16xf32>, vector<16x144xf32>, vector<12x144xf32> -> vector<12x144xf32>
      %c1_i32_33 = arith.constant 1 : i32
      %47 = arith.addi %c1_i32_33, %arg10 : i32
      %48 = arith.index_cast %47 : i32 to index
      %c1 = arith.constant 1 : index
      %c0_34 = arith.constant 0 : index
      %49 = vector.load %arg9[%48, %c1, %c0_34] : memref<14x14x144xf32, #tpu.memory_space<vmem>>, vector<1x12x144xf32>
      %50 = vector.shape_cast %49 : vector<1x12x144xf32> to vector<12x144xf32>
      %51 = vector.shape_cast %46 : vector<12x144xf32> to vector<1x12x144xf32>
      tpu.vector_store %arg9[%48, %c1, %c0_34], %51 {strides = array<i32>} : memref<14x14x144xf32, #tpu.memory_space<vmem>>, vector<1x12x144xf32>,
    }
    %c12_i32_17 = arith.constant 12 : i32
    %c0_i32_18 = arith.constant 0 : i32
    %c12_i32_19 = arith.constant 12 : i32
    %10 = arith.addi %c0_i32_18, %c12_i32_19 : i32
    %c1_i32_20 = arith.constant 1 : i32
    scf.for %arg10 = %c0_i32_18 to %10 step %c1_i32_20  : i32 {
      %cst_22 = arith.constant 0.000000e+00 : f32
      %11 = vector.broadcast %cst_22 : f32 to vector<12x16xf32>
      %c0_i32_23 = arith.constant 0 : i32
      %12 = arith.addi %arg10, %c0_i32_23 : i32
      %13 = arith.index_cast %12 : i32 to index
      %c0_24 = arith.constant 0 : index
      %c0_25 = arith.constant 0 : index
      %14 = vector.load %arg9[%13, %c0_24, %c0_25] : memref<14x14x144xf32, #tpu.memory_space<vmem>>, vector<1x14x144xf32>
      %15 = vector.shape_cast %14 : vector<1x14x144xf32> to vector<14x144xf32>
      %16 = vector.extract_strided_slice %15 {offsets = [0, 0], sizes = [12, 16], strides = [1, 1]} : vector<14x144xf32> to vector<12x16xf32>
      %17 = arith.addf %11, %16 : vector<12x16xf32>
      %18 = vector.extract_strided_slice %15 {offsets = [1, 16], sizes = [12, 16], strides = [1, 1]} : vector<14x144xf32> to vector<12x16xf32>
      %19 = arith.addf %17, %18 : vector<12x16xf32>
      %20 = vector.extract_strided_slice %15 {offsets = [2, 32], sizes = [12, 16], strides = [1, 1]} : vector<14x144xf32> to vector<12x16xf32>
      %21 = arith.addf %19, %20 : vector<12x16xf32>
      %c1_i32_26 = arith.constant 1 : i32
      %22 = arith.addi %arg10, %c1_i32_26 : i32
      %23 = arith.index_cast %22 : i32 to index
      %c0_27 = arith.constant 0 : index
      %c0_28 = arith.constant 0 : index
      %24 = vector.load %arg9[%23, %c0_27, %c0_28] : memref<14x14x144xf32, #tpu.memory_space<vmem>>, vector<1x14x144xf32>
      %25 = vector.shape_cast %24 : vector<1x14x144xf32> to vector<14x144xf32>
      %26 = vector.extract_strided_slice %25 {offsets = [0, 48], sizes = [12, 16], strides = [1, 1]} : vector<14x144xf32> to vector<12x16xf32>
      %27 = arith.addf %21, %26 : vector<12x16xf32>
      %28 = vector.extract_strided_slice %25 {offsets = [1, 64], sizes = [12, 16], strides = [1, 1]} : vector<14x144xf32> to vector<12x16xf32>
      %29 = arith.addf %27, %28 : vector<12x16xf32>
      %30 = vector.extract_strided_slice %25 {offsets = [2, 80], sizes = [12, 16], strides = [1, 1]} : vector<14x144xf32> to vector<12x16xf32>
      %31 = arith.addf %29, %30 : vector<12x16xf32>
      %c2_i32 = arith.constant 2 : i32
      %32 = arith.addi %arg10, %c2_i32 : i32
      %33 = arith.index_cast %32 : i32 to index
      %c0_29 = arith.constant 0 : index
      %c0_30 = arith.constant 0 : index
      %34 = vector.load %arg9[%33, %c0_29, %c0_30] : memref<14x14x144xf32, #tpu.memory_space<vmem>>, vector<1x14x144xf32>
      %35 = vector.shape_cast %34 : vector<1x14x144xf32> to vector<14x144xf32>
      %36 = vector.extract_strided_slice %35 {offsets = [0, 96], sizes = [12, 16], strides = [1, 1]} : vector<14x144xf32> to vector<12x16xf32>
      %37 = arith.addf %31, %36 : vector<12x16xf32>
      %38 = vector.extract_strided_slice %35 {offsets = [1, 112], sizes = [12, 16], strides = [1, 1]} : vector<14x144xf32> to vector<12x16xf32>
      %39 = arith.addf %37, %38 : vector<12x16xf32>
      %40 = vector.extract_strided_slice %35 {offsets = [2, 128], sizes = [12, 16], strides = [1, 1]} : vector<14x144xf32> to vector<12x16xf32>
      %41 = arith.addf %39, %40 : vector<12x16xf32>
      %42 = vector.broadcast %3 : vector<1x16xf32> to vector<12x16xf32>
      %43 = arith.addf %41, %42 : vector<12x16xf32>
      %cst_31 = arith.constant 0.000000e+00 : f32
      %44 = vector.broadcast %cst_31 : f32 to vector<12x16xf32>
      %45 = arith.maximumf %43, %44 : vector<12x16xf32>
      %c0_32 = arith.constant 0 : index
      %46 = arith.index_cast %arg10 : i32 to index
      %c0_33 = arith.constant 0 : index
      %c0_34 = arith.constant 0 : index
      %47 = vector.load %arg6[%c0_32, %46, %c0_33, %c0_34] : memref<1x12x12x16xf32, #tpu.memory_space<vmem>>, vector<1x1x12x16xf32>
      %48 = vector.shape_cast %47 : vector<1x1x12x16xf32> to vector<12x16xf32>
      %49 = arith.addf %45, %48 : vector<12x16xf32>
      %cst_35 = arith.constant 0.000000e+00 : f32
      %50 = vector.broadcast %cst_35 : f32 to vector<12x16xf32>
      %51 = arith.maximumf %49, %50 : vector<12x16xf32>
      %c0_36 = arith.constant 0 : index
      %52 = arith.index_cast %arg10 : i32 to index
      %c0_37 = arith.constant 0 : index
      %c0_38 = arith.constant 0 : index
      %53 = vector.load %arg7[%c0_36, %52, %c0_37, %c0_38] : memref<1x12x12x16xf32, #tpu.memory_space<vmem>>, vector<1x1x12x16xf32>
      %54 = vector.shape_cast %53 : vector<1x1x12x16xf32> to vector<12x16xf32>
      %55 = vector.shape_cast %51 : vector<12x16xf32> to vector<1x1x12x16xf32>
      tpu.vector_store %arg7[%c0_36, %52, %c0_37, %c0_38], %55 {strides = array<i32>} : memref<1x12x12x16xf32, #tpu.memory_space<vmem>>, vector<1x1x12x16xf32>,
    }
    %c12_i32_21 = arith.constant 12 : i32
    return
  }
  func.func @transform_0(%arg0: i32) -> (i32, i32, i32, i32) {
    %c0_i32 = arith.constant 0 : i32
    %c0_i32_0 = arith.constant 0 : i32
    %c0_i32_1 = arith.constant 0 : i32
    %c0_i32_2 = arith.constant 0 : i32
    return %arg0, %c0_i32, %c0_i32_0, %c0_i32_1 : i32, i32, i32, i32
  }
  func.func @transform_1(%arg0: i32) -> (i32, i32) {
    %c0_i32 = arith.constant 0 : i32
    %c0_i32_0 = arith.constant 0 : i32
    %c0_i32_1 = arith.constant 0 : i32
    return %c0_i32, %c0_i32_0 : i32, i32
  }
  func.func @transform_2(%arg0: i32) -> (i32, i32) {
    %c0_i32 = arith.constant 0 : i32
    %c0_i32_0 = arith.constant 0 : i32
    %c0_i32_1 = arith.constant 0 : i32
    return %c0_i32, %c0_i32_0 : i32, i32
  }
  func.func @transform_3(%arg0: i32) -> (i32, i32) {
    %c0_i32 = arith.constant 0 : i32
    %c0_i32_0 = arith.constant 0 : i32
    %c0_i32_1 = arith.constant 0 : i32
    return %c0_i32, %c0_i32_0 : i32, i32
  }
  func.func @transform_4(%arg0: i32) -> (i32, i32) {
    %c0_i32 = arith.constant 0 : i32
    %c0_i32_0 = arith.constant 0 : i32
    %c0_i32_1 = arith.constant 0 : i32
    return %c0_i32, %c0_i32_0 : i32, i32
  }
  func.func @transform_5(%arg0: i32) -> (i32, i32, i32, i32) {
    %c0_i32 = arith.constant 0 : i32
    %c0_i32_0 = arith.constant 0 : i32
    %c0_i32_1 = arith.constant 0 : i32
    %c0_i32_2 = arith.constant 0 : i32
    return %arg0, %c0_i32, %c0_i32_0, %c0_i32_1 : i32, i32, i32, i32
  }
  func.func @transform_6(%arg0: i32) -> (i32, i32, i32, i32) {
    %c0_i32 = arith.constant 0 : i32
    %c0_i32_0 = arith.constant 0 : i32
    %c0_i32_1 = arith.constant 0 : i32
    %c0_i32_2 = arith.constant 0 : i32
    return %arg0, %c0_i32, %c0_i32_0, %c0_i32_1 : i32, i32, i32, i32
  }
}

module attributes {stable_mosaic.version = 11 : i64} {
  func.func @kernel(%arg0: i32, %arg1: memref<1x12x12x16xf32, #tpu.memory_space<vmem>>, %arg2: memref<16x144xf32, #tpu.memory_space<vmem>>, %arg3: memref<1x16xf32, #tpu.memory_space<vmem>>, %arg4: memref<16x144xf32, #tpu.memory_space<vmem>>, %arg5: memref<1x16xf32, #tpu.memory_space<vmem>>, %arg6: memref<1x14x14x16xf32, #tpu.memory_space<vmem>>, %arg7: memref<16x16x144xf32, #tpu.memory_space<vmem>>, %arg8: memref<16x16x144xf32, #tpu.memory_space<vmem>>) attributes {dimension_semantics = [#tpu.dimension_semantics<parallel>], iteration_bounds = array<i64: 2>, scalar_prefetch = 0 : i64, scratch_operands = 2 : i64, tpu.core_type = #tpu.core_type<tc>, window_params = [{transform_indices = @transform_0, window_bounds = array<i64: 1, 12, 12, 16>}, {pipeline_mode = #tpu.pipeline_mode<synchronous>, transform_indices = @transform_1, window_bounds = array<i64: 16, 144>}, {pipeline_mode = #tpu.pipeline_mode<synchronous>, transform_indices = @transform_2, window_bounds = array<i64: 1, 16>}, {pipeline_mode = #tpu.pipeline_mode<synchronous>, transform_indices = @transform_3, window_bounds = array<i64: 16, 144>}, {pipeline_mode = #tpu.pipeline_mode<synchronous>, transform_indices = @transform_4, window_bounds = array<i64: 1, 16>}, {transform_indices = @transform_5, window_bounds = array<i64: 1, 14, 14, 16>}]} {
    %c0 = arith.constant 0 : index
    %c0_0 = arith.constant 0 : index
    %0 = vector.load %arg2[%c0, %c0_0] : memref<16x144xf32, #tpu.memory_space<vmem>>, vector<16x144xf32>
    %c0_1 = arith.constant 0 : index
    %c0_2 = arith.constant 0 : index
    %1 = vector.load %arg3[%c0_1, %c0_2] : memref<1x16xf32, #tpu.memory_space<vmem>>, vector<1x16xf32>
    %c0_3 = arith.constant 0 : index
    %c0_4 = arith.constant 0 : index
    %2 = vector.load %arg4[%c0_3, %c0_4] : memref<16x144xf32, #tpu.memory_space<vmem>>, vector<16x144xf32>
    %c0_5 = arith.constant 0 : index
    %c0_6 = arith.constant 0 : index
    %3 = vector.load %arg5[%c0_5, %c0_6] : memref<1x16xf32, #tpu.memory_space<vmem>>, vector<1x16xf32>
    %cst = arith.constant 0.000000e+00 : f32
    %4 = vector.broadcast %cst : f32 to vector<16x16x144xf32>
    %c0_7 = arith.constant 0 : index
    %c0_8 = arith.constant 0 : index
    %c0_9 = arith.constant 0 : index
    %5 = vector.load %arg7[%c0_7, %c0_8, %c0_9] : memref<16x16x144xf32, #tpu.memory_space<vmem>>, vector<16x16x144xf32>
    tpu.vector_store %arg7[%c0_7, %c0_8, %c0_9], %4 {strides = array<i32>} : memref<16x16x144xf32, #tpu.memory_space<vmem>>, vector<16x16x144xf32>,
    %cst_10 = arith.constant 0.000000e+00 : f32
    %6 = vector.broadcast %cst_10 : f32 to vector<16x16x144xf32>
    %c0_11 = arith.constant 0 : index
    %c0_12 = arith.constant 0 : index
    %c0_13 = arith.constant 0 : index
    %7 = vector.load %arg8[%c0_11, %c0_12, %c0_13] : memref<16x16x144xf32, #tpu.memory_space<vmem>>, vector<16x16x144xf32>
    tpu.vector_store %arg8[%c0_11, %c0_12, %c0_13], %6 {strides = array<i32>} : memref<16x16x144xf32, #tpu.memory_space<vmem>>, vector<16x16x144xf32>,
    %c0_i32 = arith.constant 0 : i32
    %c12_i32 = arith.constant 12 : i32
    %8 = arith.addi %c0_i32, %c12_i32 : i32
    %c1_i32 = arith.constant 1 : i32
    scf.for %arg9 = %c0_i32 to %8 step %c1_i32  : i32 {
      %c0_22 = arith.constant 0 : index
      %11 = arith.index_cast %arg9 : i32 to index
      %c0_23 = arith.constant 0 : index
      %c0_24 = arith.constant 0 : index
      %12 = vector.load %arg1[%c0_22, %11, %c0_23, %c0_24] : memref<1x12x12x16xf32, #tpu.memory_space<vmem>>, vector<1x1x12x16xf32>
      %13 = vector.shape_cast %12 : vector<1x1x12x16xf32> to vector<12x16xf32>
      %cst_25 = arith.constant dense<0.000000e+00> : vector<12x144xf32>
      %14 = tpu.matmul %13, %0, %cst_25 {dimension_numbers = #tpu.dot_dimension_numbers<[1], [0], [0], [1], [0, 0, 1, 1], [], []>} : vector<12x16xf32>, vector<16x144xf32>, vector<12x144xf32> -> vector<12x144xf32>
      %c2_i32 = arith.constant 2 : i32
      %15 = arith.addi %c2_i32, %arg9 : i32
      %16 = arith.index_cast %15 : i32 to index
      %c2 = arith.constant 2 : index
      %c0_26 = arith.constant 0 : index
      %17 = vector.load %arg7[%16, %c2, %c0_26] : memref<16x16x144xf32, #tpu.memory_space<vmem>>, vector<1x12x144xf32>
      %18 = vector.shape_cast %17 : vector<1x12x144xf32> to vector<12x144xf32>
      %19 = vector.shape_cast %14 : vector<12x144xf32> to vector<1x12x144xf32>
      tpu.vector_store %arg7[%16, %c2, %c0_26], %19 {strides = array<i32>} : memref<16x16x144xf32, #tpu.memory_space<vmem>>, vector<1x12x144xf32>,
    }
    %c12_i32_14 = arith.constant 12 : i32
    %c0_i32_15 = arith.constant 0 : i32
    %c14_i32 = arith.constant 14 : i32
    %9 = arith.addi %c0_i32_15, %c14_i32 : i32
    %c1_i32_16 = arith.constant 1 : i32
    scf.for %arg9 = %c0_i32_15 to %9 step %c1_i32_16  : i32 {
      %cst_22 = arith.constant 0.000000e+00 : f32
      %11 = vector.broadcast %cst_22 : f32 to vector<14x16xf32>
      %c0_i32_23 = arith.constant 0 : i32
      %12 = arith.addi %arg9, %c0_i32_23 : i32
      %13 = arith.index_cast %12 : i32 to index
      %c0_24 = arith.constant 0 : index
      %c0_25 = arith.constant 0 : index
      %14 = vector.load %arg7[%13, %c0_24, %c0_25] : memref<16x16x144xf32, #tpu.memory_space<vmem>>, vector<1x16x144xf32>
      %15 = vector.shape_cast %14 : vector<1x16x144xf32> to vector<16x144xf32>
      %16 = vector.extract_strided_slice %15 {offsets = [0, 0], sizes = [14, 16], strides = [1, 1]} : vector<16x144xf32> to vector<14x16xf32>
      %17 = arith.addf %11, %16 : vector<14x16xf32>
      %18 = vector.extract_strided_slice %15 {offsets = [1, 16], sizes = [14, 16], strides = [1, 1]} : vector<16x144xf32> to vector<14x16xf32>
      %19 = arith.addf %17, %18 : vector<14x16xf32>
      %20 = vector.extract_strided_slice %15 {offsets = [2, 32], sizes = [14, 16], strides = [1, 1]} : vector<16x144xf32> to vector<14x16xf32>
      %21 = arith.addf %19, %20 : vector<14x16xf32>
      %c1_i32_26 = arith.constant 1 : i32
      %22 = arith.addi %arg9, %c1_i32_26 : i32
      %23 = arith.index_cast %22 : i32 to index
      %c0_27 = arith.constant 0 : index
      %c0_28 = arith.constant 0 : index
      %24 = vector.load %arg7[%23, %c0_27, %c0_28] : memref<16x16x144xf32, #tpu.memory_space<vmem>>, vector<1x16x144xf32>
      %25 = vector.shape_cast %24 : vector<1x16x144xf32> to vector<16x144xf32>
      %26 = vector.extract_strided_slice %25 {offsets = [0, 48], sizes = [14, 16], strides = [1, 1]} : vector<16x144xf32> to vector<14x16xf32>
      %27 = arith.addf %21, %26 : vector<14x16xf32>
      %28 = vector.extract_strided_slice %25 {offsets = [1, 64], sizes = [14, 16], strides = [1, 1]} : vector<16x144xf32> to vector<14x16xf32>
      %29 = arith.addf %27, %28 : vector<14x16xf32>
      %30 = vector.extract_strided_slice %25 {offsets = [2, 80], sizes = [14, 16], strides = [1, 1]} : vector<16x144xf32> to vector<14x16xf32>
      %31 = arith.addf %29, %30 : vector<14x16xf32>
      %c2_i32 = arith.constant 2 : i32
      %32 = arith.addi %arg9, %c2_i32 : i32
      %33 = arith.index_cast %32 : i32 to index
      %c0_29 = arith.constant 0 : index
      %c0_30 = arith.constant 0 : index
      %34 = vector.load %arg7[%33, %c0_29, %c0_30] : memref<16x16x144xf32, #tpu.memory_space<vmem>>, vector<1x16x144xf32>
      %35 = vector.shape_cast %34 : vector<1x16x144xf32> to vector<16x144xf32>
      %36 = vector.extract_strided_slice %35 {offsets = [0, 96], sizes = [14, 16], strides = [1, 1]} : vector<16x144xf32> to vector<14x16xf32>
      %37 = arith.addf %31, %36 : vector<14x16xf32>
      %38 = vector.extract_strided_slice %35 {offsets = [1, 112], sizes = [14, 16], strides = [1, 1]} : vector<16x144xf32> to vector<14x16xf32>
      %39 = arith.addf %37, %38 : vector<14x16xf32>
      %40 = vector.extract_strided_slice %35 {offsets = [2, 128], sizes = [14, 16], strides = [1, 1]} : vector<16x144xf32> to vector<14x16xf32>
      %41 = arith.addf %39, %40 : vector<14x16xf32>
      %42 = vector.broadcast %1 : vector<1x16xf32> to vector<14x16xf32>
      %43 = arith.addf %41, %42 : vector<14x16xf32>
      %cst_31 = arith.constant 0.000000e+00 : f32
      %44 = vector.broadcast %cst_31 : f32 to vector<14x16xf32>
      %45 = arith.maximumf %43, %44 : vector<14x16xf32>
      %cst_32 = arith.constant dense<0.000000e+00> : vector<14x144xf32>
      %46 = tpu.matmul %45, %2, %cst_32 {dimension_numbers = #tpu.dot_dimension_numbers<[1], [0], [0], [1], [0, 0, 1, 1], [], []>} : vector<14x16xf32>, vector<16x144xf32>, vector<14x144xf32> -> vector<14x144xf32>
      %c1_i32_33 = arith.constant 1 : i32
      %47 = arith.addi %c1_i32_33, %arg9 : i32
      %48 = arith.index_cast %47 : i32 to index
      %c1 = arith.constant 1 : index
      %c0_34 = arith.constant 0 : index
      %49 = vector.load %arg8[%48, %c1, %c0_34] : memref<16x16x144xf32, #tpu.memory_space<vmem>>, vector<1x14x144xf32>
      %50 = vector.shape_cast %49 : vector<1x14x144xf32> to vector<14x144xf32>
      %51 = vector.shape_cast %46 : vector<14x144xf32> to vector<1x14x144xf32>
      tpu.vector_store %arg8[%48, %c1, %c0_34], %51 {strides = array<i32>} : memref<16x16x144xf32, #tpu.memory_space<vmem>>, vector<1x14x144xf32>,
    }
    %c14_i32_17 = arith.constant 14 : i32
    %c0_i32_18 = arith.constant 0 : i32
    %c14_i32_19 = arith.constant 14 : i32
    %10 = arith.addi %c0_i32_18, %c14_i32_19 : i32
    %c1_i32_20 = arith.constant 1 : i32
    scf.for %arg9 = %c0_i32_18 to %10 step %c1_i32_20  : i32 {
      %cst_22 = arith.constant 0.000000e+00 : f32
      %11 = vector.broadcast %cst_22 : f32 to vector<14x16xf32>
      %c0_i32_23 = arith.constant 0 : i32
      %12 = arith.addi %arg9, %c0_i32_23 : i32
      %13 = arith.index_cast %12 : i32 to index
      %c0_24 = arith.constant 0 : index
      %c0_25 = arith.constant 0 : index
      %14 = vector.load %arg8[%13, %c0_24, %c0_25] : memref<16x16x144xf32, #tpu.memory_space<vmem>>, vector<1x16x144xf32>
      %15 = vector.shape_cast %14 : vector<1x16x144xf32> to vector<16x144xf32>
      %16 = vector.extract_strided_slice %15 {offsets = [0, 0], sizes = [14, 16], strides = [1, 1]} : vector<16x144xf32> to vector<14x16xf32>
      %17 = arith.addf %11, %16 : vector<14x16xf32>
      %18 = vector.extract_strided_slice %15 {offsets = [1, 16], sizes = [14, 16], strides = [1, 1]} : vector<16x144xf32> to vector<14x16xf32>
      %19 = arith.addf %17, %18 : vector<14x16xf32>
      %20 = vector.extract_strided_slice %15 {offsets = [2, 32], sizes = [14, 16], strides = [1, 1]} : vector<16x144xf32> to vector<14x16xf32>
      %21 = arith.addf %19, %20 : vector<14x16xf32>
      %c1_i32_26 = arith.constant 1 : i32
      %22 = arith.addi %arg9, %c1_i32_26 : i32
      %23 = arith.index_cast %22 : i32 to index
      %c0_27 = arith.constant 0 : index
      %c0_28 = arith.constant 0 : index
      %24 = vector.load %arg8[%23, %c0_27, %c0_28] : memref<16x16x144xf32, #tpu.memory_space<vmem>>, vector<1x16x144xf32>
      %25 = vector.shape_cast %24 : vector<1x16x144xf32> to vector<16x144xf32>
      %26 = vector.extract_strided_slice %25 {offsets = [0, 48], sizes = [14, 16], strides = [1, 1]} : vector<16x144xf32> to vector<14x16xf32>
      %27 = arith.addf %21, %26 : vector<14x16xf32>
      %28 = vector.extract_strided_slice %25 {offsets = [1, 64], sizes = [14, 16], strides = [1, 1]} : vector<16x144xf32> to vector<14x16xf32>
      %29 = arith.addf %27, %28 : vector<14x16xf32>
      %30 = vector.extract_strided_slice %25 {offsets = [2, 80], sizes = [14, 16], strides = [1, 1]} : vector<16x144xf32> to vector<14x16xf32>
      %31 = arith.addf %29, %30 : vector<14x16xf32>
      %c2_i32 = arith.constant 2 : i32
      %32 = arith.addi %arg9, %c2_i32 : i32
      %33 = arith.index_cast %32 : i32 to index
      %c0_29 = arith.constant 0 : index
      %c0_30 = arith.constant 0 : index
      %34 = vector.load %arg8[%33, %c0_29, %c0_30] : memref<16x16x144xf32, #tpu.memory_space<vmem>>, vector<1x16x144xf32>
      %35 = vector.shape_cast %34 : vector<1x16x144xf32> to vector<16x144xf32>
      %36 = vector.extract_strided_slice %35 {offsets = [0, 96], sizes = [14, 16], strides = [1, 1]} : vector<16x144xf32> to vector<14x16xf32>
      %37 = arith.addf %31, %36 : vector<14x16xf32>
      %38 = vector.extract_strided_slice %35 {offsets = [1, 112], sizes = [14, 16], strides = [1, 1]} : vector<16x144xf32> to vector<14x16xf32>
      %39 = arith.addf %37, %38 : vector<14x16xf32>
      %40 = vector.extract_strided_slice %35 {offsets = [2, 128], sizes = [14, 16], strides = [1, 1]} : vector<16x144xf32> to vector<14x16xf32>
      %41 = arith.addf %39, %40 : vector<14x16xf32>
      %42 = vector.broadcast %3 : vector<1x16xf32> to vector<14x16xf32>
      %43 = arith.addf %41, %42 : vector<14x16xf32>
      %cst_31 = arith.constant 0.000000e+00 : f32
      %44 = vector.broadcast %cst_31 : f32 to vector<14x16xf32>
      %45 = arith.maximumf %43, %44 : vector<14x16xf32>
      %c0_32 = arith.constant 0 : index
      %46 = arith.index_cast %arg9 : i32 to index
      %c0_33 = arith.constant 0 : index
      %c0_34 = arith.constant 0 : index
      %47 = vector.load %arg6[%c0_32, %46, %c0_33, %c0_34] : memref<1x14x14x16xf32, #tpu.memory_space<vmem>>, vector<1x1x14x16xf32>
      %48 = vector.shape_cast %47 : vector<1x1x14x16xf32> to vector<14x16xf32>
      %49 = vector.shape_cast %45 : vector<14x16xf32> to vector<1x1x14x16xf32>
      tpu.vector_store %arg6[%c0_32, %46, %c0_33, %c0_34], %49 {strides = array<i32>} : memref<1x14x14x16xf32, #tpu.memory_space<vmem>>, vector<1x1x14x16xf32>,
    }
    %c14_i32_21 = arith.constant 14 : i32
    return
  }
  func.func @transform_0(%arg0: i32) -> (i32, i32, i32, i32) {
    %c0_i32 = arith.constant 0 : i32
    %c0_i32_0 = arith.constant 0 : i32
    %c0_i32_1 = arith.constant 0 : i32
    %c0_i32_2 = arith.constant 0 : i32
    return %arg0, %c0_i32, %c0_i32_0, %c0_i32_1 : i32, i32, i32, i32
  }
  func.func @transform_1(%arg0: i32) -> (i32, i32) {
    %c0_i32 = arith.constant 0 : i32
    %c0_i32_0 = arith.constant 0 : i32
    %c0_i32_1 = arith.constant 0 : i32
    return %c0_i32, %c0_i32_0 : i32, i32
  }
  func.func @transform_2(%arg0: i32) -> (i32, i32) {
    %c0_i32 = arith.constant 0 : i32
    %c0_i32_0 = arith.constant 0 : i32
    %c0_i32_1 = arith.constant 0 : i32
    return %c0_i32, %c0_i32_0 : i32, i32
  }
  func.func @transform_3(%arg0: i32) -> (i32, i32) {
    %c0_i32 = arith.constant 0 : i32
    %c0_i32_0 = arith.constant 0 : i32
    %c0_i32_1 = arith.constant 0 : i32
    return %c0_i32, %c0_i32_0 : i32, i32
  }
  func.func @transform_4(%arg0: i32) -> (i32, i32) {
    %c0_i32 = arith.constant 0 : i32
    %c0_i32_0 = arith.constant 0 : i32
    %c0_i32_1 = arith.constant 0 : i32
    return %c0_i32, %c0_i32_0 : i32, i32
  }
  func.func @transform_5(%arg0: i32) -> (i32, i32, i32, i32) {
    %c0_i32 = arith.constant 0 : i32
    %c0_i32_0 = arith.constant 0 : i32
    %c0_i32_1 = arith.constant 0 : i32
    %c0_i32_2 = arith.constant 0 : i32
    return %arg0, %c0_i32, %c0_i32_0, %c0_i32_1 : i32, i32, i32, i32
  }
}

module attributes {stable_mosaic.version = 11 : i64} {
  func.func @kernel(%arg0: i32, %arg1: memref<1x14x14x16xf32, #tpu.memory_space<vmem>>, %arg2: memref<16x144xf32, #tpu.memory_space<vmem>>, %arg3: memref<1x16xf32, #tpu.memory_space<vmem>>, %arg4: memref<16x9xf32, #tpu.memory_space<vmem>>, %arg5: memref<1x1xf32, #tpu.memory_space<vmem>>, %arg6: memref<1x16x16x1xf32, #tpu.memory_space<vmem>>, %arg7: memref<1x16x16x1xf32, #tpu.memory_space<vmem>>, %arg8: memref<18x18x144xf32, #tpu.memory_space<vmem>>, %arg9: memref<18x18x9xf32, #tpu.memory_space<vmem>>) attributes {dimension_semantics = [#tpu.dimension_semantics<parallel>], iteration_bounds = array<i64: 2>, scalar_prefetch = 0 : i64, scratch_operands = 2 : i64, tpu.core_type = #tpu.core_type<tc>, window_params = [{transform_indices = @transform_0, window_bounds = array<i64: 1, 14, 14, 16>}, {pipeline_mode = #tpu.pipeline_mode<synchronous>, transform_indices = @transform_1, window_bounds = array<i64: 16, 144>}, {pipeline_mode = #tpu.pipeline_mode<synchronous>, transform_indices = @transform_2, window_bounds = array<i64: 1, 16>}, {pipeline_mode = #tpu.pipeline_mode<synchronous>, transform_indices = @transform_3, window_bounds = array<i64: 16, 9>}, {pipeline_mode = #tpu.pipeline_mode<synchronous>, transform_indices = @transform_4, window_bounds = array<i64: 1, 1>}, {transform_indices = @transform_5, window_bounds = array<i64: 1, 16, 16, 1>}, {transform_indices = @transform_6, window_bounds = array<i64: 1, 16, 16, 1>}]} {
    %c0 = arith.constant 0 : index
    %c0_0 = arith.constant 0 : index
    %0 = vector.load %arg2[%c0, %c0_0] : memref<16x144xf32, #tpu.memory_space<vmem>>, vector<16x144xf32>
    %c0_1 = arith.constant 0 : index
    %c0_2 = arith.constant 0 : index
    %1 = vector.load %arg3[%c0_1, %c0_2] : memref<1x16xf32, #tpu.memory_space<vmem>>, vector<1x16xf32>
    %c0_3 = arith.constant 0 : index
    %c0_4 = arith.constant 0 : index
    %2 = vector.load %arg4[%c0_3, %c0_4] : memref<16x9xf32, #tpu.memory_space<vmem>>, vector<16x9xf32>
    %c0_5 = arith.constant 0 : index
    %c0_6 = arith.constant 0 : index
    %3 = vector.load %arg5[%c0_5, %c0_6] : memref<1x1xf32, #tpu.memory_space<vmem>>, vector<1x1xf32>
    %cst = arith.constant 0.000000e+00 : f32
    %4 = vector.broadcast %cst : f32 to vector<18x18x144xf32>
    %c0_7 = arith.constant 0 : index
    %c0_8 = arith.constant 0 : index
    %c0_9 = arith.constant 0 : index
    %5 = vector.load %arg8[%c0_7, %c0_8, %c0_9] : memref<18x18x144xf32, #tpu.memory_space<vmem>>, vector<18x18x144xf32>
    tpu.vector_store %arg8[%c0_7, %c0_8, %c0_9], %4 {strides = array<i32>} : memref<18x18x144xf32, #tpu.memory_space<vmem>>, vector<18x18x144xf32>,
    %cst_10 = arith.constant 0.000000e+00 : f32
    %6 = vector.broadcast %cst_10 : f32 to vector<18x18x9xf32>
    %c0_11 = arith.constant 0 : index
    %c0_12 = arith.constant 0 : index
    %c0_13 = arith.constant 0 : index
    %7 = vector.load %arg9[%c0_11, %c0_12, %c0_13] : memref<18x18x9xf32, #tpu.memory_space<vmem>>, vector<18x18x9xf32>
    tpu.vector_store %arg9[%c0_11, %c0_12, %c0_13], %6 {strides = array<i32>} : memref<18x18x9xf32, #tpu.memory_space<vmem>>, vector<18x18x9xf32>,
    %c0_i32 = arith.constant 0 : i32
    %c14_i32 = arith.constant 14 : i32
    %8 = arith.addi %c0_i32, %c14_i32 : i32
    %c1_i32 = arith.constant 1 : i32
    scf.for %arg10 = %c0_i32 to %8 step %c1_i32  : i32 {
      %c0_22 = arith.constant 0 : index
      %11 = arith.index_cast %arg10 : i32 to index
      %c0_23 = arith.constant 0 : index
      %c0_24 = arith.constant 0 : index
      %12 = vector.load %arg1[%c0_22, %11, %c0_23, %c0_24] : memref<1x14x14x16xf32, #tpu.memory_space<vmem>>, vector<1x1x14x16xf32>
      %13 = vector.shape_cast %12 : vector<1x1x14x16xf32> to vector<14x16xf32>
      %cst_25 = arith.constant dense<0.000000e+00> : vector<14x144xf32>
      %14 = tpu.matmul %13, %0, %cst_25 {dimension_numbers = #tpu.dot_dimension_numbers<[1], [0], [0], [1], [0, 0, 1, 1], [], []>} : vector<14x16xf32>, vector<16x144xf32>, vector<14x144xf32> -> vector<14x144xf32>
      %c2_i32 = arith.constant 2 : i32
      %15 = arith.addi %c2_i32, %arg10 : i32
      %16 = arith.index_cast %15 : i32 to index
      %c2 = arith.constant 2 : index
      %c0_26 = arith.constant 0 : index
      %17 = vector.load %arg8[%16, %c2, %c0_26] : memref<18x18x144xf32, #tpu.memory_space<vmem>>, vector<1x14x144xf32>
      %18 = vector.shape_cast %17 : vector<1x14x144xf32> to vector<14x144xf32>
      %19 = vector.shape_cast %14 : vector<14x144xf32> to vector<1x14x144xf32>
      tpu.vector_store %arg8[%16, %c2, %c0_26], %19 {strides = array<i32>} : memref<18x18x144xf32, #tpu.memory_space<vmem>>, vector<1x14x144xf32>,
    }
    %c14_i32_14 = arith.constant 14 : i32
    %c0_i32_15 = arith.constant 0 : i32
    %c16_i32 = arith.constant 16 : i32
    %9 = arith.addi %c0_i32_15, %c16_i32 : i32
    %c1_i32_16 = arith.constant 1 : i32
    scf.for %arg10 = %c0_i32_15 to %9 step %c1_i32_16  : i32 {
      %cst_22 = arith.constant 0.000000e+00 : f32
      %11 = vector.broadcast %cst_22 : f32 to vector<16x16xf32>
      %c0_i32_23 = arith.constant 0 : i32
      %12 = arith.addi %arg10, %c0_i32_23 : i32
      %13 = arith.index_cast %12 : i32 to index
      %c0_24 = arith.constant 0 : index
      %c0_25 = arith.constant 0 : index
      %14 = vector.load %arg8[%13, %c0_24, %c0_25] : memref<18x18x144xf32, #tpu.memory_space<vmem>>, vector<1x18x144xf32>
      %15 = vector.shape_cast %14 : vector<1x18x144xf32> to vector<18x144xf32>
      %16 = vector.extract_strided_slice %15 {offsets = [0, 0], sizes = [16, 16], strides = [1, 1]} : vector<18x144xf32> to vector<16x16xf32>
      %17 = arith.addf %11, %16 : vector<16x16xf32>
      %18 = vector.extract_strided_slice %15 {offsets = [1, 16], sizes = [16, 16], strides = [1, 1]} : vector<18x144xf32> to vector<16x16xf32>
      %19 = arith.addf %17, %18 : vector<16x16xf32>
      %20 = vector.extract_strided_slice %15 {offsets = [2, 32], sizes = [16, 16], strides = [1, 1]} : vector<18x144xf32> to vector<16x16xf32>
      %21 = arith.addf %19, %20 : vector<16x16xf32>
      %c1_i32_26 = arith.constant 1 : i32
      %22 = arith.addi %arg10, %c1_i32_26 : i32
      %23 = arith.index_cast %22 : i32 to index
      %c0_27 = arith.constant 0 : index
      %c0_28 = arith.constant 0 : index
      %24 = vector.load %arg8[%23, %c0_27, %c0_28] : memref<18x18x144xf32, #tpu.memory_space<vmem>>, vector<1x18x144xf32>
      %25 = vector.shape_cast %24 : vector<1x18x144xf32> to vector<18x144xf32>
      %26 = vector.extract_strided_slice %25 {offsets = [0, 48], sizes = [16, 16], strides = [1, 1]} : vector<18x144xf32> to vector<16x16xf32>
      %27 = arith.addf %21, %26 : vector<16x16xf32>
      %28 = vector.extract_strided_slice %25 {offsets = [1, 64], sizes = [16, 16], strides = [1, 1]} : vector<18x144xf32> to vector<16x16xf32>
      %29 = arith.addf %27, %28 : vector<16x16xf32>
      %30 = vector.extract_strided_slice %25 {offsets = [2, 80], sizes = [16, 16], strides = [1, 1]} : vector<18x144xf32> to vector<16x16xf32>
      %31 = arith.addf %29, %30 : vector<16x16xf32>
      %c2_i32 = arith.constant 2 : i32
      %32 = arith.addi %arg10, %c2_i32 : i32
      %33 = arith.index_cast %32 : i32 to index
      %c0_29 = arith.constant 0 : index
      %c0_30 = arith.constant 0 : index
      %34 = vector.load %arg8[%33, %c0_29, %c0_30] : memref<18x18x144xf32, #tpu.memory_space<vmem>>, vector<1x18x144xf32>
      %35 = vector.shape_cast %34 : vector<1x18x144xf32> to vector<18x144xf32>
      %36 = vector.extract_strided_slice %35 {offsets = [0, 96], sizes = [16, 16], strides = [1, 1]} : vector<18x144xf32> to vector<16x16xf32>
      %37 = arith.addf %31, %36 : vector<16x16xf32>
      %38 = vector.extract_strided_slice %35 {offsets = [1, 112], sizes = [16, 16], strides = [1, 1]} : vector<18x144xf32> to vector<16x16xf32>
      %39 = arith.addf %37, %38 : vector<16x16xf32>
      %40 = vector.extract_strided_slice %35 {offsets = [2, 128], sizes = [16, 16], strides = [1, 1]} : vector<18x144xf32> to vector<16x16xf32>
      %41 = arith.addf %39, %40 : vector<16x16xf32>
      %42 = vector.broadcast %1 : vector<1x16xf32> to vector<16x16xf32>
      %43 = arith.addf %41, %42 : vector<16x16xf32>
      %cst_31 = arith.constant 0.000000e+00 : f32
      %44 = vector.broadcast %cst_31 : f32 to vector<16x16xf32>
      %45 = arith.maximumf %43, %44 : vector<16x16xf32>
      %cst_32 = arith.constant dense<0.000000e+00> : vector<16x9xf32>
      %46 = tpu.matmul %45, %2, %cst_32 {dimension_numbers = #tpu.dot_dimension_numbers<[1], [0], [0], [1], [0, 0, 1, 1], [], []>} : vector<16x16xf32>, vector<16x9xf32>, vector<16x9xf32> -> vector<16x9xf32>
      %c1_i32_33 = arith.constant 1 : i32
      %47 = arith.addi %c1_i32_33, %arg10 : i32
      %48 = arith.index_cast %47 : i32 to index
      %c1 = arith.constant 1 : index
      %c0_34 = arith.constant 0 : index
      %49 = vector.load %arg9[%48, %c1, %c0_34] : memref<18x18x9xf32, #tpu.memory_space<vmem>>, vector<1x16x9xf32>
      %50 = vector.shape_cast %49 : vector<1x16x9xf32> to vector<16x9xf32>
      %51 = vector.shape_cast %46 : vector<16x9xf32> to vector<1x16x9xf32>
      tpu.vector_store %arg9[%48, %c1, %c0_34], %51 {strides = array<i32>} : memref<18x18x9xf32, #tpu.memory_space<vmem>>, vector<1x16x9xf32>,
    }
    %c16_i32_17 = arith.constant 16 : i32
    %c0_i32_18 = arith.constant 0 : i32
    %c16_i32_19 = arith.constant 16 : i32
    %10 = arith.addi %c0_i32_18, %c16_i32_19 : i32
    %c1_i32_20 = arith.constant 1 : i32
    scf.for %arg10 = %c0_i32_18 to %10 step %c1_i32_20  : i32 {
      %cst_22 = arith.constant 0.000000e+00 : f32
      %11 = vector.broadcast %cst_22 : f32 to vector<16x1xf32>
      %c0_i32_23 = arith.constant 0 : i32
      %12 = arith.addi %arg10, %c0_i32_23 : i32
      %13 = arith.index_cast %12 : i32 to index
      %c0_24 = arith.constant 0 : index
      %c0_25 = arith.constant 0 : index
      %14 = vector.load %arg9[%13, %c0_24, %c0_25] : memref<18x18x9xf32, #tpu.memory_space<vmem>>, vector<1x18x9xf32>
      %15 = vector.shape_cast %14 : vector<1x18x9xf32> to vector<18x9xf32>
      %16 = vector.extract_strided_slice %15 {offsets = [0, 0], sizes = [16, 1], strides = [1, 1]} : vector<18x9xf32> to vector<16x1xf32>
      %17 = arith.addf %11, %16 : vector<16x1xf32>
      %18 = vector.extract_strided_slice %15 {offsets = [1, 1], sizes = [16, 1], strides = [1, 1]} : vector<18x9xf32> to vector<16x1xf32>
      %19 = arith.addf %17, %18 : vector<16x1xf32>
      %20 = vector.extract_strided_slice %15 {offsets = [2, 2], sizes = [16, 1], strides = [1, 1]} : vector<18x9xf32> to vector<16x1xf32>
      %21 = arith.addf %19, %20 : vector<16x1xf32>
      %c1_i32_26 = arith.constant 1 : i32
      %22 = arith.addi %arg10, %c1_i32_26 : i32
      %23 = arith.index_cast %22 : i32 to index
      %c0_27 = arith.constant 0 : index
      %c0_28 = arith.constant 0 : index
      %24 = vector.load %arg9[%23, %c0_27, %c0_28] : memref<18x18x9xf32, #tpu.memory_space<vmem>>, vector<1x18x9xf32>
      %25 = vector.shape_cast %24 : vector<1x18x9xf32> to vector<18x9xf32>
      %26 = vector.extract_strided_slice %25 {offsets = [0, 3], sizes = [16, 1], strides = [1, 1]} : vector<18x9xf32> to vector<16x1xf32>
      %27 = arith.addf %21, %26 : vector<16x1xf32>
      %28 = vector.extract_strided_slice %25 {offsets = [1, 4], sizes = [16, 1], strides = [1, 1]} : vector<18x9xf32> to vector<16x1xf32>
      %29 = arith.addf %27, %28 : vector<16x1xf32>
      %30 = vector.extract_strided_slice %25 {offsets = [2, 5], sizes = [16, 1], strides = [1, 1]} : vector<18x9xf32> to vector<16x1xf32>
      %31 = arith.addf %29, %30 : vector<16x1xf32>
      %c2_i32 = arith.constant 2 : i32
      %32 = arith.addi %arg10, %c2_i32 : i32
      %33 = arith.index_cast %32 : i32 to index
      %c0_29 = arith.constant 0 : index
      %c0_30 = arith.constant 0 : index
      %34 = vector.load %arg9[%33, %c0_29, %c0_30] : memref<18x18x9xf32, #tpu.memory_space<vmem>>, vector<1x18x9xf32>
      %35 = vector.shape_cast %34 : vector<1x18x9xf32> to vector<18x9xf32>
      %36 = vector.extract_strided_slice %35 {offsets = [0, 6], sizes = [16, 1], strides = [1, 1]} : vector<18x9xf32> to vector<16x1xf32>
      %37 = arith.addf %31, %36 : vector<16x1xf32>
      %38 = vector.extract_strided_slice %35 {offsets = [1, 7], sizes = [16, 1], strides = [1, 1]} : vector<18x9xf32> to vector<16x1xf32>
      %39 = arith.addf %37, %38 : vector<16x1xf32>
      %40 = vector.extract_strided_slice %35 {offsets = [2, 8], sizes = [16, 1], strides = [1, 1]} : vector<18x9xf32> to vector<16x1xf32>
      %41 = arith.addf %39, %40 : vector<16x1xf32>
      %42 = vector.broadcast %3 : vector<1x1xf32> to vector<16x1xf32>
      %43 = arith.addf %41, %42 : vector<16x1xf32>
      %c0_31 = arith.constant 0 : index
      %44 = arith.index_cast %arg10 : i32 to index
      %c0_32 = arith.constant 0 : index
      %c0_33 = arith.constant 0 : index
      %45 = vector.load %arg6[%c0_31, %44, %c0_32, %c0_33] : memref<1x16x16x1xf32, #tpu.memory_space<vmem>>, vector<1x1x16x1xf32>
      %46 = vector.shape_cast %45 : vector<1x1x16x1xf32> to vector<16x1xf32>
      %47 = arith.addf %43, %46 : vector<16x1xf32>
      %cst_34 = arith.constant 0.000000e+00 : f32
      %48 = vector.broadcast %cst_34 : f32 to vector<16x1xf32>
      %49 = arith.maximumf %47, %48 : vector<16x1xf32>
      %c0_35 = arith.constant 0 : index
      %50 = arith.index_cast %arg10 : i32 to index
      %c0_36 = arith.constant 0 : index
      %c0_37 = arith.constant 0 : index
      %51 = vector.load %arg7[%c0_35, %50, %c0_36, %c0_37] : memref<1x16x16x1xf32, #tpu.memory_space<vmem>>, vector<1x1x16x1xf32>
      %52 = vector.shape_cast %51 : vector<1x1x16x1xf32> to vector<16x1xf32>
      %53 = vector.shape_cast %49 : vector<16x1xf32> to vector<1x1x16x1xf32>
      tpu.vector_store %arg7[%c0_35, %50, %c0_36, %c0_37], %53 {strides = array<i32>} : memref<1x16x16x1xf32, #tpu.memory_space<vmem>>, vector<1x1x16x1xf32>,
    }
    %c16_i32_21 = arith.constant 16 : i32
    return
  }
  func.func @transform_0(%arg0: i32) -> (i32, i32, i32, i32) {
    %c0_i32 = arith.constant 0 : i32
    %c0_i32_0 = arith.constant 0 : i32
    %c0_i32_1 = arith.constant 0 : i32
    %c0_i32_2 = arith.constant 0 : i32
    return %arg0, %c0_i32, %c0_i32_0, %c0_i32_1 : i32, i32, i32, i32
  }
  func.func @transform_1(%arg0: i32) -> (i32, i32) {
    %c0_i32 = arith.constant 0 : i32
    %c0_i32_0 = arith.constant 0 : i32
    %c0_i32_1 = arith.constant 0 : i32
    return %c0_i32, %c0_i32_0 : i32, i32
  }
  func.func @transform_2(%arg0: i32) -> (i32, i32) {
    %c0_i32 = arith.constant 0 : i32
    %c0_i32_0 = arith.constant 0 : i32
    %c0_i32_1 = arith.constant 0 : i32
    return %c0_i32, %c0_i32_0 : i32, i32
  }
  func.func @transform_3(%arg0: i32) -> (i32, i32) {
    %c0_i32 = arith.constant 0 : i32
    %c0_i32_0 = arith.constant 0 : i32
    %c0_i32_1 = arith.constant 0 : i32
    return %c0_i32, %c0_i32_0 : i32, i32
  }
  func.func @transform_4(%arg0: i32) -> (i32, i32) {
    %c0_i32 = arith.constant 0 : i32
    %c0_i32_0 = arith.constant 0 : i32
    %c0_i32_1 = arith.constant 0 : i32
    return %c0_i32, %c0_i32_0 : i32, i32
  }
  func.func @transform_5(%arg0: i32) -> (i32, i32, i32, i32) {
    %c0_i32 = arith.constant 0 : i32
    %c0_i32_0 = arith.constant 0 : i32
    %c0_i32_1 = arith.constant 0 : i32
    %c0_i32_2 = arith.constant 0 : i32
    return %arg0, %c0_i32, %c0_i32_0, %c0_i32_1 : i32, i32, i32, i32
  }
  func.func @transform_6(%arg0: i32) -> (i32, i32, i32, i32) {
    %c0_i32 = arith.constant 0 : i32
    %c0_i32_0 = arith.constant 0 : i32
    %c0_i32_1 = arith.constant 0 : i32
    %c0_i32_2 = arith.constant 0 : i32
    return %arg0, %c0_i32, %c0_i32_0, %c0_i32_1 : i32, i32, i32, i32
  }
}

module attributes {stable_mosaic.version = 11 : i64} {
  func.func @kernel(%arg0: i32, %arg1: memref<1x16x16xf32, #tpu.memory_space<vmem>>, %arg2: memref<1x16x16xf32, #tpu.memory_space<vmem>>, %arg3: memref<64x16xf32, #tpu.memory_space<vmem>>, %arg4: memref<64x16xf32, #tpu.memory_space<vmem>>, %arg5: memref<9x1xf32, #tpu.memory_space<vmem>>, %arg6: memref<1x1xf32, #tpu.memory_space<vmem>>, %arg7: memref<9x1xf32, #tpu.memory_space<vmem>>, %arg8: memref<1x1xf32, #tpu.memory_space<vmem>>, %arg9: memref<1x64x64xf32, #tpu.memory_space<vmem>>, %arg10: memref<18x18xf32, #tpu.memory_space<vmem>>, %arg11: memref<66x66xf32, #tpu.memory_space<vmem>>) attributes {dimension_semantics = [#tpu.dimension_semantics<parallel>], iteration_bounds = array<i64: 2>, scalar_prefetch = 0 : i64, scratch_operands = 2 : i64, tpu.core_type = #tpu.core_type<tc>, window_params = [{transform_indices = @transform_0, window_bounds = array<i64: 1, 16, 16>}, {transform_indices = @transform_1, window_bounds = array<i64: 1, 16, 16>}, {pipeline_mode = #tpu.pipeline_mode<synchronous>, transform_indices = @transform_2, window_bounds = array<i64: 64, 16>}, {pipeline_mode = #tpu.pipeline_mode<synchronous>, transform_indices = @transform_3, window_bounds = array<i64: 64, 16>}, {pipeline_mode = #tpu.pipeline_mode<synchronous>, transform_indices = @transform_4, window_bounds = array<i64: 9, 1>}, {pipeline_mode = #tpu.pipeline_mode<synchronous>, transform_indices = @transform_5, window_bounds = array<i64: 1, 1>}, {pipeline_mode = #tpu.pipeline_mode<synchronous>, transform_indices = @transform_6, window_bounds = array<i64: 9, 1>}, {pipeline_mode = #tpu.pipeline_mode<synchronous>, transform_indices = @transform_7, window_bounds = array<i64: 1, 1>}, {transform_indices = @transform_8, window_bounds = array<i64: 1, 64, 64>}]} {
    %c0 = arith.constant 0 : index
    %c0_0 = arith.constant 0 : index
    %0 = vector.load %arg3[%c0, %c0_0] : memref<64x16xf32, #tpu.memory_space<vmem>>, vector<64x16xf32>
    %c0_1 = arith.constant 0 : index
    %c0_2 = arith.constant 0 : index
    %1 = vector.load %arg4[%c0_1, %c0_2] : memref<64x16xf32, #tpu.memory_space<vmem>>, vector<64x16xf32>
    %c0_3 = arith.constant 0 : index
    %c0_4 = arith.constant 0 : index
    %2 = vector.load %arg5[%c0_3, %c0_4] : memref<9x1xf32, #tpu.memory_space<vmem>>, vector<9x1xf32>
    %c0_5 = arith.constant 0 : index
    %c0_6 = arith.constant 0 : index
    %3 = vector.load %arg7[%c0_5, %c0_6] : memref<9x1xf32, #tpu.memory_space<vmem>>, vector<9x1xf32>
    %cst = arith.constant 0.000000e+00 : f32
    %4 = vector.broadcast %cst : f32 to vector<18x18xf32>
    %c0_7 = arith.constant 0 : index
    %c0_8 = arith.constant 0 : index
    %5 = vector.load %arg10[%c0_7, %c0_8] : memref<18x18xf32, #tpu.memory_space<vmem>>, vector<18x18xf32>
    tpu.vector_store %arg10[%c0_7, %c0_8], %4 {strides = array<i32>} : memref<18x18xf32, #tpu.memory_space<vmem>>, vector<18x18xf32>,
    %c0_9 = arith.constant 0 : index
    %c0_10 = arith.constant 0 : index
    %c0_11 = arith.constant 0 : index
    %6 = vector.load %arg1[%c0_9, %c0_10, %c0_11] : memref<1x16x16xf32, #tpu.memory_space<vmem>>, vector<1x16x16xf32>
    %7 = vector.shape_cast %6 : vector<1x16x16xf32> to vector<16x16xf32>
    %c1 = arith.constant 1 : index
    %c1_12 = arith.constant 1 : index
    %8 = vector.load %arg10[%c1, %c1_12] : memref<18x18xf32, #tpu.memory_space<vmem>>, vector<16x16xf32>
    tpu.vector_store %arg10[%c1, %c1_12], %7 {strides = array<i32>} : memref<18x18xf32, #tpu.memory_space<vmem>>, vector<16x16xf32>,
    %c0_13 = arith.constant 0 : index
    %c0_14 = arith.constant 0 : index
    %9 = vector.load %arg10[%c0_13, %c0_14] : memref<18x18xf32, #tpu.memory_space<vmem>>, vector<18x18xf32>
    %cst_15 = arith.constant 0.000000e+00 : f32
    %10 = vector.broadcast %cst_15 : f32 to vector<16x16xf32>
    %11 = vector.extract_strided_slice %9 {offsets = [0, 0], sizes = [16, 16], strides = [1, 1]} : vector<18x18xf32> to vector<16x16xf32>
    %12 = vector.extract_strided_slice %2 {offsets = [0, 0], sizes = [1, 1], strides = [1, 1]} : vector<9x1xf32> to vector<1x1xf32>
    %13 = vector.broadcast %12 : vector<1x1xf32> to vector<16x16xf32>
    %14 = arith.mulf %11, %13 : vector<16x16xf32>
    %15 = arith.addf %10, %14 : vector<16x16xf32>
    %16 = vector.extract_strided_slice %9 {offsets = [0, 1], sizes = [16, 16], strides = [1, 1]} : vector<18x18xf32> to vector<16x16xf32>
    %17 = vector.extract_strided_slice %2 {offsets = [1, 0], sizes = [1, 1], strides = [1, 1]} : vector<9x1xf32> to vector<1x1xf32>
    %18 = vector.broadcast %17 : vector<1x1xf32> to vector<16x16xf32>
    %19 = arith.mulf %16, %18 : vector<16x16xf32>
    %20 = arith.addf %15, %19 : vector<16x16xf32>
    %21 = vector.extract_strided_slice %9 {offsets = [0, 2], sizes = [16, 16], strides = [1, 1]} : vector<18x18xf32> to vector<16x16xf32>
    %22 = vector.extract_strided_slice %2 {offsets = [2, 0], sizes = [1, 1], strides = [1, 1]} : vector<9x1xf32> to vector<1x1xf32>
    %23 = vector.broadcast %22 : vector<1x1xf32> to vector<16x16xf32>
    %24 = arith.mulf %21, %23 : vector<16x16xf32>
    %25 = arith.addf %20, %24 : vector<16x16xf32>
    %26 = vector.extract_strided_slice %9 {offsets = [1, 0], sizes = [16, 16], strides = [1, 1]} : vector<18x18xf32> to vector<16x16xf32>
    %27 = vector.extract_strided_slice %2 {offsets = [3, 0], sizes = [1, 1], strides = [1, 1]} : vector<9x1xf32> to vector<1x1xf32>
    %28 = vector.broadcast %27 : vector<1x1xf32> to vector<16x16xf32>
    %29 = arith.mulf %26, %28 : vector<16x16xf32>
    %30 = arith.addf %25, %29 : vector<16x16xf32>
    %31 = vector.extract_strided_slice %9 {offsets = [1, 1], sizes = [16, 16], strides = [1, 1]} : vector<18x18xf32> to vector<16x16xf32>
    %32 = vector.extract_strided_slice %2 {offsets = [4, 0], sizes = [1, 1], strides = [1, 1]} : vector<9x1xf32> to vector<1x1xf32>
    %33 = vector.broadcast %32 : vector<1x1xf32> to vector<16x16xf32>
    %34 = arith.mulf %31, %33 : vector<16x16xf32>
    %35 = arith.addf %30, %34 : vector<16x16xf32>
    %36 = vector.extract_strided_slice %9 {offsets = [1, 2], sizes = [16, 16], strides = [1, 1]} : vector<18x18xf32> to vector<16x16xf32>
    %37 = vector.extract_strided_slice %2 {offsets = [5, 0], sizes = [1, 1], strides = [1, 1]} : vector<9x1xf32> to vector<1x1xf32>
    %38 = vector.broadcast %37 : vector<1x1xf32> to vector<16x16xf32>
    %39 = arith.mulf %36, %38 : vector<16x16xf32>
    %40 = arith.addf %35, %39 : vector<16x16xf32>
    %41 = vector.extract_strided_slice %9 {offsets = [2, 0], sizes = [16, 16], strides = [1, 1]} : vector<18x18xf32> to vector<16x16xf32>
    %42 = vector.extract_strided_slice %2 {offsets = [6, 0], sizes = [1, 1], strides = [1, 1]} : vector<9x1xf32> to vector<1x1xf32>
    %43 = vector.broadcast %42 : vector<1x1xf32> to vector<16x16xf32>
    %44 = arith.mulf %41, %43 : vector<16x16xf32>
    %45 = arith.addf %40, %44 : vector<16x16xf32>
    %46 = vector.extract_strided_slice %9 {offsets = [2, 1], sizes = [16, 16], strides = [1, 1]} : vector<18x18xf32> to vector<16x16xf32>
    %47 = vector.extract_strided_slice %2 {offsets = [7, 0], sizes = [1, 1], strides = [1, 1]} : vector<9x1xf32> to vector<1x1xf32>
    %48 = vector.broadcast %47 : vector<1x1xf32> to vector<16x16xf32>
    %49 = arith.mulf %46, %48 : vector<16x16xf32>
    %50 = arith.addf %45, %49 : vector<16x16xf32>
    %51 = vector.extract_strided_slice %9 {offsets = [2, 2], sizes = [16, 16], strides = [1, 1]} : vector<18x18xf32> to vector<16x16xf32>
    %52 = vector.extract_strided_slice %2 {offsets = [8, 0], sizes = [1, 1], strides = [1, 1]} : vector<9x1xf32> to vector<1x1xf32>
    %53 = vector.broadcast %52 : vector<1x1xf32> to vector<16x16xf32>
    %54 = arith.mulf %51, %53 : vector<16x16xf32>
    %55 = arith.addf %50, %54 : vector<16x16xf32>
    %c0_16 = arith.constant 0 : index
    %c0_17 = arith.constant 0 : index
    %56 = vector.load %arg6[%c0_16, %c0_17] : memref<1x1xf32, #tpu.memory_space<vmem>>, vector<1x1xf32>
    %57 = vector.broadcast %56 : vector<1x1xf32> to vector<16x16xf32>
    %58 = arith.addf %55, %57 : vector<16x16xf32>
    %cst_18 = arith.constant 0.000000e+00 : f32
    %59 = vector.broadcast %cst_18 : f32 to vector<16x16xf32>
    %60 = arith.maximumf %58, %59 : vector<16x16xf32>
    %cst_19 = arith.constant dense<0.000000e+00> : vector<64x16xf32>
    %61 = tpu.matmul %0, %60, %cst_19 {dimension_numbers = #tpu.dot_dimension_numbers<[1], [0], [0], [1], [0, 0, 1, 1], [], []>} : vector<64x16xf32>, vector<16x16xf32>, vector<64x16xf32> -> vector<64x16xf32>
    %cst_20 = arith.constant dense<0.000000e+00> : vector<64x64xf32>
    %62 = tpu.matmul %61, %1, %cst_20 {dimension_numbers = #tpu.dot_dimension_numbers<[1], [1], [0], [0], [0, 0, 1, 0], [], []>} : vector<64x16xf32>, vector<64x16xf32>, vector<64x64xf32> -> vector<64x64xf32>
    %cst_21 = arith.constant 0.000000e+00 : f32
    %63 = vector.broadcast %cst_21 : f32 to vector<66x66xf32>
    %c0_22 = arith.constant 0 : index
    %c0_23 = arith.constant 0 : index
    %64 = vector.load %arg11[%c0_22, %c0_23] : memref<66x66xf32, #tpu.memory_space<vmem>>, vector<66x66xf32>
    tpu.vector_store %arg11[%c0_22, %c0_23], %63 {strides = array<i32>} : memref<66x66xf32, #tpu.memory_space<vmem>>, vector<66x66xf32>,
    %c1_24 = arith.constant 1 : index
    %c1_25 = arith.constant 1 : index
    %65 = vector.load %arg11[%c1_24, %c1_25] : memref<66x66xf32, #tpu.memory_space<vmem>>, vector<64x64xf32>
    tpu.vector_store %arg11[%c1_24, %c1_25], %62 {strides = array<i32>} : memref<66x66xf32, #tpu.memory_space<vmem>>, vector<64x64xf32>,
    %c0_26 = arith.constant 0 : index
    %c0_27 = arith.constant 0 : index
    %66 = vector.load %arg11[%c0_26, %c0_27] : memref<66x66xf32, #tpu.memory_space<vmem>>, vector<66x66xf32>
    %cst_28 = arith.constant 0.000000e+00 : f32
    %67 = vector.broadcast %cst_28 : f32 to vector<64x64xf32>
    %68 = vector.extract_strided_slice %66 {offsets = [0, 0], sizes = [64, 64], strides = [1, 1]} : vector<66x66xf32> to vector<64x64xf32>
    %69 = vector.extract_strided_slice %3 {offsets = [0, 0], sizes = [1, 1], strides = [1, 1]} : vector<9x1xf32> to vector<1x1xf32>
    %70 = vector.broadcast %69 : vector<1x1xf32> to vector<64x64xf32>
    %71 = arith.mulf %68, %70 : vector<64x64xf32>
    %72 = arith.addf %67, %71 : vector<64x64xf32>
    %73 = vector.extract_strided_slice %66 {offsets = [0, 1], sizes = [64, 64], strides = [1, 1]} : vector<66x66xf32> to vector<64x64xf32>
    %74 = vector.extract_strided_slice %3 {offsets = [1, 0], sizes = [1, 1], strides = [1, 1]} : vector<9x1xf32> to vector<1x1xf32>
    %75 = vector.broadcast %74 : vector<1x1xf32> to vector<64x64xf32>
    %76 = arith.mulf %73, %75 : vector<64x64xf32>
    %77 = arith.addf %72, %76 : vector<64x64xf32>
    %78 = vector.extract_strided_slice %66 {offsets = [0, 2], sizes = [64, 64], strides = [1, 1]} : vector<66x66xf32> to vector<64x64xf32>
    %79 = vector.extract_strided_slice %3 {offsets = [2, 0], sizes = [1, 1], strides = [1, 1]} : vector<9x1xf32> to vector<1x1xf32>
    %80 = vector.broadcast %79 : vector<1x1xf32> to vector<64x64xf32>
    %81 = arith.mulf %78, %80 : vector<64x64xf32>
    %82 = arith.addf %77, %81 : vector<64x64xf32>
    %83 = vector.extract_strided_slice %66 {offsets = [1, 0], sizes = [64, 64], strides = [1, 1]} : vector<66x66xf32> to vector<64x64xf32>
    %84 = vector.extract_strided_slice %3 {offsets = [3, 0], sizes = [1, 1], strides = [1, 1]} : vector<9x1xf32> to vector<1x1xf32>
    %85 = vector.broadcast %84 : vector<1x1xf32> to vector<64x64xf32>
    %86 = arith.mulf %83, %85 : vector<64x64xf32>
    %87 = arith.addf %82, %86 : vector<64x64xf32>
    %88 = vector.extract_strided_slice %66 {offsets = [1, 1], sizes = [64, 64], strides = [1, 1]} : vector<66x66xf32> to vector<64x64xf32>
    %89 = vector.extract_strided_slice %3 {offsets = [4, 0], sizes = [1, 1], strides = [1, 1]} : vector<9x1xf32> to vector<1x1xf32>
    %90 = vector.broadcast %89 : vector<1x1xf32> to vector<64x64xf32>
    %91 = arith.mulf %88, %90 : vector<64x64xf32>
    %92 = arith.addf %87, %91 : vector<64x64xf32>
    %93 = vector.extract_strided_slice %66 {offsets = [1, 2], sizes = [64, 64], strides = [1, 1]} : vector<66x66xf32> to vector<64x64xf32>
    %94 = vector.extract_strided_slice %3 {offsets = [5, 0], sizes = [1, 1], strides = [1, 1]} : vector<9x1xf32> to vector<1x1xf32>
    %95 = vector.broadcast %94 : vector<1x1xf32> to vector<64x64xf32>
    %96 = arith.mulf %93, %95 : vector<64x64xf32>
    %97 = arith.addf %92, %96 : vector<64x64xf32>
    %98 = vector.extract_strided_slice %66 {offsets = [2, 0], sizes = [64, 64], strides = [1, 1]} : vector<66x66xf32> to vector<64x64xf32>
    %99 = vector.extract_strided_slice %3 {offsets = [6, 0], sizes = [1, 1], strides = [1, 1]} : vector<9x1xf32> to vector<1x1xf32>
    %100 = vector.broadcast %99 : vector<1x1xf32> to vector<64x64xf32>
    %101 = arith.mulf %98, %100 : vector<64x64xf32>
    %102 = arith.addf %97, %101 : vector<64x64xf32>
    %103 = vector.extract_strided_slice %66 {offsets = [2, 1], sizes = [64, 64], strides = [1, 1]} : vector<66x66xf32> to vector<64x64xf32>
    %104 = vector.extract_strided_slice %3 {offsets = [7, 0], sizes = [1, 1], strides = [1, 1]} : vector<9x1xf32> to vector<1x1xf32>
    %105 = vector.broadcast %104 : vector<1x1xf32> to vector<64x64xf32>
    %106 = arith.mulf %103, %105 : vector<64x64xf32>
    %107 = arith.addf %102, %106 : vector<64x64xf32>
    %108 = vector.extract_strided_slice %66 {offsets = [2, 2], sizes = [64, 64], strides = [1, 1]} : vector<66x66xf32> to vector<64x64xf32>
    %109 = vector.extract_strided_slice %3 {offsets = [8, 0], sizes = [1, 1], strides = [1, 1]} : vector<9x1xf32> to vector<1x1xf32>
    %110 = vector.broadcast %109 : vector<1x1xf32> to vector<64x64xf32>
    %111 = arith.mulf %108, %110 : vector<64x64xf32>
    %112 = arith.addf %107, %111 : vector<64x64xf32>
    %c0_29 = arith.constant 0 : index
    %c0_30 = arith.constant 0 : index
    %113 = vector.load %arg8[%c0_29, %c0_30] : memref<1x1xf32, #tpu.memory_space<vmem>>, vector<1x1xf32>
    %114 = vector.broadcast %113 : vector<1x1xf32> to vector<64x64xf32>
    %115 = arith.addf %112, %114 : vector<64x64xf32>
    %cst_31 = arith.constant 0.000000e+00 : f32
    %116 = vector.broadcast %cst_31 : f32 to vector<64x64xf32>
    %117 = arith.maximumf %115, %116 : vector<64x64xf32>
    %c0_32 = arith.constant 0 : index
    %c0_33 = arith.constant 0 : index
    %c0_34 = arith.constant 0 : index
    %118 = vector.load %arg2[%c0_32, %c0_33, %c0_34] : memref<1x16x16xf32, #tpu.memory_space<vmem>>, vector<1x16x16xf32>
    %119 = vector.shape_cast %118 : vector<1x16x16xf32> to vector<16x16xf32>
    %cst_35 = arith.constant dense<0.000000e+00> : vector<64x16xf32>
    %120 = tpu.matmul %0, %119, %cst_35 {dimension_numbers = #tpu.dot_dimension_numbers<[1], [0], [0], [1], [0, 0, 1, 1], [], []>} : vector<64x16xf32>, vector<16x16xf32>, vector<64x16xf32> -> vector<64x16xf32>
    %cst_36 = arith.constant dense<0.000000e+00> : vector<64x64xf32>
    %121 = tpu.matmul %120, %1, %cst_36 {dimension_numbers = #tpu.dot_dimension_numbers<[1], [1], [0], [0], [0, 0, 1, 0], [], []>} : vector<64x16xf32>, vector<64x16xf32>, vector<64x64xf32> -> vector<64x64xf32>
    %122 = arith.addf %117, %121 : vector<64x64xf32>
    %c0_37 = arith.constant 0 : index
    %c0_38 = arith.constant 0 : index
    %c0_39 = arith.constant 0 : index
    %123 = vector.load %arg9[%c0_37, %c0_38, %c0_39] : memref<1x64x64xf32, #tpu.memory_space<vmem>>, vector<1x64x64xf32>
    %124 = vector.shape_cast %123 : vector<1x64x64xf32> to vector<64x64xf32>
    %125 = vector.shape_cast %122 : vector<64x64xf32> to vector<1x64x64xf32>
    tpu.vector_store %arg9[%c0_37, %c0_38, %c0_39], %125 {strides = array<i32>} : memref<1x64x64xf32, #tpu.memory_space<vmem>>, vector<1x64x64xf32>,
    return
  }
  func.func @transform_0(%arg0: i32) -> (i32, i32, i32) {
    %c0_i32 = arith.constant 0 : i32
    %c0_i32_0 = arith.constant 0 : i32
    %c0_i32_1 = arith.constant 0 : i32
    return %arg0, %c0_i32, %c0_i32_0 : i32, i32, i32
  }
  func.func @transform_1(%arg0: i32) -> (i32, i32, i32) {
    %c0_i32 = arith.constant 0 : i32
    %c0_i32_0 = arith.constant 0 : i32
    %c0_i32_1 = arith.constant 0 : i32
    return %arg0, %c0_i32, %c0_i32_0 : i32, i32, i32
  }
  func.func @transform_2(%arg0: i32) -> (i32, i32) {
    %c0_i32 = arith.constant 0 : i32
    %c0_i32_0 = arith.constant 0 : i32
    %c0_i32_1 = arith.constant 0 : i32
    return %c0_i32, %c0_i32_0 : i32, i32
  }
  func.func @transform_3(%arg0: i32) -> (i32, i32) {
    %c0_i32 = arith.constant 0 : i32
    %c0_i32_0 = arith.constant 0 : i32
    %c0_i32_1 = arith.constant 0 : i32
    return %c0_i32, %c0_i32_0 : i32, i32
  }
  func.func @transform_4(%arg0: i32) -> (i32, i32) {
    %c0_i32 = arith.constant 0 : i32
    %c0_i32_0 = arith.constant 0 : i32
    %c0_i32_1 = arith.constant 0 : i32
    return %c0_i32, %c0_i32_0 : i32, i32
  }
  func.func @transform_5(%arg0: i32) -> (i32, i32) {
    %c0_i32 = arith.constant 0 : i32
    %c0_i32_0 = arith.constant 0 : i32
    %c0_i32_1 = arith.constant 0 : i32
    return %c0_i32, %c0_i32_0 : i32, i32
  }
  func.func @transform_6(%arg0: i32) -> (i32, i32) {
    %c0_i32 = arith.constant 0 : i32
    %c0_i32_0 = arith.constant 0 : i32
    %c0_i32_1 = arith.constant 0 : i32
    return %c0_i32, %c0_i32_0 : i32, i32
  }
  func.func @transform_7(%arg0: i32) -> (i32, i32) {
    %c0_i32 = arith.constant 0 : i32
    %c0_i32_0 = arith.constant 0 : i32
    %c0_i32_1 = arith.constant 0 : i32
    return %c0_i32, %c0_i32_0 : i32, i32
  }
  func.func @transform_8(%arg0: i32) -> (i32, i32, i32) {
    %c0_i32 = arith.constant 0 : i32
    %c0_i32_0 = arith.constant 0 : i32
    %c0_i32_1 = arith.constant 0 : i32
    return %arg0, %c0_i32, %c0_i32_0 : i32, i32, i32
  }
}

</mosaic_0001>

<bundles_post_ra>
// kernel: ynet_forward.9
= control target key start
LH: loop header
LB: loop body
LE: loop exit
PB: predicated region body
PF: predicated region fallthrough
CT: control target
= control target key end

     0   :  { %s606_s12 = smov 0   ;;  %s688_s0 = inlined_call_operand.vmem [shape: f32[2,12,12,16], index: 0, kind: input, shape index: {}]   ;;  %s689_s1 = inlined_call_operand.vmem [shape: f32[16,144], index: 1, kind: input, shape index: {}]   ;;  %s690_s2 = inlined_call_operand.vmem [shape: f32[1,16], index: 2, kind: input, shape index: {}]   ;;  %s691_s3 = inlined_call_operand.vmem [shape: f32[2,10,10,16], index: 3, kind: output, shape index: {}]  }
   0x1 LB: > { %s488_s13 = sadd.s32 4294967295, %s568_s12   ;;  %p492_p0 = scmp.ge.s32.totalorder %s568_s12, 1  ;;  %s568_s12 = sphi %s606_s12, %s13_s12  }
   0x2   : > { %p137_p1 = scmp.lt.s32.totalorder %s568_s12, 3 }
   0x4   : > { %p138_p2 = pnand %p492_p0, %p137_p1 }
   0x5   : > { %p161_p3 = scmp.lt.s32.totalorder (!%p138_p2), %s488_s13, 1  ;;  %s641_s5 = smov (!%p138_p2), 0  }
   0x6   : > { %141 = sbr.rel (%p138_p2) target bundleno = 376 (0x178), region = 32 }
   0xb   : > { %v171_v0 = vld [vmem:[%s689_s1] sm:$0xff]  ;;  %v172_v1 = vld [vmem:[%s689_s1 + $0x8] sm:$0xff]  ;;  %v173_v2 = vld [vmem:[%s689_s1 + $0x10] sm:$0xff]  ;;  %s693_s13 = smov (!%p161_p3, %s488_s13), 1 }
   0xc   : > { %v174_v3 = vld [vmem:[%s689_s1 + $0x18] sm:$0xff]  ;;  %v629_v4 = vld [vmem:[%s690_s2] ss:$0 sm:$0xff]  ;;  %s520_s24 = smul.u32 192, %s693_s13 }
   0xd   : > { %s521_s25 = smul.u32 160, %s693_s13 }
   0xe   : > { %s634_s28 = scalar_lea.vmem %s688_s0, %s520_s24 }
   0xf   : > { %s639_s4 = scalar_lea.vmem %s691_s3, %s521_s25 }
  0x10 LB: >> { %221 = vmatprep.subr.mxu0 %v174_v3  ;;  %516 = vmatprep.subr.mxu1 %v174_v3  ;;  %s495_s6 = sshll.u32 %s572_s5, 4  ;;  %vm186_vm0 = vcmask 130048   ;;  %v578_v5 = vmov 0.0   ;;  %s514_s8 = sshll.u32 %s572_s5, 5  ;;  %vm276_vm1 = vcmask 125952   ;;  %s572_s5 = sphi %s641_s5, %s181_s5  }
  0x11   : >> { %222 = vmatpush1.msra.mxu0 %v173_v2  ;;  %518 = vmatpush1.msra.mxu1 %v173_v2  ;;  %s183_s7 = scalar_lea.vmem %s634_s28, %s495_s6  ;;  %s272_s9 = scalar_lea.vmem [#allocation2], %s514_s8 }
  0x12   : >> { %223 = vmatprep.subr.mxu0 %v172_v1  ;;  %517 = vmatprep.subr.mxu1 %v172_v1  ;;  %v184_v6 = vld [vmem:[%s183_s7] sm:$0xff]  ;;  %v185_v7 = vld [vmem:[%s183_s7 + $0x8] sm:$0xf]  ;;  %s181_s5 = sadd.s32 1, %s572_s5  }
  0x13   : >> { %224 = vmatpush1.msra.mxu0 %v171_v0  ;;  %519 = vmatpush1.msra.mxu1 %v171_v0  ;;  %p178_p4 = scmp.ge.s32.totalorder %s181_s5, 12  }
  0x14   : >> { %257 = vmatprep.mubr.f32.mxu0 %v578_v5  ;;  %263 = vmatprep.mubr.f32.mxu1 %v578_v5  ;;  %s655_s10 = smov (%p178_p4), 0  }
  0x15   : >> { %496 = vmatmul.mubr.msk.f32.vlgmr.msra.gmra.mxu0 %vm186_vm0, %v184_v6  ;;  %497 = vmatmul.mubr.msk.f32.vlgmr.msra.gmra.mxu1 %vm186_vm0, %v185_v7 }
  0xd5   : >> { %v259_v8 = vpop.f32.mrf.mxu0  ;;  %v265_v9 = vpop.f32.mrf.mxu1  ;;  %180 = sbr.rel (!%p178_p4) target bundleno = 16 (0x10), region = 82 }
  0xd6   : >> { %273 = vst [vmem:[%s272_s9] sm:$0xff] %v259_v8  ;;  %275 = vst [vmem:[%s272_s9 + $0x10] sm:$0xf] %v265_v9 }
  0xd7   : >> { %v261_v10 = vpop.f32.mrf.mxu0  ;;  %v267_v11 = vpop.f32.mrf.mxu1 }
  0xd8   : >> { %274 = vst.msk [vmem:[%s272_s9 + $0x8] sm:$0xff] %vm186_vm0, %v261_v10 }
  0xd9   : >> { %277 = vst.msk [vmem:[%s272_s9 + $0x18] sm:$0xf] %vm276_vm1, %v267_v11 }
  0xda LB: >> { %s515_s11 = sshll.u32 %s576_s10, 5  ;;  %s579_s14 = smov 96   ;;  %vm305_vm2 = vcmask 1045504   ;;  %vm293_vm3 = vcmask 1046528   ;;  %vm407_vm4 = vcmask 123904   ;;  %s576_s10 = sphi %s655_s10, %s283_s10  }
  0xdb   : >> { %s661_s13 = scalar_lea.vmem [#allocation2], %s515_s11  ;;  %s580_s15 = smov 112  }
  0xdc   : >> { %s581_s16 = smov 80   ;;  %s582_s17 = smov 64  }
  0xdd   : >> { %s583_s18 = smov 48   ;;  %s584_s19 = smov 32  }
  0xde   : >> { %s585_s20 = smov 16   ;;  %s511_s21 = sshll.u32 %s576_s10, 4 }
  0xdf   : >> { %s404_s22 = scalar_lea.vmem %s639_s4, %s511_s21  ;;  %s283_s10 = sadd.s32 1, %s576_s10  }
  0xe0   : >> { %v288_v12 = vld [vmem:[%s661_s13 + $0x10] sm:$0xf]  ;;  %v287_v15 = vld [vmem:[%s661_s13] sm:$0xff]  ;;  %v509_v24 = vld [vmem:[%s661_s13 + $0x58] sm:$0xf]  ;;  %p280_p5 = scmp.ge.s32.totalorder %s283_s10, 10  }
  0xe1   : >> { %v307_v13 = vrot.slane %v288_v12, 2  ;;  %v295_v14 = vrot.slane %v288_v12, 1  ;;  %v504_v16 = vld [vmem:[%s661_s13 + $0x30] sm:$0xf]  ;;  %v503_v17 = vld [vmem:[%s661_s13 + $0x20] sm:$0xff]  ;;  %v306_v18 = vrot.slane %v287_v15, 2 }
  0xe2   : >> { %v294_v19 = vrot.slane %v287_v15, 1  ;;  %v333_v20 = vrot.slane %v503_v17, 1  ;;  %v334_v23 = vrot.slane %v504_v16, 1  ;;  %v387_v25 = vrot.slane %v509_v24, 2  ;;  %v507_v29 = vld [vmem:[%s661_s13 + $0x48] sm:$0xff]  ;;  %v506_v34 = vld [vmem:[%s661_s13 + $0x40] sm:$0xff] }
  0xe3   : >> { %311 = vrot.lane.b32.xlu1 %v307_v13, %s579_s14  ;;  %299 = vrot.lane.b32.xlu0 %v295_v14, %s580_s15  ;;  %v308_v21 = vsel %vm305_vm2, %v306_v18, %v307_v13  ;;  %v344_v26 = vrot.slane %v503_v17, 2  ;;  %v345_v28 = vrot.slane %v504_v16, 2  ;;  %v386_v30 = vrot.slane %v507_v29, 2  ;;  %v508_v33 = vld [vmem:[%s661_s13 + $0x50] sm:$0xf] }
  0xe4   : >> { %v296_v22 = vsel %vm293_vm3, %v294_v19, %v295_v14  ;;  %v335_v27 = vsel %vm293_vm3, %v333_v20, %v334_v23  ;;  %v374_v35 = vrot.slane %v508_v33, 1  ;;  %v373_v36 = vrot.slane %v506_v34, 1 }
  0xe5   : >> { %v388_v31 = vsel %vm305_vm2, %v386_v30, %v387_v25  ;;  %v346_v32 = vsel %vm305_vm2, %v344_v26, %v345_v28 }
  0xe6   : >> { %v375_v37 = vsel %vm293_vm3, %v373_v36, %v374_v35 }
  0xe7   : >> { %327 = vrot.lane.b32.xlu1 %v504_v16, %s581_s16  ;;  %325 = vrot.lane.b32.xlu0 %v503_v17, %s581_s16 }
  0xeb   : >> { %309 = vrot.lane.b32.xlu1 %v308_v21, %s579_s14  ;;  %297 = vrot.lane.b32.xlu0 %v296_v22, %s580_s15 }
  0xef   : >> { %338 = vrot.lane.b32.xlu1 %v334_v23, %s582_s17  ;;  %336 = vrot.lane.b32.xlu0 %v335_v27, %s582_s17 }
  0xf3   : >> { %349 = vrot.lane.b32.xlu1 %v345_v28, %s583_s18  ;;  %347 = vrot.lane.b32.xlu0 %v346_v32, %s583_s18 }
  0xf7   : >> { %367 = vrot.lane.b32.xlu1 %v508_v33, %s584_s19  ;;  %365 = vrot.lane.b32.xlu0 %v506_v34, %s584_s19 }
  0xfb   : >> { %378 = vrot.lane.b32.xlu1 %v374_v35, %s585_s20  ;;  %376 = vrot.lane.b32.xlu0 %v375_v37, %s585_s20 }
 0x155   : >> { %v312_v38 = vpop.permute.xlu1 %311  ;;  %v300_v39 = vpop.permute.xlu0 %299 }
 0x156   : >> { %v304_v44 = vadd.f32 %v300_v39, %v288_v12 }
 0x158   : >> { %v316_v49 = vadd.f32 %v312_v38, %v304_v44 }
 0x159   : >> { %v328_v40 = vpop.permute.xlu1 %327  ;;  %v326_v41 = vpop.permute.xlu0 %325 }
 0x15a   : >> { %v332_v53 = vadd.f32 %v328_v40, %v316_v49 }
 0x15d   : >> { %v310_v42 = vpop.permute.xlu1 %309  ;;  %v298_v43 = vpop.permute.xlu0 %297 }
 0x15e   : >> { %v303_v45 = vadd.f32 %v298_v43, %v287_v15 }
 0x160   : >> { %v315_v46 = vadd.f32 %v310_v42, %v303_v45 }
 0x161   : >> { %v339_v47 = vpop.permute.xlu1 %338  ;;  %v337_v48 = vpop.permute.xlu0 %336 }
 0x162   : >> { %v331_v50 = vadd.f32 %v326_v41, %v315_v46  ;;  %v343_v55 = vadd.f32 %v339_v47, %v332_v53 }
 0x164   : >> { %v342_v54 = vadd.f32 %v337_v48, %v331_v50 }
 0x165   : >> { %v350_v51 = vpop.permute.xlu1 %349  ;;  %v348_v52 = vpop.permute.xlu0 %347 }
 0x166   : >> { %v354_v58 = vadd.f32 %v350_v51, %v343_v55  ;;  %v353_v59 = vadd.f32 %v348_v52, %v342_v54 }
 0x169   : >> { %v368_v56 = vpop.permute.xlu1 %367  ;;  %v366_v57 = vpop.permute.xlu0 %365 }
 0x16a   : >> { %v372_v60 = vadd.f32 %v368_v56, %v354_v58  ;;  %v371_v61 = vadd.f32 %v366_v57, %v353_v59 }
 0x16d   : >> { %v379_v62 = vpop.permute.xlu1 %378  ;;  %v377_v63 = vpop.permute.xlu0 %376 }
 0x16e   : >> { %v383_v0 = vadd.f32 %v379_v62, %v372_v60  ;;  %v382_v1 = vadd.f32 %v377_v63, %v371_v61 }
 0x170   : >> { %v392_v2 = vadd.f32 %v387_v25, %v383_v0  ;;  %v391_v3 = vadd.f32 %v388_v31, %v382_v1 }
 0x172   : >> { %v400_v5 = vadd.f32 %v629_v4, %v392_v2  ;;  %v399_v6 = vadd.f32 %v629_v4, %v391_v3 }
 0x173   : > { %282 = sbr.rel (!%p280_p5) target bundleno = 218 (0xda), region = 93 }
 0x174   : >> { %v402_v7 = vmax.f32 %v400_v5, 0.0  ;;  %v401_v8 = vmax.f32 %v399_v6, 0.0 }
 0x176   : >> { %408 = vst.msk [vmem:[%s404_s22 + $0x8] sm:$0x3] %vm407_vm4, %v402_v7 }
 0x177   : >> { %406 = vst.msk [vmem:[%s404_s22] sm:$0xff] %vm186_vm0, %v401_v8 }
 0x178 PF: > { %s13_s12 = sadd.s32 1, %s568_s12  }
 0x179   : > { %p10_p6 = scmp.ge.s32.totalorder %s13_s12, 4  }
 0x17b   :  { %12 = sbr.rel (!%p10_p6) target bundleno = 1 (0x1), region = 104 }

// kernel: ynet_forward.7
= control target key start
LH: loop header
LB: loop body
LE: loop exit
PB: predicated region body
PF: predicated region fallthrough
CT: control target
= control target key end

     0   :  { %s540_s12 = smov 0   ;;  %s612_s0 = inlined_call_operand.vmem [shape: f32[2,16,16,1], index: 0, kind: input, shape index: {}]   ;;  %s613_s1 = inlined_call_operand.vmem [shape: f32[1,144], index: 1, kind: input, shape index: {}]   ;;  %s614_s2 = inlined_call_operand.vmem [shape: f32[1,16], index: 2, kind: input, shape index: {}]   ;;  %s615_s3 = inlined_call_operand.vmem [shape: f32[2,14,14,16], index: 3, kind: output, shape index: {}]  }
   0x1 LB: > { %s426_s13 = sadd.s32 4294967295, %s502_s12   ;;  %p430_p0 = scmp.ge.s32.totalorder %s502_s12, 1  ;;  %s502_s12 = sphi %s540_s12, %s13_s12  }
   0x2   : > { %p137_p1 = scmp.lt.s32.totalorder %s502_s12, 3 }
   0x4   : > { %p138_p2 = pnand %p430_p0, %p137_p1 }
   0x5   : > { %p161_p3 = scmp.lt.s32.totalorder (!%p138_p2), %s426_s13, 1  ;;  %s566_s26 = smov (!%p138_p2), 0  }
   0x6   : > { %141 = sbr.rel (%p138_p2) target bundleno = 307 (0x133), region = 32 }
   0xb   : > { %v171_v0 = vld [vmem:[%s613_s1] sm:$0x3]  ;;  %s617_s13 = smov (!%p161_p3, %s426_s13), 1 }
   0xc   : > { %v554_v1 = vld [vmem:[%s614_s2] ss:$0 sm:$0xff]  ;;  %s451_s18 = sshll.u32 %s617_s13, 8  ;;  %s454_s19 = smul.u32 224, %s617_s13 }
   0xd   : > { %s559_s22 = scalar_lea.vmem %s612_s0, %s451_s18 }
   0xe   : > { %s564_s25 = scalar_lea.vmem %s615_s3, %s454_s19 }
   0xf LB: >> { %v512_v2 = vmov 0   ;;  %s434_s27 = sshll.u32 %s506_s26, 4  ;;  %v194_v5 = vlaneseq  ;;  %s452_s29 = sshll.u32 %s506_s26, 5  ;;  %vm212_vm0 = vcmask 130048   ;;  %s506_s26 = sphi %s566_s26, %s178_s26  }
  0x10   : >> { %487 = vset.pattern.permute.xlu0 %v512_v2  ;;  %s180_s28 = scalar_lea.vmem %s559_s22, %s434_s27  ;;  %s210_s30 = scalar_lea.vmem [#allocation2], %s452_s29 }
  0x11   : >> { %v181_v3 = vld [vmem:[%s180_s28] sm:$0xff]  ;;  %v182_v4 = vld [vmem:[%s180_s28 + $0x8] sm:$0xff]  ;;  %v195_v6 = vshrl.u32 %v194_v5, 7  ;;  %s178_s26 = sadd.s32 1, %s506_s26  }
  0x12   : >> { %185 = vperm.xlu0 %487, %v181_v3   ;;  %p175_p4 = scmp.ge.s32.totalorder %s178_s26, 16  }
  0x13   : >> { %v196_v7 = vsub.s32 0, %v195_v6  ;;  %v200_v8 = vsub.s32 1, %v195_v6  ;;  %s579_s4 = smov (%p175_p4), 0  }
  0x15   : >> { %v197_v9 = vrot.slane %v171_v0, %v196_v7  ;;  %v201_v10 = vrot.slane %v171_v0, %v200_v8 }
  0x16   : >> { %190 = vperm.xlu0 %487, %v182_v4  }
  0x8d   : >> { %v186_v11 = vpop.permute.xlu0 %185 }
  0x8e   : >> { %v204_v12 = vmul.f32 %v197_v9, %v186_v11  ;;  %v205_v13 = vmul.f32 %v201_v10, %v186_v11 }
  0x90   : >> { %211 = vst [vmem:[%s210_s30] sm:$0xff] %v204_v12  ;;  %213 = vst.msk [vmem:[%s210_s30 + $0x8] sm:$0xff] %vm212_vm0, %v205_v13  ;;  %177 = sbr.rel (!%p175_p4) target bundleno = 15 (0xf), region = 82 }
  0x91   : >> { %v191_v14 = vpop.permute.xlu0 %190 }
  0x92   : >> { %v206_v15 = vmul.f32 %v197_v9, %v191_v14  ;;  %v207_v16 = vmul.f32 %v201_v10, %v191_v14 }
  0x94   : >> { %214 = vst [vmem:[%s210_s30 + $0x10] sm:$0xff] %v206_v15  ;;  %215 = vst.msk [vmem:[%s210_s30 + $0x18] sm:$0xff] %vm212_vm0, %v207_v16 }
  0x95 LB: >> { %s453_s5 = sshll.u32 %s510_s4, 5  ;;  %s513_s7 = smov 96   ;;  %vm243_vm1 = vcmask 1045504   ;;  %vm231_vm2 = vcmask 1046528   ;;  %vm345_vm3 = vcmask 128000   ;;  %s510_s4 = sphi %s579_s4, %s221_s4  }
  0x96   : >> { %s585_s6 = scalar_lea.vmem [#allocation2], %s453_s5  ;;  %s514_s8 = smov 112  }
  0x97   : >> { %s515_s9 = smov 80   ;;  %s516_s10 = smov 64  }
  0x98   : >> { %s517_s11 = smov 48   ;;  %s518_s13 = smov 32  }
  0x99   : >> { %s519_s14 = smov 16   ;;  %s448_s15 = sshll.u32 %s510_s4, 4 }
  0x9a   : >> { %s342_s16 = scalar_lea.vmem %s564_s25, %s448_s15  ;;  %s221_s4 = sadd.s32 1, %s510_s4  }
  0x9b   : >> { %v226_v17 = vld [vmem:[%s585_s6 + $0x10] sm:$0xff]  ;;  %v225_v20 = vld [vmem:[%s585_s6] sm:$0xff]  ;;  %v446_v29 = vld [vmem:[%s585_s6 + $0x58] sm:$0xff]  ;;  %p218_p5 = scmp.ge.s32.totalorder %s221_s4, 14  }
  0x9c   : >> { %v245_v18 = vrot.slane %v226_v17, 2  ;;  %v233_v19 = vrot.slane %v226_v17, 1  ;;  %v441_v21 = vld [vmem:[%s585_s6 + $0x30] sm:$0xff]  ;;  %v440_v22 = vld [vmem:[%s585_s6 + $0x20] sm:$0xff]  ;;  %v244_v23 = vrot.slane %v225_v20, 2  ;;  %v232_v24 = vrot.slane %v225_v20, 1 }
  0x9d   : >> { %v271_v25 = vrot.slane %v440_v22, 1  ;;  %v272_v28 = vrot.slane %v441_v21, 1  ;;  %v325_v30 = vrot.slane %v446_v29, 2  ;;  %v282_v31 = vrot.slane %v440_v22, 2  ;;  %v444_v34 = vld [vmem:[%s585_s6 + $0x48] sm:$0xff]  ;;  %v445_v38 = vld [vmem:[%s585_s6 + $0x50] sm:$0xff] }
  0x9e   : >> { %249 = vrot.lane.b32.xlu1 %v245_v18, %s513_s7  ;;  %237 = vrot.lane.b32.xlu0 %v233_v19, %s514_s8  ;;  %v246_v26 = vsel %vm243_vm1, %v244_v23, %v245_v18  ;;  %v234_v27 = vsel %vm231_vm2, %v232_v24, %v233_v19  ;;  %v283_v33 = vrot.slane %v441_v21, 2  ;;  %v324_v35 = vrot.slane %v444_v34, 2  ;;  %v443_v39 = vld [vmem:[%s585_s6 + $0x40] sm:$0xff] }
  0x9f   : >> { %v273_v32 = vsel %vm231_vm2, %v271_v25, %v272_v28  ;;  %v312_v40 = vrot.slane %v445_v38, 1  ;;  %v311_v41 = vrot.slane %v443_v39, 1 }
  0xa0   : >> { %v326_v36 = vsel %vm243_vm1, %v324_v35, %v325_v30  ;;  %v284_v37 = vsel %vm243_vm1, %v282_v31, %v283_v33 }
  0xa1   : >> { %v313_v42 = vsel %vm231_vm2, %v311_v41, %v312_v40 }
  0xa2   : >> { %265 = vrot.lane.b32.xlu1 %v441_v21, %s515_s9  ;;  %263 = vrot.lane.b32.xlu0 %v440_v22, %s515_s9 }
  0xa6   : >> { %247 = vrot.lane.b32.xlu1 %v246_v26, %s513_s7  ;;  %235 = vrot.lane.b32.xlu0 %v234_v27, %s514_s8 }
  0xaa   : >> { %276 = vrot.lane.b32.xlu1 %v272_v28, %s516_s10  ;;  %274 = vrot.lane.b32.xlu0 %v273_v32, %s516_s10 }
  0xae   : >> { %287 = vrot.lane.b32.xlu1 %v283_v33, %s517_s11  ;;  %285 = vrot.lane.b32.xlu0 %v284_v37, %s517_s11 }
  0xb2   : >> { %305 = vrot.lane.b32.xlu1 %v445_v38, %s518_s13  ;;  %303 = vrot.lane.b32.xlu0 %v443_v39, %s518_s13 }
  0xb6   : >> { %316 = vrot.lane.b32.xlu1 %v312_v40, %s519_s14  ;;  %314 = vrot.lane.b32.xlu0 %v313_v42, %s519_s14 }
 0x110   : >> { %v250_v43 = vpop.permute.xlu1 %249  ;;  %v238_v44 = vpop.permute.xlu0 %237 }
 0x111   : >> { %v242_v49 = vadd.f32 %v238_v44, %v226_v17 }
 0x113   : >> { %v254_v54 = vadd.f32 %v250_v43, %v242_v49 }
 0x114   : >> { %v266_v45 = vpop.permute.xlu1 %265  ;;  %v264_v46 = vpop.permute.xlu0 %263 }
 0x115   : >> { %v270_v58 = vadd.f32 %v266_v45, %v254_v54 }
 0x118   : >> { %v248_v47 = vpop.permute.xlu1 %247  ;;  %v236_v48 = vpop.permute.xlu0 %235 }
 0x119   : >> { %v241_v50 = vadd.f32 %v236_v48, %v225_v20 }
 0x11b   : >> { %v253_v51 = vadd.f32 %v248_v47, %v241_v50 }
 0x11c   : >> { %v277_v52 = vpop.permute.xlu1 %276  ;;  %v275_v53 = vpop.permute.xlu0 %274 }
 0x11d   : >> { %v269_v55 = vadd.f32 %v264_v46, %v253_v51  ;;  %v281_v60 = vadd.f32 %v277_v52, %v270_v58 }
 0x11f   : >> { %v280_v59 = vadd.f32 %v275_v53, %v269_v55 }
 0x120   : >> { %v288_v56 = vpop.permute.xlu1 %287  ;;  %v286_v57 = vpop.permute.xlu0 %285 }
 0x121   : >> { %v292_v63 = vadd.f32 %v288_v56, %v281_v60  ;;  %v291_v0 = vadd.f32 %v286_v57, %v280_v59 }
 0x124   : >> { %v306_v61 = vpop.permute.xlu1 %305  ;;  %v304_v62 = vpop.permute.xlu0 %303 }
 0x125   : >> { %v310_v2 = vadd.f32 %v306_v61, %v292_v63  ;;  %v309_v3 = vadd.f32 %v304_v62, %v291_v0 }
 0x128   : >> { %v317_v4 = vpop.permute.xlu1 %316  ;;  %v315_v5 = vpop.permute.xlu0 %314 }
 0x129   : >> { %v321_v6 = vadd.f32 %v317_v4, %v310_v2  ;;  %v320_v7 = vadd.f32 %v315_v5, %v309_v3 }
 0x12b   : >> { %v330_v8 = vadd.f32 %v325_v30, %v321_v6  ;;  %v329_v9 = vadd.f32 %v326_v36, %v320_v7 }
 0x12d   : >> { %v338_v10 = vadd.f32 %v554_v1, %v330_v8  ;;  %v337_v11 = vadd.f32 %v554_v1, %v329_v9 }
 0x12e   : > { %220 = sbr.rel (!%p218_p5) target bundleno = 149 (0x95), region = 93 }
 0x12f   : >> { %v340_v12 = vmax.f32 %v338_v10, 0.0  ;;  %v339_v13 = vmax.f32 %v337_v11, 0.0 }
 0x131   : >> { %346 = vst.msk [vmem:[%s342_s16 + $0x8] sm:$0x3f] %vm345_vm3, %v340_v12 }
 0x132   : >> { %344 = vst.msk [vmem:[%s342_s16] sm:$0xff] %vm212_vm0, %v339_v13 }
 0x133 PF: > { %s13_s12 = sadd.s32 1, %s502_s12  }
 0x134   : > { %p10_p6 = scmp.ge.s32.totalorder %s13_s12, 4  }
 0x136   :  { %12 = sbr.rel (!%p10_p6) target bundleno = 1 (0x1), region = 104 }

// kernel: ynet_forward.8
= control target key start
LH: loop header
LB: loop body
LE: loop exit
PB: predicated region body
PF: predicated region fallthrough
CT: control target
= control target key end

     0   :  { %s606_s12 = smov 0   ;;  %s688_s0 = inlined_call_operand.vmem [shape: f32[2,14,14,16], index: 0, kind: input, shape index: {}]   ;;  %s689_s1 = inlined_call_operand.vmem [shape: f32[16,144], index: 1, kind: input, shape index: {}]   ;;  %s690_s2 = inlined_call_operand.vmem [shape: f32[1,16], index: 2, kind: input, shape index: {}]   ;;  %s691_s3 = inlined_call_operand.vmem [shape: f32[2,12,12,16], index: 3, kind: output, shape index: {}]  }
   0x1 LB: > { %s488_s13 = sadd.s32 4294967295, %s568_s12   ;;  %p492_p0 = scmp.ge.s32.totalorder %s568_s12, 1  ;;  %s568_s12 = sphi %s606_s12, %s13_s12  }
   0x2   : > { %p137_p1 = scmp.lt.s32.totalorder %s568_s12, 3 }
   0x4   : > { %p138_p2 = pnand %p492_p0, %p137_p1 }
   0x5   : > { %p161_p3 = scmp.lt.s32.totalorder (!%p138_p2), %s488_s13, 1  ;;  %s641_s5 = smov (!%p138_p2), 0  }
   0x6   : > { %141 = sbr.rel (%p138_p2) target bundleno = 376 (0x178), region = 32 }
   0xb   : > { %v171_v0 = vld [vmem:[%s689_s1] sm:$0xff]  ;;  %v172_v1 = vld [vmem:[%s689_s1 + $0x8] sm:$0xff]  ;;  %v173_v2 = vld [vmem:[%s689_s1 + $0x10] sm:$0xff]  ;;  %s693_s13 = smov (!%p161_p3, %s488_s13), 1 }
   0xc   : > { %v174_v3 = vld [vmem:[%s689_s1 + $0x18] sm:$0xff]  ;;  %v629_v4 = vld [vmem:[%s690_s2] ss:$0 sm:$0xff]  ;;  %s520_s24 = smul.u32 224, %s693_s13 }
   0xd   : > { %s521_s25 = smul.u32 192, %s693_s13 }
   0xe   : > { %s634_s28 = scalar_lea.vmem %s688_s0, %s520_s24 }
   0xf   : > { %s639_s4 = scalar_lea.vmem %s691_s3, %s521_s25 }
  0x10 LB: >> { %221 = vmatprep.subr.mxu0 %v174_v3  ;;  %516 = vmatprep.subr.mxu1 %v174_v3  ;;  %s495_s6 = sshll.u32 %s572_s5, 4  ;;  %vm186_vm0 = vcmask 130048   ;;  %v578_v5 = vmov 0.0   ;;  %s514_s8 = sshll.u32 %s572_s5, 5  ;;  %vm276_vm1 = vcmask 128000   ;;  %s572_s5 = sphi %s641_s5, %s181_s5  }
  0x11   : >> { %222 = vmatpush1.msra.mxu0 %v173_v2  ;;  %518 = vmatpush1.msra.mxu1 %v173_v2  ;;  %s183_s7 = scalar_lea.vmem %s634_s28, %s495_s6  ;;  %s272_s9 = scalar_lea.vmem [#allocation2], %s514_s8 }
  0x12   : >> { %223 = vmatprep.subr.mxu0 %v172_v1  ;;  %517 = vmatprep.subr.mxu1 %v172_v1  ;;  %v184_v6 = vld [vmem:[%s183_s7] sm:$0xff]  ;;  %v185_v7 = vld [vmem:[%s183_s7 + $0x8] sm:$0x3f]  ;;  %s181_s5 = sadd.s32 1, %s572_s5  }
  0x13   : >> { %224 = vmatpush1.msra.mxu0 %v171_v0  ;;  %519 = vmatpush1.msra.mxu1 %v171_v0  ;;  %p178_p4 = scmp.ge.s32.totalorder %s181_s5, 14  }
  0x14   : >> { %257 = vmatprep.mubr.f32.mxu0 %v578_v5  ;;  %263 = vmatprep.mubr.f32.mxu1 %v578_v5  ;;  %s655_s10 = smov (%p178_p4), 0  }
  0x15   : >> { %496 = vmatmul.mubr.msk.f32.vlgmr.msra.gmra.mxu0 %vm186_vm0, %v184_v6  ;;  %497 = vmatmul.mubr.msk.f32.vlgmr.msra.gmra.mxu1 %vm186_vm0, %v185_v7 }
  0xd5   : >> { %v259_v8 = vpop.f32.mrf.mxu0  ;;  %v265_v9 = vpop.f32.mrf.mxu1  ;;  %180 = sbr.rel (!%p178_p4) target bundleno = 16 (0x10), region = 82 }
  0xd6   : >> { %273 = vst [vmem:[%s272_s9] sm:$0xff] %v259_v8  ;;  %275 = vst [vmem:[%s272_s9 + $0x10] sm:$0x3f] %v265_v9 }
  0xd7   : >> { %v261_v10 = vpop.f32.mrf.mxu0  ;;  %v267_v11 = vpop.f32.mrf.mxu1 }
  0xd8   : >> { %274 = vst.msk [vmem:[%s272_s9 + $0x8] sm:$0xff] %vm186_vm0, %v261_v10 }
  0xd9   : >> { %277 = vst.msk [vmem:[%s272_s9 + $0x18] sm:$0x3f] %vm276_vm1, %v267_v11 }
  0xda LB: >> { %s515_s11 = sshll.u32 %s576_s10, 5  ;;  %s579_s14 = smov 96   ;;  %vm305_vm2 = vcmask 1045504   ;;  %vm293_vm3 = vcmask 1046528   ;;  %vm407_vm4 = vcmask 125952   ;;  %s576_s10 = sphi %s655_s10, %s283_s10  }
  0xdb   : >> { %s661_s13 = scalar_lea.vmem [#allocation2], %s515_s11  ;;  %s580_s15 = smov 112  }
  0xdc   : >> { %s581_s16 = smov 80   ;;  %s582_s17 = smov 64  }
  0xdd   : >> { %s583_s18 = smov 48   ;;  %s584_s19 = smov 32  }
  0xde   : >> { %s585_s20 = smov 16   ;;  %s511_s21 = sshll.u32 %s576_s10, 4 }
  0xdf   : >> { %s404_s22 = scalar_lea.vmem %s639_s4, %s511_s21  ;;  %s283_s10 = sadd.s32 1, %s576_s10  }
  0xe0   : >> { %v288_v12 = vld [vmem:[%s661_s13 + $0x10] sm:$0x3f]  ;;  %v287_v15 = vld [vmem:[%s661_s13] sm:$0xff]  ;;  %v509_v24 = vld [vmem:[%s661_s13 + $0x58] sm:$0x3f]  ;;  %p280_p5 = scmp.ge.s32.totalorder %s283_s10, 12  }
  0xe1   : >> { %v307_v13 = vrot.slane %v288_v12, 2  ;;  %v295_v14 = vrot.slane %v288_v12, 1  ;;  %v504_v16 = vld [vmem:[%s661_s13 + $0x30] sm:$0x3f]  ;;  %v503_v17 = vld [vmem:[%s661_s13 + $0x20] sm:$0xff]  ;;  %v306_v18 = vrot.slane %v287_v15, 2 }
  0xe2   : >> { %v294_v19 = vrot.slane %v287_v15, 1  ;;  %v333_v20 = vrot.slane %v503_v17, 1  ;;  %v334_v23 = vrot.slane %v504_v16, 1  ;;  %v387_v25 = vrot.slane %v509_v24, 2  ;;  %v507_v29 = vld [vmem:[%s661_s13 + $0x48] sm:$0xff]  ;;  %v506_v34 = vld [vmem:[%s661_s13 + $0x40] sm:$0xff] }
  0xe3   : >> { %311 = vrot.lane.b32.xlu1 %v307_v13, %s579_s14  ;;  %299 = vrot.lane.b32.xlu0 %v295_v14, %s580_s15  ;;  %v308_v21 = vsel %vm305_vm2, %v306_v18, %v307_v13  ;;  %v344_v26 = vrot.slane %v503_v17, 2  ;;  %v345_v28 = vrot.slane %v504_v16, 2  ;;  %v386_v30 = vrot.slane %v507_v29, 2  ;;  %v508_v33 = vld [vmem:[%s661_s13 + $0x50] sm:$0x3f] }
  0xe4   : >> { %v296_v22 = vsel %vm293_vm3, %v294_v19, %v295_v14  ;;  %v335_v27 = vsel %vm293_vm3, %v333_v20, %v334_v23  ;;  %v374_v35 = vrot.slane %v508_v33, 1  ;;  %v373_v36 = vrot.slane %v506_v34, 1 }
  0xe5   : >> { %v388_v31 = vsel %vm305_vm2, %v386_v30, %v387_v25  ;;  %v346_v32 = vsel %vm305_vm2, %v344_v26, %v345_v28 }
  0xe6   : >> { %v375_v37 = vsel %vm293_vm3, %v373_v36, %v374_v35 }
  0xe7   : >> { %327 = vrot.lane.b32.xlu1 %v504_v16, %s581_s16  ;;  %325 = vrot.lane.b32.xlu0 %v503_v17, %s581_s16 }
  0xeb   : >> { %309 = vrot.lane.b32.xlu1 %v308_v21, %s579_s14  ;;  %297 = vrot.lane.b32.xlu0 %v296_v22, %s580_s15 }
  0xef   : >> { %338 = vrot.lane.b32.xlu1 %v334_v23, %s582_s17  ;;  %336 = vrot.lane.b32.xlu0 %v335_v27, %s582_s17 }
  0xf3   : >> { %349 = vrot.lane.b32.xlu1 %v345_v28, %s583_s18  ;;  %347 = vrot.lane.b32.xlu0 %v346_v32, %s583_s18 }
  0xf7   : >> { %367 = vrot.lane.b32.xlu1 %v508_v33, %s584_s19  ;;  %365 = vrot.lane.b32.xlu0 %v506_v34, %s584_s19 }
  0xfb   : >> { %378 = vrot.lane.b32.xlu1 %v374_v35, %s585_s20  ;;  %376 = vrot.lane.b32.xlu0 %v375_v37, %s585_s20 }
 0x155   : >> { %v312_v38 = vpop.permute.xlu1 %311  ;;  %v300_v39 = vpop.permute.xlu0 %299 }
 0x156   : >> { %v304_v44 = vadd.f32 %v300_v39, %v288_v12 }
 0x158   : >> { %v316_v49 = vadd.f32 %v312_v38, %v304_v44 }
 0x159   : >> { %v328_v40 = vpop.permute.xlu1 %327  ;;  %v326_v41 = vpop.permute.xlu0 %325 }
 0x15a   : >> { %v332_v53 = vadd.f32 %v328_v40, %v316_v49 }
 0x15d   : >> { %v310_v42 = vpop.permute.xlu1 %309  ;;  %v298_v43 = vpop.permute.xlu0 %297 }
 0x15e   : >> { %v303_v45 = vadd.f32 %v298_v43, %v287_v15 }
 0x160   : >> { %v315_v46 = vadd.f32 %v310_v42, %v303_v45 }
 0x161   : >> { %v339_v47 = vpop.permute.xlu1 %338  ;;  %v337_v48 = vpop.permute.xlu0 %336 }
 0x162   : >> { %v331_v50 = vadd.f32 %v326_v41, %v315_v46  ;;  %v343_v55 = vadd.f32 %v339_v47, %v332_v53 }
 0x164   : >> { %v342_v54 = vadd.f32 %v337_v48, %v331_v50 }
 0x165   : >> { %v350_v51 = vpop.permute.xlu1 %349  ;;  %v348_v52 = vpop.permute.xlu0 %347 }
 0x166   : >> { %v354_v58 = vadd.f32 %v350_v51, %v343_v55  ;;  %v353_v59 = vadd.f32 %v348_v52, %v342_v54 }
 0x169   : >> { %v368_v56 = vpop.permute.xlu1 %367  ;;  %v366_v57 = vpop.permute.xlu0 %365 }
 0x16a   : >> { %v372_v60 = vadd.f32 %v368_v56, %v354_v58  ;;  %v371_v61 = vadd.f32 %v366_v57, %v353_v59 }
 0x16d   : >> { %v379_v62 = vpop.permute.xlu1 %378  ;;  %v377_v63 = vpop.permute.xlu0 %376 }
 0x16e   : >> { %v383_v0 = vadd.f32 %v379_v62, %v372_v60  ;;  %v382_v1 = vadd.f32 %v377_v63, %v371_v61 }
 0x170   : >> { %v392_v2 = vadd.f32 %v387_v25, %v383_v0  ;;  %v391_v3 = vadd.f32 %v388_v31, %v382_v1 }
 0x172   : >> { %v400_v5 = vadd.f32 %v629_v4, %v392_v2  ;;  %v399_v6 = vadd.f32 %v629_v4, %v391_v3 }
 0x173   : > { %282 = sbr.rel (!%p280_p5) target bundleno = 218 (0xda), region = 93 }
 0x174   : >> { %v402_v7 = vmax.f32 %v400_v5, 0.0  ;;  %v401_v8 = vmax.f32 %v399_v6, 0.0 }
 0x176   : >> { %408 = vst.msk [vmem:[%s404_s22 + $0x8] sm:$0xf] %vm407_vm4, %v402_v7 }
 0x177   : >> { %406 = vst.msk [vmem:[%s404_s22] sm:$0xff] %vm186_vm0, %v401_v8 }
 0x178 PF: > { %s13_s12 = sadd.s32 1, %s568_s12  }
 0x179   : > { %p10_p6 = scmp.ge.s32.totalorder %s13_s12, 4  }
 0x17b   :  { %12 = sbr.rel (!%p10_p6) target bundleno = 1 (0x1), region = 104 }

// kernel: ynet_forward.10
= control target key start
LH: loop header
LB: loop body
LE: loop exit
PB: predicated region body
PF: predicated region fallthrough
CT: control target
= control target key end

     0   :  { %s1185_s21 = smov 0   ;;  %s1538_s0 = inlined_call_operand.vmem [shape: f32[2,10,10,16], index: 0, kind: input, shape index: {}]   ;;  %s1539_s1 = inlined_call_operand.vmem [shape: f32[16,144], index: 1, kind: input, shape index: {}]   ;;  %s1540_s2 = inlined_call_operand.vmem [shape: f32[1,16], index: 2, kind: input, shape index: {}]   ;;  %s1541_s3 = inlined_call_operand.vmem [shape: f32[16,144], index: 3, kind: input, shape index: {}]   ;;  %s1542_s4 = inlined_call_operand.vmem [shape: f32[1,16], index: 4, kind: input, shape index: {}]   ;;  %s1543_s5 = inlined_call_operand.vmem [shape: f32[2,12,12,16], index: 5, kind: input, shape index: {}]   ;;  %s1544_s6 = inlined_call_operand.vmem [shape: f32[2,12,12,16], index: 6, kind: output, shape index: {}]  }
   0x1 LB: > { %s992_s22 = sadd.s32 4294967295, %s1119_s21   ;;  %p996_p0 = scmp.ge.s32.totalorder %s1119_s21, 1  ;;  %s1119_s21 = sphi %s1185_s21, %s16_s21  }
   0x2   : > { %p222_p1 = scmp.lt.s32.totalorder %s1119_s21, 3 }
   0x4   : > { %p223_p2 = pnand %p996_p0, %p222_p1 }
   0x5   : > { %p1195_p3 = scmp.lt.s32.totalorder (!%p223_p2), %s992_s22, 1  ;;  %s1440_s9 = smov (!%p223_p2), 0  }
   0x6   : > { %226 = sbr.rel (%p223_p2) target bundleno = 789 (0x315), region = 44 }
   0xb   : > { %v1202_v0 = vld [vmem:[%s1539_s1] sm:$0xff]  ;;  %v1207_v1 = vld [vmem:[%s1539_s1 + $0x8] sm:$0xff]  ;;  %v1212_v2 = vld [vmem:[%s1539_s1 + $0x10] sm:$0xff]  ;;  %vm283_vm0 = vcmask 130048   ;;  %v1133_v6 = vmov 0.0   ;;  %vm286_vm1 = vcmask 128000  }
   0xc   : > { %v1217_v3 = vld [vmem:[%s1539_s1 + $0x18] sm:$0xff]  ;;  %v1222_v4 = vld [vmem:[%s1540_s2] ss:$0 sm:$0xff]  ;;  %282 = vst [vmem:[#allocation2] sm:$0xff] %v1133_v6  ;;  %285 = vst [vmem:[#allocation2 + $0x10] sm:$0x3f] %v1133_v6 }
   0xd   : > { %v1227_v5 = vld [vmem:[%s1541_s3] sm:$0xff]  ;;  %288 = vst [vmem:[#allocation2 + $0x20] sm:$0xff] %v1133_v6  ;;  %290 = vst [vmem:[#allocation2 + $0x30] sm:$0x3f] %v1133_v6  ;;  %s1547_s22 = smov (!%p1195_p3, %s992_s22), 1  ;;  %v1350_v7 = vld [vmem:[%s1541_s3 + $0x8] sm:$0xff] }
   0xe   : > { %292 = vst [vmem:[#allocation2 + $0x40] sm:$0xff] %v1133_v6  ;;  %294 = vst [vmem:[#allocation2 + $0x50] sm:$0x3f] %v1133_v6  ;;  %v1355_v8 = vld [vmem:[%s1541_s3 + $0x10] sm:$0xff]  ;;  %v1360_v9 = vld [vmem:[%s1541_s3 + $0x18] sm:$0xff]  ;;  %s1050_s20 = smul.u32 160, %s1547_s22 }
   0xf   : > { %296 = vst [vmem:[#allocation2 + $0x60] sm:$0xff] %v1133_v6  ;;  %298 = vst [vmem:[#allocation2 + $0x70] sm:$0x3f] %v1133_v6  ;;  %v1421_v10 = vld [vmem:[%s1542_s4] ss:$0 sm:$0xff]  ;;  %s1051_s23 = smul.u32 192, %s1547_s22 }
  0x10   : > { %300 = vst [vmem:[#allocation2 + $0x80] sm:$0xff] %v1133_v6  ;;  %302 = vst [vmem:[#allocation2 + $0x90] sm:$0x3f] %v1133_v6  ;;  %s1428_s26 = scalar_lea.vmem %s1538_s0, %s1050_s20 }
  0x11   : > { %304 = vst [vmem:[#allocation2 + $0xa0] sm:$0xff] %v1133_v6  ;;  %306 = vst [vmem:[#allocation2 + $0xb0] sm:$0x3f] %v1133_v6  ;;  %s1433_s29 = scalar_lea.vmem %s1543_s5, %s1051_s23  ;;  %s1438_s8 = scalar_lea.vmem %s1544_s6, %s1051_s23 }
  0x12   : > { %308 = vst [vmem:[#allocation2 + $0xc0] sm:$0xff] %v1133_v6  ;;  %310 = vst [vmem:[#allocation2 + $0xd0] sm:$0x3f] %v1133_v6 }
  0x13   : > { %312 = vst [vmem:[#allocation2 + $0xe0] sm:$0xff] %v1133_v6  ;;  %314 = vst [vmem:[#allocation2 + $0xf0] sm:$0x3f] %v1133_v6 }
  0x14   : > { %316 = vst [vmem:[#allocation2 + $0x100] sm:$0xff] %v1133_v6  ;;  %318 = vst [vmem:[#allocation2 + $0x110] sm:$0x3f] %v1133_v6 }
  0x15   : > { %320 = vst [vmem:[#allocation2 + $0x120] sm:$0xff] %v1133_v6  ;;  %322 = vst [vmem:[#allocation2 + $0x130] sm:$0x3f] %v1133_v6 }
  0x16   : > { %324 = vst [vmem:[#allocation2 + $0x140] sm:$0xff] %v1133_v6  ;;  %326 = vst [vmem:[#allocation2 + $0x150] sm:$0x3f] %v1133_v6 }
  0x17   : > { %328 = vst [vmem:[#allocation2 + $0x160] sm:$0xff] %v1133_v6  ;;  %330 = vst [vmem:[#allocation2 + $0x170] sm:$0x3f] %v1133_v6 }
  0x18   : > { %332 = vst [vmem:[#allocation2 + $0x180] sm:$0xff] %v1133_v6  ;;  %334 = vst [vmem:[#allocation2 + $0x190] sm:$0x3f] %v1133_v6 }
  0x19   : > { %336 = vst [vmem:[#allocation2 + $0x1a0] sm:$0xff] %v1133_v6  ;;  %338 = vst [vmem:[#allocation2 + $0x1b0] sm:$0x3f] %v1133_v6 }
  0x1a   : > { %340 = vst [vmem:[#allocation3] sm:$0xff] %v1133_v6  ;;  %342 = vst [vmem:[#allocation3 + $0x10] sm:$0x3f] %v1133_v6 }
  0x1b   : > { %344 = vst [vmem:[#allocation3 + $0x20] sm:$0xff] %v1133_v6  ;;  %346 = vst [vmem:[#allocation3 + $0x30] sm:$0x3f] %v1133_v6 }
  0x1c   : > { %348 = vst [vmem:[#allocation3 + $0x40] sm:$0xff] %v1133_v6  ;;  %350 = vst [vmem:[#allocation3 + $0x50] sm:$0x3f] %v1133_v6 }
  0x1d   : > { %352 = vst [vmem:[#allocation3 + $0x60] sm:$0xff] %v1133_v6  ;;  %354 = vst [vmem:[#allocation3 + $0x70] sm:$0x3f] %v1133_v6 }
  0x1e   : > { %356 = vst [vmem:[#allocation3 + $0x80] sm:$0xff] %v1133_v6  ;;  %358 = vst [vmem:[#allocation3 + $0x90] sm:$0x3f] %v1133_v6 }
  0x1f   : > { %360 = vst [vmem:[#allocation3 + $0xa0] sm:$0xff] %v1133_v6  ;;  %362 = vst [vmem:[#allocation3 + $0xb0] sm:$0x3f] %v1133_v6 }
  0x20   : > { %364 = vst [vmem:[#allocation3 + $0xc0] sm:$0xff] %v1133_v6  ;;  %366 = vst [vmem:[#allocation3 + $0xd0] sm:$0x3f] %v1133_v6 }
  0x21   : > { %368 = vst [vmem:[#allocation3 + $0xe0] sm:$0xff] %v1133_v6  ;;  %370 = vst [vmem:[#allocation3 + $0xf0] sm:$0x3f] %v1133_v6 }
  0x22   : > { %372 = vst [vmem:[#allocation3 + $0x100] sm:$0xff] %v1133_v6  ;;  %374 = vst [vmem:[#allocation3 + $0x110] sm:$0x3f] %v1133_v6 }
  0x23   : > { %376 = vst [vmem:[#allocation3 + $0x120] sm:$0xff] %v1133_v6  ;;  %378 = vst [vmem:[#allocation3 + $0x130] sm:$0x3f] %v1133_v6 }
  0x24   : > { %380 = vst [vmem:[#allocation3 + $0x140] sm:$0xff] %v1133_v6  ;;  %382 = vst [vmem:[#allocation3 + $0x150] sm:$0x3f] %v1133_v6 }
  0x25   : > { %384 = vst [vmem:[#allocation3 + $0x160] sm:$0xff] %v1133_v6  ;;  %386 = vst [vmem:[#allocation3 + $0x170] sm:$0x3f] %v1133_v6 }
  0x26   : > { %388 = vst [vmem:[#allocation3 + $0x180] sm:$0xff] %v1133_v6  ;;  %390 = vst [vmem:[#allocation3 + $0x190] sm:$0x3f] %v1133_v6 }
  0x27   : > { %392 = vst [vmem:[#allocation3 + $0x1a0] sm:$0xff] %v1133_v6  ;;  %394 = vst [vmem:[#allocation3 + $0x1b0] sm:$0x3f] %v1133_v6 }
  0x28   : > { %284 = vst.msk [vmem:[#allocation2 + $0x8] sm:$0xff] %vm283_vm0, %v1133_v6  ;;  %289 = vst.msk [vmem:[#allocation2 + $0x28] sm:$0xff] %vm283_vm0, %v1133_v6 }
  0x29   : > { %293 = vst.msk [vmem:[#allocation2 + $0x48] sm:$0xff] %vm283_vm0, %v1133_v6  ;;  %297 = vst.msk [vmem:[#allocation2 + $0x68] sm:$0xff] %vm283_vm0, %v1133_v6 }
  0x2a   : > { %301 = vst.msk [vmem:[#allocation2 + $0x88] sm:$0xff] %vm283_vm0, %v1133_v6  ;;  %305 = vst.msk [vmem:[#allocation2 + $0xa8] sm:$0xff] %vm283_vm0, %v1133_v6 }
  0x2b   : > { %309 = vst.msk [vmem:[#allocation2 + $0xc8] sm:$0xff] %vm283_vm0, %v1133_v6  ;;  %313 = vst.msk [vmem:[#allocation2 + $0xe8] sm:$0xff] %vm283_vm0, %v1133_v6 }
  0x2c   : > { %317 = vst.msk [vmem:[#allocation2 + $0x108] sm:$0xff] %vm283_vm0, %v1133_v6  ;;  %321 = vst.msk [vmem:[#allocation2 + $0x128] sm:$0xff] %vm283_vm0, %v1133_v6 }
  0x2d   : > { %325 = vst.msk [vmem:[#allocation2 + $0x148] sm:$0xff] %vm283_vm0, %v1133_v6  ;;  %329 = vst.msk [vmem:[#allocation2 + $0x168] sm:$0xff] %vm283_vm0, %v1133_v6 }
  0x2e   : > { %333 = vst.msk [vmem:[#allocation2 + $0x188] sm:$0xff] %vm283_vm0, %v1133_v6  ;;  %337 = vst.msk [vmem:[#allocation2 + $0x1a8] sm:$0xff] %vm283_vm0, %v1133_v6 }
  0x2f   : > { %341 = vst.msk [vmem:[#allocation3 + $0x8] sm:$0xff] %vm283_vm0, %v1133_v6  ;;  %345 = vst.msk [vmem:[#allocation3 + $0x28] sm:$0xff] %vm283_vm0, %v1133_v6 }
  0x30   : > { %349 = vst.msk [vmem:[#allocation3 + $0x48] sm:$0xff] %vm283_vm0, %v1133_v6  ;;  %353 = vst.msk [vmem:[#allocation3 + $0x68] sm:$0xff] %vm283_vm0, %v1133_v6 }
  0x31   : > { %357 = vst.msk [vmem:[#allocation3 + $0x88] sm:$0xff] %vm283_vm0, %v1133_v6  ;;  %361 = vst.msk [vmem:[#allocation3 + $0xa8] sm:$0xff] %vm283_vm0, %v1133_v6 }
  0x32   : > { %365 = vst.msk [vmem:[#allocation3 + $0xc8] sm:$0xff] %vm283_vm0, %v1133_v6  ;;  %369 = vst.msk [vmem:[#allocation3 + $0xe8] sm:$0xff] %vm283_vm0, %v1133_v6 }
  0x33   : > { %373 = vst.msk [vmem:[#allocation3 + $0x108] sm:$0xff] %vm283_vm0, %v1133_v6  ;;  %377 = vst.msk [vmem:[#allocation3 + $0x128] sm:$0xff] %vm283_vm0, %v1133_v6 }
  0x34   : > { %381 = vst.msk [vmem:[#allocation3 + $0x148] sm:$0xff] %vm283_vm0, %v1133_v6  ;;  %385 = vst.msk [vmem:[#allocation3 + $0x168] sm:$0xff] %vm283_vm0, %v1133_v6 }
  0x35   : > { %389 = vst.msk [vmem:[#allocation3 + $0x188] sm:$0xff] %vm283_vm0, %v1133_v6  ;;  %393 = vst.msk [vmem:[#allocation3 + $0x1a8] sm:$0xff] %vm283_vm0, %v1133_v6 }
  0x36   : > { %287 = vst.msk [vmem:[#allocation2 + $0x18] sm:$0x3f] %vm286_vm1, %v1133_v6  ;;  %291 = vst.msk [vmem:[#allocation2 + $0x38] sm:$0x3f] %vm286_vm1, %v1133_v6 }
  0x37   : > { %295 = vst.msk [vmem:[#allocation2 + $0x58] sm:$0x3f] %vm286_vm1, %v1133_v6  ;;  %299 = vst.msk [vmem:[#allocation2 + $0x78] sm:$0x3f] %vm286_vm1, %v1133_v6 }
  0x38   : > { %303 = vst.msk [vmem:[#allocation2 + $0x98] sm:$0x3f] %vm286_vm1, %v1133_v6  ;;  %307 = vst.msk [vmem:[#allocation2 + $0xb8] sm:$0x3f] %vm286_vm1, %v1133_v6 }
  0x39   : > { %311 = vst.msk [vmem:[#allocation2 + $0xd8] sm:$0x3f] %vm286_vm1, %v1133_v6  ;;  %315 = vst.msk [vmem:[#allocation2 + $0xf8] sm:$0x3f] %vm286_vm1, %v1133_v6 }
  0x3a   : > { %319 = vst.msk [vmem:[#allocation2 + $0x118] sm:$0x3f] %vm286_vm1, %v1133_v6  ;;  %323 = vst.msk [vmem:[#allocation2 + $0x138] sm:$0x3f] %vm286_vm1, %v1133_v6 }
  0x3b   : > { %327 = vst.msk [vmem:[#allocation2 + $0x158] sm:$0x3f] %vm286_vm1, %v1133_v6  ;;  %331 = vst.msk [vmem:[#allocation2 + $0x178] sm:$0x3f] %vm286_vm1, %v1133_v6 }
  0x3c   : > { %335 = vst.msk [vmem:[#allocation2 + $0x198] sm:$0x3f] %vm286_vm1, %v1133_v6  ;;  %339 = vst.msk [vmem:[#allocation2 + $0x1b8] sm:$0x3f] %vm286_vm1, %v1133_v6 }
  0x3d   : > { %343 = vst.msk [vmem:[#allocation3 + $0x18] sm:$0x3f] %vm286_vm1, %v1133_v6  ;;  %347 = vst.msk [vmem:[#allocation3 + $0x38] sm:$0x3f] %vm286_vm1, %v1133_v6 }
  0x3e   : > { %351 = vst.msk [vmem:[#allocation3 + $0x58] sm:$0x3f] %vm286_vm1, %v1133_v6  ;;  %355 = vst.msk [vmem:[#allocation3 + $0x78] sm:$0x3f] %vm286_vm1, %v1133_v6 }
  0x3f   : > { %359 = vst.msk [vmem:[#allocation3 + $0x98] sm:$0x3f] %vm286_vm1, %v1133_v6  ;;  %363 = vst.msk [vmem:[#allocation3 + $0xb8] sm:$0x3f] %vm286_vm1, %v1133_v6 }
  0x40   : > { %367 = vst.msk [vmem:[#allocation3 + $0xd8] sm:$0x3f] %vm286_vm1, %v1133_v6  ;;  %371 = vst.msk [vmem:[#allocation3 + $0xf8] sm:$0x3f] %vm286_vm1, %v1133_v6 }
  0x41   : > { %375 = vst.msk [vmem:[#allocation3 + $0x118] sm:$0x3f] %vm286_vm1, %v1133_v6  ;;  %379 = vst.msk [vmem:[#allocation3 + $0x138] sm:$0x3f] %vm286_vm1, %v1133_v6 }
  0x42   : > { %383 = vst.msk [vmem:[#allocation3 + $0x158] sm:$0x3f] %vm286_vm1, %v1133_v6  ;;  %387 = vst.msk [vmem:[#allocation3 + $0x178] sm:$0x3f] %vm286_vm1, %v1133_v6 }
  0x43   : > { %391 = vst.msk [vmem:[#allocation3 + $0x198] sm:$0x3f] %vm286_vm1, %v1133_v6  ;;  %395 = vst.msk [vmem:[#allocation3 + $0x1b8] sm:$0x3f] %vm286_vm1, %v1133_v6 }
  0x44 LB: >> { %440 = vmatprep.subr.mxu0 %v1217_v3  ;;  %1042 = vmatprep.subr.mxu1 %v1217_v3  ;;  %s1000_s22 = sshll.u32 %s1123_s9, 4  ;;  %v1134_v11 = vmov 0.0   ;;  %s1003_s11 = sshll.u32 %s1123_s9, 5  ;;  %vm494_vm2 = vcmask 1041408   ;;  %vm509_vm3 = vcmask 130050   ;;  %vm512_vm4 = vcmask 125952   ;;  %s1123_s9 = sphi %s1440_s9, %s401_s9  }
  0x45   : >> { %441 = vmatpush1.msra.mxu0 %v1212_v2  ;;  %1044 = vmatpush1.msra.mxu1 %v1212_v2  ;;  %s403_s10 = scalar_lea.vmem %s1428_s26, %s1000_s22  ;;  %s922_s12 = scalar_lea.vmem [#allocation2], %s1003_s11 }
  0x46   : >> { %442 = vmatprep.subr.mxu0 %v1207_v1  ;;  %1043 = vmatprep.subr.mxu1 %v1207_v1  ;;  %v404_v12 = vld [vmem:[%s403_s10] sm:$0xff]  ;;  %v405_v13 = vld [vmem:[%s403_s10 + $0x8] sm:$0x3]  ;;  %s401_s9 = sadd.s32 1, %s1123_s9  }
  0x47   : >> { %443 = vmatpush1.msra.mxu0 %v1202_v0  ;;  %1045 = vmatpush1.msra.mxu1 %v1202_v0  ;;  %p398_p4 = scmp.ge.s32.totalorder %s401_s9, 10  }
  0x48   : >> { %476 = vmatprep.mubr.f32.mxu0 %v1134_v11  ;;  %482 = vmatprep.mubr.f32.mxu1 %v1134_v11  ;;  %s1462_s13 = smov (%p398_p4), 0  }
  0x49   : >> { %1001 = vmatmul.mubr.msk.f32.vlgmr.msra.gmra.mxu0 %vm283_vm0, %v404_v12  ;;  %1002 = vmatmul.mubr.msk.f32.vlgmr.msra.gmra.mxu1 %vm283_vm0, %v405_v13 }
 0x109   : >> { %v478_v14 = vpop.f32.mrf.mxu0  ;;  %v484_v15 = vpop.f32.mrf.mxu1 }
 0x10a   : >> { %v495_v16 = vrot.slane %v478_v14, 6  ;;  %v497_v17 = vrot.slane %v484_v15, 6 }
 0x10b   : >> { %v480_v18 = vpop.f32.mrf.mxu0  ;;  %v486_v19 = vpop.f32.mrf.mxu1  ;;  %400 = sbr.rel (!%p398_p4) target bundleno = 68 (0x44), region = 109 }
 0x10c   : >> { %1004 = vst [vmem:[%s922_s12 + $0x40] sm:$0xfc] %v495_v16  ;;  %v498_v20 = vsel %vm494_vm2, %v495_v16, %v497_v17  ;;  %v496_v21 = vrot.slane %v480_v18, 6  ;;  %v499_v22 = vrot.slane %v486_v19, 6 }
 0x10d   : >> { %1006 = vst [vmem:[%s922_s12 + $0x50] sm:$0xf] %v498_v20 }
 0x10e   : >> { %1005 = vst.msk [vmem:[%s922_s12 + $0x48] sm:$0xfc] %vm509_vm3, %v496_v21  ;;  %v500_v23 = vsel %vm494_vm2, %v496_v21, %v499_v22 }
 0x10f   : >> { %1007 = vst.msk [vmem:[%s922_s12 + $0x58] sm:$0xf] %vm512_vm4, %v500_v23 }
 0x110 LB: >> { %673 = vmatprep.subr.mxu0 %v1360_v9  ;;  %1046 = vmatprep.subr.mxu1 %v1360_v9  ;;  %s1040_s14 = sshll.u32 %s1127_s13, 5  ;;  %s1135_s16 = smov 96   ;;  %vm541_vm5 = vcmask 1045504   ;;  %vm529_vm6 = vcmask 1046528   ;;  %v1140_v49 = vmov 0.0   ;;  %vm726_vm7 = vcmask 1040384   ;;  %s1127_s13 = sphi %s1462_s13, %s519_s13  }
 0x111   : >> { %674 = vmatpush1.msra.mxu0 %v1355_v8  ;;  %1048 = vmatpush1.msra.mxu1 %v1355_v8  ;;  %s1478_s15 = scalar_lea.vmem [#allocation2], %s1040_s14  ;;  %s1136_s17 = smov 112   ;;  %vm740_vm8 = vcmask 130049   ;;  %vm743_vm9 = vcmask 126976  }
 0x112   : >> { %675 = vmatprep.subr.mxu0 %v1350_v7  ;;  %1047 = vmatprep.subr.mxu1 %v1350_v7  ;;  %s1137_s18 = smov 80   ;;  %s1138_s19 = smov 64  }
 0x113   : >> { %676 = vmatpush1.msra.mxu0 %v1227_v5  ;;  %1049 = vmatpush1.msra.mxu1 %v1227_v5  ;;  %s1139_s20 = smov 48   ;;  %s1141_s23 = smov 32  }
 0x114   : >> { %709 = vmatprep.mubr.f32.mxu0 %v1140_v49  ;;  %715 = vmatprep.mubr.f32.mxu1 %v1140_v49  ;;  %s1142_s24 = smov 16   ;;  %s933_s25 = scalar_lea.vmem [#allocation3], %s1040_s14 }
 0x115   : >> { %s519_s13 = sadd.s32 1, %s1127_s13  }
 0x116   : >> { %v524_v24 = vld [vmem:[%s1478_s15 + $0x10] sm:$0x3f]  ;;  %v523_v27 = vld [vmem:[%s1478_s15] sm:$0xff]  ;;  %v1017_v36 = vld [vmem:[%s1478_s15 + $0x58] sm:$0x3f]  ;;  %p516_p5 = scmp.ge.s32.totalorder %s519_s13, 12  }
 0x117   : >> { %v543_v25 = vrot.slane %v524_v24, 2  ;;  %v531_v26 = vrot.slane %v524_v24, 1  ;;  %v1012_v28 = vld [vmem:[%s1478_s15 + $0x30] sm:$0x3f]  ;;  %v1011_v29 = vld [vmem:[%s1478_s15 + $0x20] sm:$0xff]  ;;  %v542_v30 = vrot.slane %v523_v27, 2 }
 0x118   : >> { %v530_v31 = vrot.slane %v523_v27, 1  ;;  %v569_v32 = vrot.slane %v1011_v29, 1  ;;  %v570_v35 = vrot.slane %v1012_v28, 1  ;;  %v623_v37 = vrot.slane %v1017_v36, 2  ;;  %v1015_v41 = vld [vmem:[%s1478_s15 + $0x48] sm:$0xff]  ;;  %v1014_v46 = vld [vmem:[%s1478_s15 + $0x40] sm:$0xff] }
 0x119   : >> { %547 = vrot.lane.b32.xlu1 %v543_v25, %s1135_s16  ;;  %535 = vrot.lane.b32.xlu0 %v531_v26, %s1136_s17  ;;  %v544_v33 = vsel %vm541_vm5, %v542_v30, %v543_v25  ;;  %v580_v38 = vrot.slane %v1011_v29, 2  ;;  %v581_v40 = vrot.slane %v1012_v28, 2  ;;  %v622_v42 = vrot.slane %v1015_v41, 2  ;;  %v1016_v45 = vld [vmem:[%s1478_s15 + $0x50] sm:$0x3f]  ;;  %s1503_s26 = smov (%p516_p5), 0  }
 0x11a   : >> { %v532_v34 = vsel %vm529_vm6, %v530_v31, %v531_v26  ;;  %v571_v39 = vsel %vm529_vm6, %v569_v32, %v570_v35  ;;  %v610_v47 = vrot.slane %v1016_v45, 1  ;;  %v609_v48 = vrot.slane %v1014_v46, 1 }
 0x11b   : >> { %v624_v43 = vsel %vm541_vm5, %v622_v42, %v623_v37  ;;  %v582_v44 = vsel %vm541_vm5, %v580_v38, %v581_v40 }
 0x11c   : >> { %v611_v50 = vsel %vm529_vm6, %v609_v48, %v610_v47 }
 0x11d   : >> { %563 = vrot.lane.b32.xlu1 %v1012_v28, %s1137_s18  ;;  %561 = vrot.lane.b32.xlu0 %v1011_v29, %s1137_s18 }
 0x121   : >> { %545 = vrot.lane.b32.xlu1 %v544_v33, %s1135_s16  ;;  %533 = vrot.lane.b32.xlu0 %v532_v34, %s1136_s17 }
 0x125   : >> { %574 = vrot.lane.b32.xlu1 %v570_v35, %s1138_s19  ;;  %572 = vrot.lane.b32.xlu0 %v571_v39, %s1138_s19 }
 0x129   : >> { %585 = vrot.lane.b32.xlu1 %v581_v40, %s1139_s20  ;;  %583 = vrot.lane.b32.xlu0 %v582_v44, %s1139_s20 }
 0x12d   : >> { %603 = vrot.lane.b32.xlu1 %v1016_v45, %s1141_s23  ;;  %601 = vrot.lane.b32.xlu0 %v1014_v46, %s1141_s23 }
 0x131   : >> { %614 = vrot.lane.b32.xlu1 %v610_v47, %s1142_s24  ;;  %612 = vrot.lane.b32.xlu0 %v611_v50, %s1142_s24 }
 0x18b   : >> { %v548_v51 = vpop.permute.xlu1 %547  ;;  %v536_v52 = vpop.permute.xlu0 %535 }
 0x18c   : >> { %v540_v57 = vadd.f32 %v536_v52, %v524_v24 }
 0x18e   : >> { %v552_v62 = vadd.f32 %v548_v51, %v540_v57 }
 0x18f   : >> { %v564_v53 = vpop.permute.xlu1 %563  ;;  %v562_v54 = vpop.permute.xlu0 %561 }
 0x190   : >> { %v568_v2 = vadd.f32 %v564_v53, %v552_v62 }
 0x193   : >> { %v546_v55 = vpop.permute.xlu1 %545  ;;  %v534_v56 = vpop.permute.xlu0 %533 }
 0x194   : >> { %v539_v58 = vadd.f32 %v534_v56, %v523_v27 }
 0x196   : >> { %v551_v59 = vadd.f32 %v546_v55, %v539_v58 }
 0x197   : >> { %v575_v60 = vpop.permute.xlu1 %574  ;;  %v573_v61 = vpop.permute.xlu0 %572 }
 0x198   : >> { %v567_v63 = vadd.f32 %v562_v54, %v551_v59  ;;  %v579_v6 = vadd.f32 %v575_v60, %v568_v2 }
 0x19a   : >> { %v578_v3 = vadd.f32 %v573_v61, %v567_v63 }
 0x19b   : >> { %v586_v0 = vpop.permute.xlu1 %585  ;;  %v584_v1 = vpop.permute.xlu0 %583 }
 0x19c   : >> { %v590_v13 = vadd.f32 %v586_v0, %v579_v6  ;;  %v589_v14 = vadd.f32 %v584_v1, %v578_v3 }
 0x19f   : >> { %v604_v11 = vpop.permute.xlu1 %603  ;;  %v602_v12 = vpop.permute.xlu0 %601 }
 0x1a0   : >> { %v608_v15 = vadd.f32 %v604_v11, %v590_v13  ;;  %v607_v16 = vadd.f32 %v602_v12, %v589_v14 }
 0x1a3   : >> { %v615_v17 = vpop.permute.xlu1 %614  ;;  %v613_v18 = vpop.permute.xlu0 %612 }
 0x1a4   : >> { %v619_v19 = vadd.f32 %v615_v17, %v608_v15  ;;  %v618_v20 = vadd.f32 %v613_v18, %v607_v16 }
 0x1a6   : >> { %v628_v21 = vadd.f32 %v623_v37, %v619_v19  ;;  %v627_v22 = vadd.f32 %v624_v43, %v618_v20 }
 0x1a8   : >> { %v636_v23 = vadd.f32 %v1222_v4, %v628_v21  ;;  %v635_v24 = vadd.f32 %v1222_v4, %v627_v22 }
 0x1aa   : >> { %v638_v25 = vmax.f32 %v636_v23, 0.0  ;;  %v637_v26 = vmax.f32 %v635_v24, 0.0 }
 0x1ac   : >> { %1019 = vmatmul.mubr.msk.f32.vlgmr.msra.gmra.mxu0 %vm283_vm0, %v637_v26  ;;  %1020 = vmatmul.mubr.msk.f32.vlgmr.msra.gmra.mxu1 %vm283_vm0, %v638_v25 }
 0x26c   : >> { %v711_v27 = vpop.f32.mrf.mxu0  ;;  %v717_v28 = vpop.f32.mrf.mxu1 }
 0x26d   : >> { %v727_v29 = vrot.slane %v711_v27, 7  ;;  %v729_v30 = vrot.slane %v717_v28, 7 }
 0x26e   : >> { %v713_v31 = vpop.f32.mrf.mxu0  ;;  %v719_v32 = vpop.f32.mrf.mxu1  ;;  %518 = sbr.rel (!%p516_p5) target bundleno = 272 (0x110), region = 120 }
 0x26f   : >> { %1022 = vst [vmem:[%s933_s25 + $0x20] sm:$0xfe] %v727_v29  ;;  %v730_v33 = vsel %vm726_vm7, %v727_v29, %v729_v30  ;;  %v728_v34 = vrot.slane %v713_v31, 7  ;;  %v731_v35 = vrot.slane %v719_v32, 7 }
 0x270   : >> { %1024 = vst [vmem:[%s933_s25 + $0x30] sm:$0x1f] %v730_v33 }
 0x271   : >> { %1023 = vst.msk [vmem:[%s933_s25 + $0x28] sm:$0xfe] %vm740_vm8, %v728_v34  ;;  %v732_v36 = vsel %vm726_vm7, %v728_v34, %v731_v35 }
 0x272   : >> { %1025 = vst.msk [vmem:[%s933_s25 + $0x38] sm:$0x1f] %vm743_vm9, %v732_v36 }
 0x273 LB: >> { %s1041_s27 = sshll.u32 %s1131_s26, 5  ;;  %s1143_s30 = smov 96   ;;  %s1131_s26 = sphi %s1503_s26, %s750_s26  }
 0x274   : >> { %s1509_s28 = scalar_lea.vmem [#allocation3], %s1041_s27  ;;  %s1144_s7 = smov 112  }
 0x275   : >> { %s1145_s9 = smov 80   ;;  %s1146_s22 = smov 64  }
 0x276   : >> { %s1147_s10 = smov 48   ;;  %s1148_s11 = smov 32  }
 0x277   : >> { %s1149_s12 = smov 16   ;;  %s1037_s13 = sshll.u32 %s1131_s26, 4 }
 0x278   : >> { %s871_s14 = scalar_lea.vmem %s1433_s29, %s1037_s13  ;;  %s878_s15 = scalar_lea.vmem %s1438_s8, %s1037_s13 }
 0x279   : >> { %v755_v37 = vld [vmem:[%s1509_s28 + $0x10] sm:$0x3f]  ;;  %v754_v40 = vld [vmem:[%s1509_s28] sm:$0xff]  ;;  %v1035_v12 = vld [vmem:[%s1509_s28 + $0x58] sm:$0x3f]  ;;  %s750_s26 = sadd.s32 1, %s1131_s26  }
 0x27a   : >> { %v774_v38 = vrot.slane %v755_v37, 2  ;;  %v762_v39 = vrot.slane %v755_v37, 1  ;;  %v1030_v4 = vld [vmem:[%s1509_s28 + $0x30] sm:$0x3f]  ;;  %v1029_v5 = vld [vmem:[%s1509_s28 + $0x20] sm:$0xff]  ;;  %v773_v7 = vrot.slane %v754_v40, 2 }
 0x27b   : >> { %v761_v8 = vrot.slane %v754_v40, 1  ;;  %v801_v42 = vrot.slane %v1030_v4, 1  ;;  %v800_v43 = vrot.slane %v1029_v5, 1  ;;  %v812_v45 = vrot.slane %v1030_v4, 2  ;;  %v1034_v48 = vld [vmem:[%s1509_s28 + $0x50] sm:$0x3f] }
 0x27c   : >> { %778 = vrot.lane.b32.xlu1 %v774_v38, %s1143_s30  ;;  %766 = vrot.lane.b32.xlu0 %v762_v39, %s1144_s7  ;;  %v775_v9 = vsel %vm541_vm5, %v773_v7, %v774_v38  ;;  %v811_v46 = vrot.slane %v1029_v5, 2  ;;  %v1032_v49 = vld [vmem:[%s1509_s28 + $0x40] sm:$0xff]  ;;  %v841_v50 = vrot.slane %v1034_v48, 1  ;;  %v1033_v13 = vld [vmem:[%s1509_s28 + $0x48] sm:$0xff]  ;;  %v854_v17 = vrot.slane %v1035_v12, 2  ;;  %p747_p6 = scmp.ge.s32.totalorder %s750_s26, 12  }
 0x27d   : >> { %v763_v41 = vsel %vm529_vm6, %v761_v8, %v762_v39  ;;  %v802_v44 = vsel %vm529_vm6, %v800_v43, %v801_v42  ;;  %v840_v51 = vrot.slane %v1032_v49, 1  ;;  %v853_v18 = vrot.slane %v1033_v13, 2  ;;  %v873_v32 = vld [vmem:[%s871_s14 + $0x8] sm:$0xf]  ;;  %v872_v33 = vld [vmem:[%s871_s14] sm:$0xff] }
 0x27e   : >> { %v813_v47 = vsel %vm541_vm5, %v811_v46, %v812_v45 }
 0x27f   : >> { %v842_v52 = vsel %vm529_vm6, %v840_v51, %v841_v50  ;;  %v855_v24 = vsel %vm541_vm5, %v853_v18, %v854_v17 }
 0x280   : >> { %794 = vrot.lane.b32.xlu1 %v1030_v4, %s1145_s9  ;;  %792 = vrot.lane.b32.xlu0 %v1029_v5, %s1145_s9 }
 0x284   : >> { %776 = vrot.lane.b32.xlu1 %v775_v9, %s1143_s30  ;;  %764 = vrot.lane.b32.xlu0 %v763_v41, %s1144_s7 }
 0x288   : >> { %805 = vrot.lane.b32.xlu1 %v801_v42, %s1146_s22  ;;  %803 = vrot.lane.b32.xlu0 %v802_v44, %s1146_s22 }
 0x28c   : >> { %816 = vrot.lane.b32.xlu1 %v812_v45, %s1147_s10  ;;  %814 = vrot.lane.b32.xlu0 %v813_v47, %s1147_s10 }
 0x290   : >> { %834 = vrot.lane.b32.xlu1 %v1034_v48, %s1148_s11  ;;  %832 = vrot.lane.b32.xlu0 %v1032_v49, %s1148_s11 }
 0x294   : >> { %845 = vrot.lane.b32.xlu1 %v841_v50, %s1149_s12  ;;  %843 = vrot.lane.b32.xlu0 %v842_v52, %s1149_s12 }
 0x2ee   : >> { %v779_v53 = vpop.permute.xlu1 %778  ;;  %v767_v54 = vpop.permute.xlu0 %766 }
 0x2ef   : >> { %v771_v59 = vadd.f32 %v767_v54, %v755_v37 }
 0x2f1   : >> { %v783_v0 = vadd.f32 %v779_v53, %v771_v59 }
 0x2f2   : >> { %v795_v55 = vpop.permute.xlu1 %794  ;;  %v793_v56 = vpop.permute.xlu0 %792 }
 0x2f3   : >> { %v799_v6 = vadd.f32 %v795_v55, %v783_v0 }
 0x2f6   : >> { %v777_v57 = vpop.permute.xlu1 %776  ;;  %v765_v58 = vpop.permute.xlu0 %764 }
 0x2f7   : >> { %v770_v60 = vadd.f32 %v765_v58, %v754_v40 }
 0x2f9   : >> { %v782_v61 = vadd.f32 %v777_v57, %v770_v60 }
 0x2fa   : >> { %v806_v62 = vpop.permute.xlu1 %805  ;;  %v804_v63 = vpop.permute.xlu0 %803 }
 0x2fb   : >> { %v798_v1 = vadd.f32 %v793_v56, %v782_v61  ;;  %v810_v14 = vadd.f32 %v806_v62, %v799_v6 }
 0x2fd   : >> { %v809_v11 = vadd.f32 %v804_v63, %v798_v1 }
 0x2fe   : >> { %v817_v2 = vpop.permute.xlu1 %816  ;;  %v815_v3 = vpop.permute.xlu0 %814 }
 0x2ff   : >> { %v821_v19 = vadd.f32 %v817_v2, %v810_v14  ;;  %v820_v20 = vadd.f32 %v815_v3, %v809_v11 }
 0x302   : >> { %v835_v15 = vpop.permute.xlu1 %834  ;;  %v833_v16 = vpop.permute.xlu0 %832 }
 0x303   : >> { %v839_v21 = vadd.f32 %v835_v15, %v821_v19  ;;  %v838_v22 = vadd.f32 %v833_v16, %v820_v20 }
 0x306   : >> { %v846_v23 = vpop.permute.xlu1 %845  ;;  %v844_v25 = vpop.permute.xlu0 %843 }
 0x307   : >> { %v850_v26 = vadd.f32 %v846_v23, %v839_v21  ;;  %v849_v27 = vadd.f32 %v844_v25, %v838_v22 }
 0x309   : >> { %v859_v28 = vadd.f32 %v854_v17, %v850_v26  ;;  %v858_v29 = vadd.f32 %v855_v24, %v849_v27 }
 0x30b   : >> { %v867_v30 = vadd.f32 %v1421_v10, %v859_v28  ;;  %v866_v31 = vadd.f32 %v1421_v10, %v858_v29 }
 0x30d   : >> { %v869_v34 = vmax.f32 %v867_v30, 0.0  ;;  %v868_v35 = vmax.f32 %v866_v31, 0.0 }
 0x30f   : >> { %v875_v36 = vadd.f32 %v873_v32, %v869_v34  ;;  %v874_v37 = vadd.f32 %v872_v33, %v868_v35 }
 0x310   : > { %749 = sbr.rel (!%p747_p6) target bundleno = 627 (0x273), region = 131 }
 0x311   : >> { %v877_v38 = vmax.f32 %v875_v36, 0.0  ;;  %v876_v39 = vmax.f32 %v874_v37, 0.0 }
 0x313   : >> { %881 = vst.msk [vmem:[%s878_s15 + $0x8] sm:$0xf] %vm512_vm4, %v877_v38 }
 0x314   : >> { %879 = vst.msk [vmem:[%s878_s15] sm:$0xff] %vm283_vm0, %v876_v39 }
 0x315 PF: > { %s16_s21 = sadd.s32 1, %s1119_s21  }
 0x316   : > { %p13_p7 = scmp.ge.s32.totalorder %s16_s21, 4  }
 0x318   :  { %15 = sbr.rel (!%p13_p7) target bundleno = 1 (0x1), region = 142 }

// kernel: ynet_forward.11
= control target key start
LH: loop header
LB: loop body
LE: loop exit
PB: predicated region body
PF: predicated region fallthrough
CT: control target
= control target key end

     0   :  { %s1126_s18 = smov 0   ;;  %s1493_s0 = inlined_call_operand.vmem [shape: f32[2,12,12,16], index: 0, kind: input, shape index: {}]   ;;  %s1494_s1 = inlined_call_operand.vmem [shape: f32[16,144], index: 1, kind: input, shape index: {}]   ;;  %s1495_s2 = inlined_call_operand.vmem [shape: f32[1,16], index: 2, kind: input, shape index: {}]   ;;  %s1496_s3 = inlined_call_operand.vmem [shape: f32[16,144], index: 3, kind: input, shape index: {}]   ;;  %s1497_s4 = inlined_call_operand.vmem [shape: f32[1,16], index: 4, kind: input, shape index: {}]   ;;  %s1498_s5 = inlined_call_operand.vmem [shape: f32[2,14,14,16], index: 5, kind: output, shape index: {}]  }
   0x1 LB: > { %s939_s19 = sadd.s32 4294967295, %s1065_s18   ;;  %p943_p0 = scmp.ge.s32.totalorder %s1065_s18, 1  ;;  %s1065_s18 = sphi %s1126_s18, %s15_s18  }
   0x2   : > { %p187_p1 = scmp.lt.s32.totalorder %s1065_s18, 3 }
   0x4   : > { %p188_p2 = pnand %p943_p0, %p187_p1 }
   0x5   : > { %p1136_p3 = scmp.lt.s32.totalorder (!%p188_p2), %s939_s19, 1  ;;  %s1396_s26 = smov (!%p188_p2), 0  }
   0x6   : > { %191 = sbr.rel (%p188_p2) target bundleno = 793 (0x319), region = 40 }
   0xb   : > { %v1143_v0 = vld [vmem:[%s1494_s1] sm:$0xff]  ;;  %v1148_v1 = vld [vmem:[%s1494_s1 + $0x8] sm:$0xff]  ;;  %v1153_v2 = vld [vmem:[%s1494_s1 + $0x10] sm:$0xff]  ;;  %vm236_vm0 = vcmask 130048   ;;  %v1079_v6 = vmov 0.0   ;;  %s1501_s19 = smov (!%p1136_p3, %s939_s19), 1 }
   0xc   : > { %v1158_v3 = vld [vmem:[%s1494_s1 + $0x18] sm:$0xff]  ;;  %v1163_v4 = vld [vmem:[%s1495_s2] ss:$0 sm:$0xff]  ;;  %235 = vst [vmem:[#allocation2] sm:$0xff] %v1079_v6  ;;  %238 = vst [vmem:[#allocation2 + $0x10] sm:$0xff] %v1079_v6  ;;  %s996_s16 = smul.u32 192, %s1501_s19 }
   0xd   : > { %v1168_v5 = vld [vmem:[%s1496_s3] sm:$0xff]  ;;  %240 = vst [vmem:[#allocation2 + $0x20] sm:$0xff] %v1079_v6  ;;  %242 = vst [vmem:[#allocation2 + $0x30] sm:$0xff] %v1079_v6  ;;  %v1369_v7 = vld [vmem:[%s1496_s3 + $0x8] sm:$0xff]  ;;  %s997_s17 = smul.u32 224, %s1501_s19 }
   0xe   : > { %244 = vst [vmem:[#allocation2 + $0x40] sm:$0xff] %v1079_v6  ;;  %246 = vst [vmem:[#allocation2 + $0x50] sm:$0xff] %v1079_v6  ;;  %v1374_v8 = vld [vmem:[%s1496_s3 + $0x10] sm:$0xff]  ;;  %v1379_v9 = vld [vmem:[%s1496_s3 + $0x18] sm:$0xff]  ;;  %s1389_s22 = scalar_lea.vmem %s1493_s0, %s996_s16 }
   0xf   : > { %248 = vst [vmem:[#allocation2 + $0x60] sm:$0xff] %v1079_v6  ;;  %250 = vst [vmem:[#allocation2 + $0x70] sm:$0xff] %v1079_v6  ;;  %v1384_v10 = vld [vmem:[%s1497_s4] ss:$0 sm:$0xff]  ;;  %s1394_s25 = scalar_lea.vmem %s1498_s5, %s997_s17 }
  0x10   : > { %252 = vst [vmem:[#allocation2 + $0x80] sm:$0xff] %v1079_v6  ;;  %254 = vst [vmem:[#allocation2 + $0x90] sm:$0xff] %v1079_v6 }
  0x11   : > { %256 = vst [vmem:[#allocation2 + $0xa0] sm:$0xff] %v1079_v6  ;;  %258 = vst [vmem:[#allocation2 + $0xb0] sm:$0xff] %v1079_v6 }
  0x12   : > { %260 = vst [vmem:[#allocation2 + $0xc0] sm:$0xff] %v1079_v6  ;;  %262 = vst [vmem:[#allocation2 + $0xd0] sm:$0xff] %v1079_v6 }
  0x13   : > { %264 = vst [vmem:[#allocation2 + $0xe0] sm:$0xff] %v1079_v6  ;;  %266 = vst [vmem:[#allocation2 + $0xf0] sm:$0xff] %v1079_v6 }
  0x14   : > { %268 = vst [vmem:[#allocation2 + $0x100] sm:$0xff] %v1079_v6  ;;  %270 = vst [vmem:[#allocation2 + $0x110] sm:$0xff] %v1079_v6 }
  0x15   : > { %272 = vst [vmem:[#allocation2 + $0x120] sm:$0xff] %v1079_v6  ;;  %274 = vst [vmem:[#allocation2 + $0x130] sm:$0xff] %v1079_v6 }
  0x16   : > { %276 = vst [vmem:[#allocation2 + $0x140] sm:$0xff] %v1079_v6  ;;  %278 = vst [vmem:[#allocation2 + $0x150] sm:$0xff] %v1079_v6 }
  0x17   : > { %280 = vst [vmem:[#allocation2 + $0x160] sm:$0xff] %v1079_v6  ;;  %282 = vst [vmem:[#allocation2 + $0x170] sm:$0xff] %v1079_v6 }
  0x18   : > { %284 = vst [vmem:[#allocation2 + $0x180] sm:$0xff] %v1079_v6  ;;  %286 = vst [vmem:[#allocation2 + $0x190] sm:$0xff] %v1079_v6 }
  0x19   : > { %288 = vst [vmem:[#allocation2 + $0x1a0] sm:$0xff] %v1079_v6  ;;  %290 = vst [vmem:[#allocation2 + $0x1b0] sm:$0xff] %v1079_v6 }
  0x1a   : > { %292 = vst [vmem:[#allocation2 + $0x1c0] sm:$0xff] %v1079_v6  ;;  %294 = vst [vmem:[#allocation2 + $0x1d0] sm:$0xff] %v1079_v6 }
  0x1b   : > { %296 = vst [vmem:[#allocation2 + $0x1e0] sm:$0xff] %v1079_v6  ;;  %298 = vst [vmem:[#allocation2 + $0x1f0] sm:$0xff] %v1079_v6 }
  0x1c   : > { %300 = vst [vmem:[#allocation3] sm:$0xff] %v1079_v6  ;;  %302 = vst [vmem:[#allocation3 + $0x10] sm:$0xff] %v1079_v6 }
  0x1d   : > { %304 = vst [vmem:[#allocation3 + $0x20] sm:$0xff] %v1079_v6  ;;  %306 = vst [vmem:[#allocation3 + $0x30] sm:$0xff] %v1079_v6 }
  0x1e   : > { %308 = vst [vmem:[#allocation3 + $0x40] sm:$0xff] %v1079_v6  ;;  %310 = vst [vmem:[#allocation3 + $0x50] sm:$0xff] %v1079_v6 }
  0x1f   : > { %312 = vst [vmem:[#allocation3 + $0x60] sm:$0xff] %v1079_v6  ;;  %314 = vst [vmem:[#allocation3 + $0x70] sm:$0xff] %v1079_v6 }
  0x20   : > { %316 = vst [vmem:[#allocation3 + $0x80] sm:$0xff] %v1079_v6  ;;  %318 = vst [vmem:[#allocation3 + $0x90] sm:$0xff] %v1079_v6 }
  0x21   : > { %320 = vst [vmem:[#allocation3 + $0xa0] sm:$0xff] %v1079_v6  ;;  %322 = vst [vmem:[#allocation3 + $0xb0] sm:$0xff] %v1079_v6 }
  0x22   : > { %324 = vst [vmem:[#allocation3 + $0xc0] sm:$0xff] %v1079_v6  ;;  %326 = vst [vmem:[#allocation3 + $0xd0] sm:$0xff] %v1079_v6 }
  0x23   : > { %328 = vst [vmem:[#allocation3 + $0xe0] sm:$0xff] %v1079_v6  ;;  %330 = vst [vmem:[#allocation3 + $0xf0] sm:$0xff] %v1079_v6 }
  0x24   : > { %332 = vst [vmem:[#allocation3 + $0x100] sm:$0xff] %v1079_v6  ;;  %334 = vst [vmem:[#allocation3 + $0x110] sm:$0xff] %v1079_v6 }
  0x25   : > { %336 = vst [vmem:[#allocation3 + $0x120] sm:$0xff] %v1079_v6  ;;  %338 = vst [vmem:[#allocation3 + $0x130] sm:$0xff] %v1079_v6 }
  0x26   : > { %340 = vst [vmem:[#allocation3 + $0x140] sm:$0xff] %v1079_v6  ;;  %342 = vst [vmem:[#allocation3 + $0x150] sm:$0xff] %v1079_v6 }
  0x27   : > { %344 = vst [vmem:[#allocation3 + $0x160] sm:$0xff] %v1079_v6  ;;  %346 = vst [vmem:[#allocation3 + $0x170] sm:$0xff] %v1079_v6 }
  0x28   : > { %348 = vst [vmem:[#allocation3 + $0x180] sm:$0xff] %v1079_v6  ;;  %350 = vst [vmem:[#allocation3 + $0x190] sm:$0xff] %v1079_v6 }
  0x29   : > { %352 = vst [vmem:[#allocation3 + $0x1a0] sm:$0xff] %v1079_v6  ;;  %354 = vst [vmem:[#allocation3 + $0x1b0] sm:$0xff] %v1079_v6 }
  0x2a   : > { %356 = vst [vmem:[#allocation3 + $0x1c0] sm:$0xff] %v1079_v6  ;;  %358 = vst [vmem:[#allocation3 + $0x1d0] sm:$0xff] %v1079_v6 }
  0x2b   : > { %360 = vst [vmem:[#allocation3 + $0x1e0] sm:$0xff] %v1079_v6  ;;  %362 = vst [vmem:[#allocation3 + $0x1f0] sm:$0xff] %v1079_v6 }
  0x2c   : > { %237 = vst.msk [vmem:[#allocation2 + $0x8] sm:$0xff] %vm236_vm0, %v1079_v6  ;;  %239 = vst.msk [vmem:[#allocation2 + $0x18] sm:$0xff] %vm236_vm0, %v1079_v6 }
  0x2d   : > { %241 = vst.msk [vmem:[#allocation2 + $0x28] sm:$0xff] %vm236_vm0, %v1079_v6  ;;  %243 = vst.msk [vmem:[#allocation2 + $0x38] sm:$0xff] %vm236_vm0, %v1079_v6 }
  0x2e   : > { %245 = vst.msk [vmem:[#allocation2 + $0x48] sm:$0xff] %vm236_vm0, %v1079_v6  ;;  %247 = vst.msk [vmem:[#allocation2 + $0x58] sm:$0xff] %vm236_vm0, %v1079_v6 }
  0x2f   : > { %249 = vst.msk [vmem:[#allocation2 + $0x68] sm:$0xff] %vm236_vm0, %v1079_v6  ;;  %251 = vst.msk [vmem:[#allocation2 + $0x78] sm:$0xff] %vm236_vm0, %v1079_v6 }
  0x30   : > { %253 = vst.msk [vmem:[#allocation2 + $0x88] sm:$0xff] %vm236_vm0, %v1079_v6  ;;  %255 = vst.msk [vmem:[#allocation2 + $0x98] sm:$0xff] %vm236_vm0, %v1079_v6 }
  0x31   : > { %257 = vst.msk [vmem:[#allocation2 + $0xa8] sm:$0xff] %vm236_vm0, %v1079_v6  ;;  %259 = vst.msk [vmem:[#allocation2 + $0xb8] sm:$0xff] %vm236_vm0, %v1079_v6 }
  0x32   : > { %261 = vst.msk [vmem:[#allocation2 + $0xc8] sm:$0xff] %vm236_vm0, %v1079_v6  ;;  %263 = vst.msk [vmem:[#allocation2 + $0xd8] sm:$0xff] %vm236_vm0, %v1079_v6 }
  0x33   : > { %265 = vst.msk [vmem:[#allocation2 + $0xe8] sm:$0xff] %vm236_vm0, %v1079_v6  ;;  %267 = vst.msk [vmem:[#allocation2 + $0xf8] sm:$0xff] %vm236_vm0, %v1079_v6 }
  0x34   : > { %269 = vst.msk [vmem:[#allocation2 + $0x108] sm:$0xff] %vm236_vm0, %v1079_v6  ;;  %271 = vst.msk [vmem:[#allocation2 + $0x118] sm:$0xff] %vm236_vm0, %v1079_v6 }
  0x35   : > { %273 = vst.msk [vmem:[#allocation2 + $0x128] sm:$0xff] %vm236_vm0, %v1079_v6  ;;  %275 = vst.msk [vmem:[#allocation2 + $0x138] sm:$0xff] %vm236_vm0, %v1079_v6 }
  0x36   : > { %277 = vst.msk [vmem:[#allocation2 + $0x148] sm:$0xff] %vm236_vm0, %v1079_v6  ;;  %279 = vst.msk [vmem:[#allocation2 + $0x158] sm:$0xff] %vm236_vm0, %v1079_v6 }
  0x37   : > { %281 = vst.msk [vmem:[#allocation2 + $0x168] sm:$0xff] %vm236_vm0, %v1079_v6  ;;  %283 = vst.msk [vmem:[#allocation2 + $0x178] sm:$0xff] %vm236_vm0, %v1079_v6 }
  0x38   : > { %285 = vst.msk [vmem:[#allocation2 + $0x188] sm:$0xff] %vm236_vm0, %v1079_v6  ;;  %287 = vst.msk [vmem:[#allocation2 + $0x198] sm:$0xff] %vm236_vm0, %v1079_v6 }
  0x39   : > { %289 = vst.msk [vmem:[#allocation2 + $0x1a8] sm:$0xff] %vm236_vm0, %v1079_v6  ;;  %291 = vst.msk [vmem:[#allocation2 + $0x1b8] sm:$0xff] %vm236_vm0, %v1079_v6 }
  0x3a   : > { %293 = vst.msk [vmem:[#allocation2 + $0x1c8] sm:$0xff] %vm236_vm0, %v1079_v6  ;;  %295 = vst.msk [vmem:[#allocation2 + $0x1d8] sm:$0xff] %vm236_vm0, %v1079_v6 }
  0x3b   : > { %297 = vst.msk [vmem:[#allocation2 + $0x1e8] sm:$0xff] %vm236_vm0, %v1079_v6  ;;  %299 = vst.msk [vmem:[#allocation2 + $0x1f8] sm:$0xff] %vm236_vm0, %v1079_v6 }
  0x3c   : > { %301 = vst.msk [vmem:[#allocation3 + $0x8] sm:$0xff] %vm236_vm0, %v1079_v6  ;;  %303 = vst.msk [vmem:[#allocation3 + $0x18] sm:$0xff] %vm236_vm0, %v1079_v6 }
  0x3d   : > { %305 = vst.msk [vmem:[#allocation3 + $0x28] sm:$0xff] %vm236_vm0, %v1079_v6  ;;  %307 = vst.msk [vmem:[#allocation3 + $0x38] sm:$0xff] %vm236_vm0, %v1079_v6 }
  0x3e   : > { %309 = vst.msk [vmem:[#allocation3 + $0x48] sm:$0xff] %vm236_vm0, %v1079_v6  ;;  %311 = vst.msk [vmem:[#allocation3 + $0x58] sm:$0xff] %vm236_vm0, %v1079_v6 }
  0x3f   : > { %313 = vst.msk [vmem:[#allocation3 + $0x68] sm:$0xff] %vm236_vm0, %v1079_v6  ;;  %315 = vst.msk [vmem:[#allocation3 + $0x78] sm:$0xff] %vm236_vm0, %v1079_v6 }
  0x40   : > { %317 = vst.msk [vmem:[#allocation3 + $0x88] sm:$0xff] %vm236_vm0, %v1079_v6  ;;  %319 = vst.msk [vmem:[#allocation3 + $0x98] sm:$0xff] %vm236_vm0, %v1079_v6 }
  0x41   : > { %321 = vst.msk [vmem:[#allocation3 + $0xa8] sm:$0xff] %vm236_vm0, %v1079_v6  ;;  %323 = vst.msk [vmem:[#allocation3 + $0xb8] sm:$0xff] %vm236_vm0, %v1079_v6 }
  0x42   : > { %325 = vst.msk [vmem:[#allocation3 + $0xc8] sm:$0xff] %vm236_vm0, %v1079_v6  ;;  %327 = vst.msk [vmem:[#allocation3 + $0xd8] sm:$0xff] %vm236_vm0, %v1079_v6 }
  0x43   : > { %329 = vst.msk [vmem:[#allocation3 + $0xe8] sm:$0xff] %vm236_vm0, %v1079_v6  ;;  %331 = vst.msk [vmem:[#allocation3 + $0xf8] sm:$0xff] %vm236_vm0, %v1079_v6 }
  0x44   : > { %333 = vst.msk [vmem:[#allocation3 + $0x108] sm:$0xff] %vm236_vm0, %v1079_v6  ;;  %335 = vst.msk [vmem:[#allocation3 + $0x118] sm:$0xff] %vm236_vm0, %v1079_v6 }
  0x45   : > { %337 = vst.msk [vmem:[#allocation3 + $0x128] sm:$0xff] %vm236_vm0, %v1079_v6  ;;  %339 = vst.msk [vmem:[#allocation3 + $0x138] sm:$0xff] %vm236_vm0, %v1079_v6 }
  0x46   : > { %341 = vst.msk [vmem:[#allocation3 + $0x148] sm:$0xff] %vm236_vm0, %v1079_v6  ;;  %343 = vst.msk [vmem:[#allocation3 + $0x158] sm:$0xff] %vm236_vm0, %v1079_v6 }
  0x47   : > { %345 = vst.msk [vmem:[#allocation3 + $0x168] sm:$0xff] %vm236_vm0, %v1079_v6  ;;  %347 = vst.msk [vmem:[#allocation3 + $0x178] sm:$0xff] %vm236_vm0, %v1079_v6 }
  0x48   : > { %349 = vst.msk [vmem:[#allocation3 + $0x188] sm:$0xff] %vm236_vm0, %v1079_v6  ;;  %351 = vst.msk [vmem:[#allocation3 + $0x198] sm:$0xff] %vm236_vm0, %v1079_v6 }
  0x49   : > { %353 = vst.msk [vmem:[#allocation3 + $0x1a8] sm:$0xff] %vm236_vm0, %v1079_v6  ;;  %355 = vst.msk [vmem:[#allocation3 + $0x1b8] sm:$0xff] %vm236_vm0, %v1079_v6 }
  0x4a   : > { %357 = vst.msk [vmem:[#allocation3 + $0x1c8] sm:$0xff] %vm236_vm0, %v1079_v6  ;;  %359 = vst.msk [vmem:[#allocation3 + $0x1d8] sm:$0xff] %vm236_vm0, %v1079_v6 }
  0x4b   : > { %361 = vst.msk [vmem:[#allocation3 + $0x1e8] sm:$0xff] %vm236_vm0, %v1079_v6  ;;  %363 = vst.msk [vmem:[#allocation3 + $0x1f8] sm:$0xff] %vm236_vm0, %v1079_v6 }
  0x4c LB: >> { %408 = vmatprep.subr.mxu0 %v1158_v3  ;;  %988 = vmatprep.subr.mxu1 %v1158_v3  ;;  %s946_s19 = sshll.u32 %s1069_s26, 4  ;;  %v1080_v11 = vmov 0.0   ;;  %s949_s28 = sshll.u32 %s1069_s26, 5  ;;  %vm462_vm1 = vcmask 1041408   ;;  %vm477_vm2 = vcmask 130050   ;;  %vm480_vm3 = vcmask 128000   ;;  %s1069_s26 = sphi %s1396_s26, %s369_s26  }
  0x4d   : >> { %409 = vmatpush1.msra.mxu0 %v1153_v2  ;;  %990 = vmatpush1.msra.mxu1 %v1153_v2  ;;  %s371_s27 = scalar_lea.vmem %s1389_s22, %s946_s19  ;;  %s877_s29 = scalar_lea.vmem [#allocation2], %s949_s28 }
  0x4e   : >> { %410 = vmatprep.subr.mxu0 %v1148_v1  ;;  %989 = vmatprep.subr.mxu1 %v1148_v1  ;;  %v372_v12 = vld [vmem:[%s371_s27] sm:$0xff]  ;;  %v373_v13 = vld [vmem:[%s371_s27 + $0x8] sm:$0xf]  ;;  %s369_s26 = sadd.s32 1, %s1069_s26  }
  0x4f   : >> { %411 = vmatpush1.msra.mxu0 %v1143_v0  ;;  %991 = vmatpush1.msra.mxu1 %v1143_v0  ;;  %p366_p4 = scmp.ge.s32.totalorder %s369_s26, 12  }
  0x50   : >> { %444 = vmatprep.mubr.f32.mxu0 %v1080_v11  ;;  %450 = vmatprep.mubr.f32.mxu1 %v1080_v11  ;;  %s1418_s30 = smov (%p366_p4), 0  }
  0x51   : >> { %947 = vmatmul.mubr.msk.f32.vlgmr.msra.gmra.mxu0 %vm236_vm0, %v372_v12  ;;  %948 = vmatmul.mubr.msk.f32.vlgmr.msra.gmra.mxu1 %vm236_vm0, %v373_v13 }
 0x111   : >> { %v446_v14 = vpop.f32.mrf.mxu0  ;;  %v452_v15 = vpop.f32.mrf.mxu1 }
 0x112   : >> { %v463_v16 = vrot.slane %v446_v14, 6  ;;  %v465_v17 = vrot.slane %v452_v15, 6 }
 0x113   : >> { %v448_v18 = vpop.f32.mrf.mxu0  ;;  %v454_v19 = vpop.f32.mrf.mxu1  ;;  %368 = sbr.rel (!%p366_p4) target bundleno = 76 (0x4c), region = 101 }
 0x114   : >> { %950 = vst [vmem:[%s877_s29 + $0x40] sm:$0xfc] %v463_v16  ;;  %v466_v20 = vsel %vm462_vm1, %v463_v16, %v465_v17  ;;  %v464_v21 = vrot.slane %v448_v18, 6  ;;  %v467_v22 = vrot.slane %v454_v19, 6 }
 0x115   : >> { %952 = vst [vmem:[%s877_s29 + $0x50] sm:$0x3f] %v466_v20 }
 0x116   : >> { %951 = vst.msk [vmem:[%s877_s29 + $0x48] sm:$0xfc] %vm477_vm2, %v464_v21  ;;  %v468_v23 = vsel %vm462_vm1, %v464_v21, %v467_v22 }
 0x117   : >> { %953 = vst.msk [vmem:[%s877_s29 + $0x58] sm:$0x3f] %vm480_vm3, %v468_v23 }
 0x118 LB: >> { %641 = vmatprep.subr.mxu0 %v1379_v9  ;;  %992 = vmatprep.subr.mxu1 %v1379_v9  ;;  %s986_s6 = sshll.u32 %s1073_s30, 5  ;;  %s1081_s8 = smov 96   ;;  %vm509_vm4 = vcmask 1045504   ;;  %vm497_vm5 = vcmask 1046528   ;;  %v1086_v49 = vmov 0.0   ;;  %vm694_vm6 = vcmask 1040384   ;;  %s1073_s30 = sphi %s1418_s30, %s487_s30  }
 0x119   : >> { %642 = vmatpush1.msra.mxu0 %v1374_v8  ;;  %994 = vmatpush1.msra.mxu1 %v1374_v8  ;;  %s1434_s7 = scalar_lea.vmem [#allocation2], %s986_s6  ;;  %s1082_s9 = smov 112   ;;  %vm708_vm7 = vcmask 130049   ;;  %vm711_vm8 = vcmask 129024  }
 0x11a   : >> { %643 = vmatprep.subr.mxu0 %v1369_v7  ;;  %993 = vmatprep.subr.mxu1 %v1369_v7  ;;  %s1083_s10 = smov 80   ;;  %s1084_s11 = smov 64  }
 0x11b   : >> { %644 = vmatpush1.msra.mxu0 %v1168_v5  ;;  %995 = vmatpush1.msra.mxu1 %v1168_v5  ;;  %s1085_s12 = smov 48   ;;  %s1087_s13 = smov 32  }
 0x11c   : >> { %677 = vmatprep.mubr.f32.mxu0 %v1086_v49  ;;  %683 = vmatprep.mubr.f32.mxu1 %v1086_v49  ;;  %s1088_s14 = smov 16   ;;  %s888_s15 = scalar_lea.vmem [#allocation3], %s986_s6 }
 0x11d   : >> { %s487_s30 = sadd.s32 1, %s1073_s30  }
 0x11e   : >> { %v492_v24 = vld [vmem:[%s1434_s7 + $0x10] sm:$0xff]  ;;  %v491_v27 = vld [vmem:[%s1434_s7] sm:$0xff]  ;;  %v963_v36 = vld [vmem:[%s1434_s7 + $0x58] sm:$0xff]  ;;  %p484_p5 = scmp.ge.s32.totalorder %s487_s30, 14  }
 0x11f   : >> { %v511_v25 = vrot.slane %v492_v24, 2  ;;  %v499_v26 = vrot.slane %v492_v24, 1  ;;  %v958_v28 = vld [vmem:[%s1434_s7 + $0x30] sm:$0xff]  ;;  %v957_v29 = vld [vmem:[%s1434_s7 + $0x20] sm:$0xff]  ;;  %v510_v30 = vrot.slane %v491_v27, 2  ;;  %v498_v31 = vrot.slane %v491_v27, 1 }
 0x120   : >> { %v537_v32 = vrot.slane %v957_v29, 1  ;;  %v538_v35 = vrot.slane %v958_v28, 1  ;;  %v591_v37 = vrot.slane %v963_v36, 2  ;;  %v548_v38 = vrot.slane %v957_v29, 2  ;;  %v961_v41 = vld [vmem:[%s1434_s7 + $0x48] sm:$0xff]  ;;  %v962_v45 = vld [vmem:[%s1434_s7 + $0x50] sm:$0xff] }
 0x121   : >> { %515 = vrot.lane.b32.xlu1 %v511_v25, %s1081_s8  ;;  %503 = vrot.lane.b32.xlu0 %v499_v26, %s1082_s9  ;;  %v512_v33 = vsel %vm509_vm4, %v510_v30, %v511_v25  ;;  %v500_v34 = vsel %vm497_vm5, %v498_v31, %v499_v26  ;;  %v549_v40 = vrot.slane %v958_v28, 2  ;;  %v590_v42 = vrot.slane %v961_v41, 2  ;;  %v960_v46 = vld [vmem:[%s1434_s7 + $0x40] sm:$0xff]  ;;  %s1459_s16 = smov (%p484_p5), 0  }
 0x122   : >> { %v539_v39 = vsel %vm497_vm5, %v537_v32, %v538_v35  ;;  %v578_v47 = vrot.slane %v962_v45, 1  ;;  %v577_v48 = vrot.slane %v960_v46, 1 }
 0x123   : >> { %v592_v43 = vsel %vm509_vm4, %v590_v42, %v591_v37  ;;  %v550_v44 = vsel %vm509_vm4, %v548_v38, %v549_v40 }
 0x124   : >> { %v579_v50 = vsel %vm497_vm5, %v577_v48, %v578_v47 }
 0x125   : >> { %531 = vrot.lane.b32.xlu1 %v958_v28, %s1083_s10  ;;  %529 = vrot.lane.b32.xlu0 %v957_v29, %s1083_s10 }
 0x129   : >> { %513 = vrot.lane.b32.xlu1 %v512_v33, %s1081_s8  ;;  %501 = vrot.lane.b32.xlu0 %v500_v34, %s1082_s9 }
 0x12d   : >> { %542 = vrot.lane.b32.xlu1 %v538_v35, %s1084_s11  ;;  %540 = vrot.lane.b32.xlu0 %v539_v39, %s1084_s11 }
 0x131   : >> { %553 = vrot.lane.b32.xlu1 %v549_v40, %s1085_s12  ;;  %551 = vrot.lane.b32.xlu0 %v550_v44, %s1085_s12 }
 0x135   : >> { %571 = vrot.lane.b32.xlu1 %v962_v45, %s1087_s13  ;;  %569 = vrot.lane.b32.xlu0 %v960_v46, %s1087_s13 }
 0x139   : >> { %582 = vrot.lane.b32.xlu1 %v578_v47, %s1088_s14  ;;  %580 = vrot.lane.b32.xlu0 %v579_v50, %s1088_s14 }
 0x193   : >> { %v516_v51 = vpop.permute.xlu1 %515  ;;  %v504_v52 = vpop.permute.xlu0 %503 }
 0x194   : >> { %v508_v57 = vadd.f32 %v504_v52, %v492_v24 }
 0x196   : >> { %v520_v62 = vadd.f32 %v516_v51, %v508_v57 }
 0x197   : >> { %v532_v53 = vpop.permute.xlu1 %531  ;;  %v530_v54 = vpop.permute.xlu0 %529 }
 0x198   : >> { %v536_v2 = vadd.f32 %v532_v53, %v520_v62 }
 0x19b   : >> { %v514_v55 = vpop.permute.xlu1 %513  ;;  %v502_v56 = vpop.permute.xlu0 %501 }
 0x19c   : >> { %v507_v58 = vadd.f32 %v502_v56, %v491_v27 }
 0x19e   : >> { %v519_v59 = vadd.f32 %v514_v55, %v507_v58 }
 0x19f   : >> { %v543_v60 = vpop.permute.xlu1 %542  ;;  %v541_v61 = vpop.permute.xlu0 %540 }
 0x1a0   : >> { %v535_v63 = vadd.f32 %v530_v54, %v519_v59  ;;  %v547_v6 = vadd.f32 %v543_v60, %v536_v2 }
 0x1a2   : >> { %v546_v3 = vadd.f32 %v541_v61, %v535_v63 }
 0x1a3   : >> { %v554_v0 = vpop.permute.xlu1 %553  ;;  %v552_v1 = vpop.permute.xlu0 %551 }
 0x1a4   : >> { %v558_v13 = vadd.f32 %v554_v0, %v547_v6  ;;  %v557_v14 = vadd.f32 %v552_v1, %v546_v3 }
 0x1a7   : >> { %v572_v11 = vpop.permute.xlu1 %571  ;;  %v570_v12 = vpop.permute.xlu0 %569 }
 0x1a8   : >> { %v576_v15 = vadd.f32 %v572_v11, %v558_v13  ;;  %v575_v16 = vadd.f32 %v570_v12, %v557_v14 }
 0x1ab   : >> { %v583_v17 = vpop.permute.xlu1 %582  ;;  %v581_v18 = vpop.permute.xlu0 %580 }
 0x1ac   : >> { %v587_v19 = vadd.f32 %v583_v17, %v576_v15  ;;  %v586_v20 = vadd.f32 %v581_v18, %v575_v16 }
 0x1ae   : >> { %v596_v21 = vadd.f32 %v591_v37, %v587_v19  ;;  %v595_v22 = vadd.f32 %v592_v43, %v586_v20 }
 0x1b0   : >> { %v604_v23 = vadd.f32 %v1163_v4, %v596_v21  ;;  %v603_v24 = vadd.f32 %v1163_v4, %v595_v22 }
 0x1b2   : >> { %v606_v25 = vmax.f32 %v604_v23, 0.0  ;;  %v605_v26 = vmax.f32 %v603_v24, 0.0 }
 0x1b4   : >> { %965 = vmatmul.mubr.msk.f32.vlgmr.msra.gmra.mxu0 %vm236_vm0, %v605_v26  ;;  %966 = vmatmul.mubr.msk.f32.vlgmr.msra.gmra.mxu1 %vm236_vm0, %v606_v25 }
 0x274   : >> { %v679_v27 = vpop.f32.mrf.mxu0  ;;  %v685_v28 = vpop.f32.mrf.mxu1 }
 0x275   : >> { %v695_v29 = vrot.slane %v679_v27, 7  ;;  %v697_v30 = vrot.slane %v685_v28, 7 }
 0x276   : >> { %v681_v31 = vpop.f32.mrf.mxu0  ;;  %v687_v32 = vpop.f32.mrf.mxu1  ;;  %486 = sbr.rel (!%p484_p5) target bundleno = 280 (0x118), region = 112 }
 0x277   : >> { %968 = vst [vmem:[%s888_s15 + $0x20] sm:$0xfe] %v695_v29  ;;  %v698_v33 = vsel %vm694_vm6, %v695_v29, %v697_v30  ;;  %v696_v34 = vrot.slane %v681_v31, 7  ;;  %v699_v35 = vrot.slane %v687_v32, 7 }
 0x278   : >> { %970 = vst [vmem:[%s888_s15 + $0x30] sm:$0x7f] %v698_v33 }
 0x279   : >> { %969 = vst.msk [vmem:[%s888_s15 + $0x28] sm:$0xfe] %vm708_vm7, %v696_v34  ;;  %v700_v36 = vsel %vm694_vm6, %v696_v34, %v699_v35 }
 0x27a   : >> { %971 = vst.msk [vmem:[%s888_s15 + $0x38] sm:$0x7f] %vm711_vm8, %v700_v36 }
 0x27b LB: >> { %s987_s17 = sshll.u32 %s1077_s16, 5  ;;  %s1089_s21 = smov 96   ;;  %s1077_s16 = sphi %s1459_s16, %s718_s16  }
 0x27c   : >> { %s1465_s20 = scalar_lea.vmem [#allocation3], %s987_s17  ;;  %s1090_s22 = smov 112  }
 0x27d   : >> { %s1091_s23 = smov 80   ;;  %s1092_s24 = smov 64  }
 0x27e   : >> { %s1093_s26 = smov 48   ;;  %s1094_s19 = smov 32  }
 0x27f   : >> { %s1095_s27 = smov 16   ;;  %s983_s28 = sshll.u32 %s1077_s16, 4 }
 0x280   : >> { %s839_s29 = scalar_lea.vmem %s1394_s25, %s983_s28  ;;  %s718_s16 = sadd.s32 1, %s1077_s16  }
 0x281   : >> { %v723_v37 = vld [vmem:[%s1465_s20 + $0x10] sm:$0xff]  ;;  %v722_v40 = vld [vmem:[%s1465_s20] sm:$0xff]  ;;  %v981_v12 = vld [vmem:[%s1465_s20 + $0x58] sm:$0xff]  ;;  %p715_p6 = scmp.ge.s32.totalorder %s718_s16, 14  }
 0x282   : >> { %v742_v38 = vrot.slane %v723_v37, 2  ;;  %v730_v39 = vrot.slane %v723_v37, 1  ;;  %v976_v4 = vld [vmem:[%s1465_s20 + $0x30] sm:$0xff]  ;;  %v975_v5 = vld [vmem:[%s1465_s20 + $0x20] sm:$0xff]  ;;  %v741_v7 = vrot.slane %v722_v40, 2  ;;  %v729_v8 = vrot.slane %v722_v40, 1 }
 0x283   : >> { %v769_v42 = vrot.slane %v976_v4, 1  ;;  %v768_v43 = vrot.slane %v975_v5, 1  ;;  %v780_v45 = vrot.slane %v976_v4, 2  ;;  %v779_v46 = vrot.slane %v975_v5, 2  ;;  %v980_v48 = vld [vmem:[%s1465_s20 + $0x50] sm:$0xff]  ;;  %v978_v49 = vld [vmem:[%s1465_s20 + $0x40] sm:$0xff] }
 0x284   : >> { %746 = vrot.lane.b32.xlu1 %v742_v38, %s1089_s21  ;;  %734 = vrot.lane.b32.xlu0 %v730_v39, %s1090_s22  ;;  %v743_v9 = vsel %vm509_vm4, %v741_v7, %v742_v38  ;;  %v731_v41 = vsel %vm497_vm5, %v729_v8, %v730_v39  ;;  %v809_v50 = vrot.slane %v980_v48, 1  ;;  %v808_v51 = vrot.slane %v978_v49, 1  ;;  %v979_v13 = vld [vmem:[%s1465_s20 + $0x48] sm:$0xff] }
 0x285   : >> { %v770_v44 = vsel %vm497_vm5, %v768_v43, %v769_v42  ;;  %v781_v47 = vsel %vm509_vm4, %v779_v46, %v780_v45  ;;  %v822_v17 = vrot.slane %v981_v12, 2  ;;  %v821_v18 = vrot.slane %v979_v13, 2 }
 0x286   : >> { %v810_v52 = vsel %vm497_vm5, %v808_v51, %v809_v50 }
 0x287   : >> { %v823_v24 = vsel %vm509_vm4, %v821_v18, %v822_v17 }
 0x288   : >> { %762 = vrot.lane.b32.xlu1 %v976_v4, %s1091_s23  ;;  %760 = vrot.lane.b32.xlu0 %v975_v5, %s1091_s23 }
 0x28c   : >> { %744 = vrot.lane.b32.xlu1 %v743_v9, %s1089_s21  ;;  %732 = vrot.lane.b32.xlu0 %v731_v41, %s1090_s22 }
 0x290   : >> { %773 = vrot.lane.b32.xlu1 %v769_v42, %s1092_s24  ;;  %771 = vrot.lane.b32.xlu0 %v770_v44, %s1092_s24 }
 0x294   : >> { %784 = vrot.lane.b32.xlu1 %v780_v45, %s1093_s26  ;;  %782 = vrot.lane.b32.xlu0 %v781_v47, %s1093_s26 }
 0x298   : >> { %802 = vrot.lane.b32.xlu1 %v980_v48, %s1094_s19  ;;  %800 = vrot.lane.b32.xlu0 %v978_v49, %s1094_s19 }
 0x29c   : >> { %813 = vrot.lane.b32.xlu1 %v809_v50, %s1095_s27  ;;  %811 = vrot.lane.b32.xlu0 %v810_v52, %s1095_s27 }
 0x2f6   : >> { %v747_v53 = vpop.permute.xlu1 %746  ;;  %v735_v54 = vpop.permute.xlu0 %734 }
 0x2f7   : >> { %v739_v59 = vadd.f32 %v735_v54, %v723_v37 }
 0x2f9   : >> { %v751_v0 = vadd.f32 %v747_v53, %v739_v59 }
 0x2fa   : >> { %v763_v55 = vpop.permute.xlu1 %762  ;;  %v761_v56 = vpop.permute.xlu0 %760 }
 0x2fb   : >> { %v767_v6 = vadd.f32 %v763_v55, %v751_v0 }
 0x2fe   : >> { %v745_v57 = vpop.permute.xlu1 %744  ;;  %v733_v58 = vpop.permute.xlu0 %732 }
 0x2ff   : >> { %v738_v60 = vadd.f32 %v733_v58, %v722_v40 }
 0x301   : >> { %v750_v61 = vadd.f32 %v745_v57, %v738_v60 }
 0x302   : >> { %v774_v62 = vpop.permute.xlu1 %773  ;;  %v772_v63 = vpop.permute.xlu0 %771 }
 0x303   : >> { %v766_v1 = vadd.f32 %v761_v56, %v750_v61  ;;  %v778_v14 = vadd.f32 %v774_v62, %v767_v6 }
 0x305   : >> { %v777_v11 = vadd.f32 %v772_v63, %v766_v1 }
 0x306   : >> { %v785_v2 = vpop.permute.xlu1 %784  ;;  %v783_v3 = vpop.permute.xlu0 %782 }
 0x307   : >> { %v789_v19 = vadd.f32 %v785_v2, %v778_v14  ;;  %v788_v20 = vadd.f32 %v783_v3, %v777_v11 }
 0x30a   : >> { %v803_v15 = vpop.permute.xlu1 %802  ;;  %v801_v16 = vpop.permute.xlu0 %800 }
 0x30b   : >> { %v807_v21 = vadd.f32 %v803_v15, %v789_v19  ;;  %v806_v22 = vadd.f32 %v801_v16, %v788_v20 }
 0x30e   : >> { %v814_v23 = vpop.permute.xlu1 %813  ;;  %v812_v25 = vpop.permute.xlu0 %811 }
 0x30f   : >> { %v818_v26 = vadd.f32 %v814_v23, %v807_v21  ;;  %v817_v27 = vadd.f32 %v812_v25, %v806_v22 }
 0x311   : >> { %v827_v28 = vadd.f32 %v822_v17, %v818_v26  ;;  %v826_v29 = vadd.f32 %v823_v24, %v817_v27 }
 0x313   : >> { %v835_v30 = vadd.f32 %v1384_v10, %v827_v28  ;;  %v834_v31 = vadd.f32 %v1384_v10, %v826_v29 }
 0x314   : > { %717 = sbr.rel (!%p715_p6) target bundleno = 635 (0x27b), region = 123 }
 0x315   : >> { %v837_v32 = vmax.f32 %v835_v30, 0.0  ;;  %v836_v33 = vmax.f32 %v834_v31, 0.0 }
 0x317   : >> { %842 = vst.msk [vmem:[%s839_s29 + $0x8] sm:$0x3f] %vm480_vm3, %v837_v32 }
 0x318   : >> { %840 = vst.msk [vmem:[%s839_s29] sm:$0xff] %vm236_vm0, %v836_v33 }
 0x319 PF: > { %s15_s18 = sadd.s32 1, %s1065_s18  }
 0x31a   : > { %p12_p7 = scmp.ge.s32.totalorder %s15_s18, 4  }
 0x31c   :  { %14 = sbr.rel (!%p12_p7) target bundleno = 1 (0x1), region = 134 }

// kernel: ynet_forward.12
= control target key start
LH: loop header
LB: loop body
LE: loop exit
PB: predicated region body
PF: predicated region fallthrough
CT: control target
= control target key end

     0   :  { %s1252_s23 = smov 0   ;;  %s1724_s0 = inlined_call_operand.vmem [shape: f32[2,14,14,16], index: 0, kind: input, shape index: {}]   ;;  %s1725_s1 = inlined_call_operand.vmem [shape: f32[16,144], index: 1, kind: input, shape index: {}]   ;;  %s1726_s2 = inlined_call_operand.vmem [shape: f32[1,16], index: 2, kind: input, shape index: {}]   ;;  %s1727_s3 = inlined_call_operand.vmem [shape: f32[16,9], index: 3, kind: input, shape index: {}]   ;;  %s1728_s4 = inlined_call_operand.<no memory space> [shape: f32[1,1], index: 4, kind: input, shape index: {}]   ;;  %s1729_s5 = inlined_call_operand.vmem [shape: f32[2,16,16,1], index: 5, kind: input, shape index: {}]   ;;  %s1730_s6 = inlined_call_operand.vmem [shape: f32[2,16,16,1], index: 6, kind: output, shape index: {}]  }
   0x1   :  { %v11_v0 = vstv %s1728_s4 }
   0x2   :  { %12 = vst [vmem:[#allocation4] sm:$0x1] %v11_v0 }
   0x3 LB: > { %s1055_s24 = sadd.s32 4294967295, %s1183_s23   ;;  %p1059_p0 = scmp.ge.s32.totalorder %s1183_s23, 1  ;;  %s1183_s23 = sphi %s1252_s23, %s18_s23  }
   0x4   : > { %p224_p1 = scmp.lt.s32.totalorder %s1183_s23, 3 }
   0x6   : > { %p225_p2 = pnand %p1059_p0, %p224_p1 }
   0x7   : > { %p1262_p3 = scmp.lt.s32.totalorder (!%p225_p2), %s1055_s24, 1  ;;  %s1596_s27 = smov (!%p225_p2), 0  }
   0x8   : > { %228 = sbr.rel (%p225_p2) target bundleno = 809 (0x329), region = 44 }
   0xd   : > { %v1269_v1 = vld [vmem:[%s1725_s1] sm:$0xff]  ;;  %v1274_v2 = vld [vmem:[%s1725_s1 + $0x8] sm:$0xff]  ;;  %v1279_v3 = vld [vmem:[%s1725_s1 + $0x10] sm:$0xff]  ;;  %vm283_vm0 = vcmask 130048   ;;  %v1197_v7 = vmov 0.0   ;;  %vm288_vm1 = vcmask 123904  }
   0xe   : > { %v1284_v4 = vld [vmem:[%s1725_s1 + $0x18] sm:$0xff]  ;;  %v1289_v5 = vld [vmem:[%s1726_s2] ss:$0 sm:$0xff]  ;;  %282 = vst [vmem:[#allocation2] sm:$0xff] %v1197_v7  ;;  %285 = vst [vmem:[#allocation2 + $0x10] sm:$0xff] %v1197_v7  ;;  %vm392_vm2 = vcmask 72704  }
   0xf   : > { %v1294_v6 = vld [vmem:[%s1727_s3] sm:$0xff]  ;;  %287 = vst [vmem:[#allocation2 + $0x20] sm:$0x3] %v1197_v7  ;;  %290 = vst [vmem:[#allocation2 + $0x30] sm:$0xff] %v1197_v7  ;;  %s1733_s24 = smov (!%p1262_p3, %s1055_s24), 1  ;;  %v1431_v8 = vld [vmem:[%s1727_s3 + $0x8] sm:$0xff] }
  0x10   : > { %292 = vst [vmem:[#allocation2 + $0x40] sm:$0xff] %v1197_v7  ;;  %294 = vst [vmem:[#allocation2 + $0x50] sm:$0x3] %v1197_v7  ;;  %v1433_v9 = vld [vmem:[#allocation4] ss:$0 sm:$0xff]  ;;  %vm395_vm3 = vcmask 66560  }
  0x11   : > { %296 = vst [vmem:[#allocation2 + $0x60] sm:$0xff] %v1197_v7  ;;  %298 = vst [vmem:[#allocation2 + $0x70] sm:$0xff] %v1197_v7  ;;  %s1115_s15 = smul.u32 224, %s1733_s24  ;;  %s1097_s16 = sshll.u32 %s1733_s24, 8 }
  0x12   : > { %300 = vst [vmem:[#allocation2 + $0x80] sm:$0x3] %v1197_v7  ;;  %302 = vst [vmem:[#allocation2 + $0x90] sm:$0xff] %v1197_v7  ;;  %s1584_s19 = scalar_lea.vmem %s1729_s5, %s1097_s16  ;;  %s1589_s22 = scalar_lea.vmem %s1730_s6, %s1097_s16 }
  0x13   : > { %304 = vst [vmem:[#allocation2 + $0xa0] sm:$0xff] %v1197_v7  ;;  %306 = vst [vmem:[#allocation2 + $0xb0] sm:$0x3] %v1197_v7  ;;  %s1594_s26 = scalar_lea.vmem %s1724_s0, %s1115_s15 }
  0x14   : > { %308 = vst [vmem:[#allocation2 + $0xc0] sm:$0xff] %v1197_v7  ;;  %310 = vst [vmem:[#allocation2 + $0xd0] sm:$0xff] %v1197_v7 }
  0x15   : > { %312 = vst [vmem:[#allocation2 + $0xe0] sm:$0x3] %v1197_v7  ;;  %314 = vst [vmem:[#allocation2 + $0xf0] sm:$0xff] %v1197_v7 }
  0x16   : > { %316 = vst [vmem:[#allocation2 + $0x100] sm:$0xff] %v1197_v7  ;;  %318 = vst [vmem:[#allocation2 + $0x110] sm:$0x3] %v1197_v7 }
  0x17   : > { %320 = vst [vmem:[#allocation2 + $0x120] sm:$0xff] %v1197_v7  ;;  %322 = vst [vmem:[#allocation2 + $0x130] sm:$0xff] %v1197_v7 }
  0x18   : > { %324 = vst [vmem:[#allocation2 + $0x140] sm:$0x3] %v1197_v7  ;;  %326 = vst [vmem:[#allocation2 + $0x150] sm:$0xff] %v1197_v7 }
  0x19   : > { %328 = vst [vmem:[#allocation2 + $0x160] sm:$0xff] %v1197_v7  ;;  %330 = vst [vmem:[#allocation2 + $0x170] sm:$0x3] %v1197_v7 }
  0x1a   : > { %332 = vst [vmem:[#allocation2 + $0x180] sm:$0xff] %v1197_v7  ;;  %334 = vst [vmem:[#allocation2 + $0x190] sm:$0xff] %v1197_v7 }
  0x1b   : > { %336 = vst [vmem:[#allocation2 + $0x1a0] sm:$0x3] %v1197_v7  ;;  %338 = vst [vmem:[#allocation2 + $0x1b0] sm:$0xff] %v1197_v7 }
  0x1c   : > { %340 = vst [vmem:[#allocation2 + $0x1c0] sm:$0xff] %v1197_v7  ;;  %342 = vst [vmem:[#allocation2 + $0x1d0] sm:$0x3] %v1197_v7 }
  0x1d   : > { %344 = vst [vmem:[#allocation2 + $0x1e0] sm:$0xff] %v1197_v7  ;;  %346 = vst [vmem:[#allocation2 + $0x1f0] sm:$0xff] %v1197_v7 }
  0x1e   : > { %348 = vst [vmem:[#allocation2 + $0x200] sm:$0x3] %v1197_v7  ;;  %350 = vst [vmem:[#allocation2 + $0x210] sm:$0xff] %v1197_v7 }
  0x1f   : > { %352 = vst [vmem:[#allocation2 + $0x220] sm:$0xff] %v1197_v7  ;;  %354 = vst [vmem:[#allocation2 + $0x230] sm:$0x3] %v1197_v7 }
  0x20   : > { %356 = vst [vmem:[#allocation2 + $0x240] sm:$0xff] %v1197_v7  ;;  %358 = vst [vmem:[#allocation2 + $0x250] sm:$0xff] %v1197_v7 }
  0x21   : > { %360 = vst [vmem:[#allocation2 + $0x260] sm:$0x3] %v1197_v7  ;;  %362 = vst [vmem:[#allocation2 + $0x270] sm:$0xff] %v1197_v7 }
  0x22   : > { %364 = vst [vmem:[#allocation2 + $0x280] sm:$0xff] %v1197_v7  ;;  %366 = vst [vmem:[#allocation2 + $0x290] sm:$0x3] %v1197_v7 }
  0x23   : > { %368 = vst [vmem:[#allocation2 + $0x2a0] sm:$0xff] %v1197_v7  ;;  %370 = vst [vmem:[#allocation2 + $0x2b0] sm:$0xff] %v1197_v7 }
  0x24   : > { %372 = vst [vmem:[#allocation2 + $0x2c0] sm:$0x3] %v1197_v7  ;;  %374 = vst [vmem:[#allocation2 + $0x2d0] sm:$0xff] %v1197_v7 }
  0x25   : > { %376 = vst [vmem:[#allocation2 + $0x2e0] sm:$0xff] %v1197_v7  ;;  %378 = vst [vmem:[#allocation2 + $0x2f0] sm:$0x3] %v1197_v7 }
  0x26   : > { %380 = vst [vmem:[#allocation2 + $0x300] sm:$0xff] %v1197_v7  ;;  %382 = vst [vmem:[#allocation2 + $0x310] sm:$0xff] %v1197_v7 }
  0x27   : > { %384 = vst [vmem:[#allocation2 + $0x320] sm:$0x3] %v1197_v7  ;;  %386 = vst [vmem:[#allocation2 + $0x330] sm:$0xff] %v1197_v7 }
  0x28   : > { %388 = vst [vmem:[#allocation2 + $0x340] sm:$0xff] %v1197_v7  ;;  %390 = vst [vmem:[#allocation2 + $0x350] sm:$0x3] %v1197_v7 }
  0x29   : > { %284 = vst.msk [vmem:[#allocation2 + $0x8] sm:$0xff] %vm283_vm0, %v1197_v7  ;;  %286 = vst.msk [vmem:[#allocation2 + $0x18] sm:$0xff] %vm283_vm0, %v1197_v7 }
  0x2a   : > { %291 = vst.msk [vmem:[#allocation2 + $0x38] sm:$0xff] %vm283_vm0, %v1197_v7  ;;  %293 = vst.msk [vmem:[#allocation2 + $0x48] sm:$0xff] %vm283_vm0, %v1197_v7 }
  0x2b   : > { %297 = vst.msk [vmem:[#allocation2 + $0x68] sm:$0xff] %vm283_vm0, %v1197_v7  ;;  %299 = vst.msk [vmem:[#allocation2 + $0x78] sm:$0xff] %vm283_vm0, %v1197_v7 }
  0x2c   : > { %303 = vst.msk [vmem:[#allocation2 + $0x98] sm:$0xff] %vm283_vm0, %v1197_v7  ;;  %305 = vst.msk [vmem:[#allocation2 + $0xa8] sm:$0xff] %vm283_vm0, %v1197_v7 }
  0x2d   : > { %309 = vst.msk [vmem:[#allocation2 + $0xc8] sm:$0xff] %vm283_vm0, %v1197_v7  ;;  %311 = vst.msk [vmem:[#allocation2 + $0xd8] sm:$0xff] %vm283_vm0, %v1197_v7 }
  0x2e   : > { %315 = vst.msk [vmem:[#allocation2 + $0xf8] sm:$0xff] %vm283_vm0, %v1197_v7  ;;  %317 = vst.msk [vmem:[#allocation2 + $0x108] sm:$0xff] %vm283_vm0, %v1197_v7 }
  0x2f   : > { %321 = vst.msk [vmem:[#allocation2 + $0x128] sm:$0xff] %vm283_vm0, %v1197_v7  ;;  %323 = vst.msk [vmem:[#allocation2 + $0x138] sm:$0xff] %vm283_vm0, %v1197_v7 }
  0x30   : > { %327 = vst.msk [vmem:[#allocation2 + $0x158] sm:$0xff] %vm283_vm0, %v1197_v7  ;;  %329 = vst.msk [vmem:[#allocation2 + $0x168] sm:$0xff] %vm283_vm0, %v1197_v7 }
  0x31   : > { %333 = vst.msk [vmem:[#allocation2 + $0x188] sm:$0xff] %vm283_vm0, %v1197_v7  ;;  %335 = vst.msk [vmem:[#allocation2 + $0x198] sm:$0xff] %vm283_vm0, %v1197_v7 }
  0x32   : > { %339 = vst.msk [vmem:[#allocation2 + $0x1b8] sm:$0xff] %vm283_vm0, %v1197_v7  ;;  %341 = vst.msk [vmem:[#allocation2 + $0x1c8] sm:$0xff] %vm283_vm0, %v1197_v7 }
  0x33   : > { %345 = vst.msk [vmem:[#allocation2 + $0x1e8] sm:$0xff] %vm283_vm0, %v1197_v7  ;;  %347 = vst.msk [vmem:[#allocation2 + $0x1f8] sm:$0xff] %vm283_vm0, %v1197_v7 }
  0x34   : > { %351 = vst.msk [vmem:[#allocation2 + $0x218] sm:$0xff] %vm283_vm0, %v1197_v7  ;;  %353 = vst.msk [vmem:[#allocation2 + $0x228] sm:$0xff] %vm283_vm0, %v1197_v7 }
  0x35   : > { %357 = vst.msk [vmem:[#allocation2 + $0x248] sm:$0xff] %vm283_vm0, %v1197_v7  ;;  %359 = vst.msk [vmem:[#allocation2 + $0x258] sm:$0xff] %vm283_vm0, %v1197_v7 }
  0x36   : > { %363 = vst.msk [vmem:[#allocation2 + $0x278] sm:$0xff] %vm283_vm0, %v1197_v7  ;;  %365 = vst.msk [vmem:[#allocation2 + $0x288] sm:$0xff] %vm283_vm0, %v1197_v7 }
  0x37   : > { %369 = vst.msk [vmem:[#allocation2 + $0x2a8] sm:$0xff] %vm283_vm0, %v1197_v7  ;;  %371 = vst.msk [vmem:[#allocation2 + $0x2b8] sm:$0xff] %vm283_vm0, %v1197_v7 }
  0x38   : > { %375 = vst.msk [vmem:[#allocation2 + $0x2d8] sm:$0xff] %vm283_vm0, %v1197_v7  ;;  %377 = vst.msk [vmem:[#allocation2 + $0x2e8] sm:$0xff] %vm283_vm0, %v1197_v7 }
  0x39   : > { %381 = vst.msk [vmem:[#allocation2 + $0x308] sm:$0xff] %vm283_vm0, %v1197_v7  ;;  %383 = vst.msk [vmem:[#allocation2 + $0x318] sm:$0xff] %vm283_vm0, %v1197_v7 }
  0x3a   : > { %387 = vst.msk [vmem:[#allocation2 + $0x338] sm:$0xff] %vm283_vm0, %v1197_v7  ;;  %389 = vst.msk [vmem:[#allocation2 + $0x348] sm:$0xff] %vm283_vm0, %v1197_v7 }
  0x3b   : > { %289 = vst.msk [vmem:[#allocation2 + $0x28] sm:$0x3] %vm288_vm1, %v1197_v7  ;;  %295 = vst.msk [vmem:[#allocation2 + $0x58] sm:$0x3] %vm288_vm1, %v1197_v7 }
  0x3c   : > { %301 = vst.msk [vmem:[#allocation2 + $0x88] sm:$0x3] %vm288_vm1, %v1197_v7  ;;  %307 = vst.msk [vmem:[#allocation2 + $0xb8] sm:$0x3] %vm288_vm1, %v1197_v7 }
  0x3d   : > { %313 = vst.msk [vmem:[#allocation2 + $0xe8] sm:$0x3] %vm288_vm1, %v1197_v7  ;;  %319 = vst.msk [vmem:[#allocation2 + $0x118] sm:$0x3] %vm288_vm1, %v1197_v7 }
  0x3e   : > { %325 = vst.msk [vmem:[#allocation2 + $0x148] sm:$0x3] %vm288_vm1, %v1197_v7  ;;  %331 = vst.msk [vmem:[#allocation2 + $0x178] sm:$0x3] %vm288_vm1, %v1197_v7 }
  0x3f   : > { %337 = vst.msk [vmem:[#allocation2 + $0x1a8] sm:$0x3] %vm288_vm1, %v1197_v7  ;;  %343 = vst.msk [vmem:[#allocation2 + $0x1d8] sm:$0x3] %vm288_vm1, %v1197_v7 }
  0x40   : > { %349 = vst.msk [vmem:[#allocation2 + $0x208] sm:$0x3] %vm288_vm1, %v1197_v7  ;;  %355 = vst.msk [vmem:[#allocation2 + $0x238] sm:$0x3] %vm288_vm1, %v1197_v7 }
  0x41   : > { %361 = vst.msk [vmem:[#allocation2 + $0x268] sm:$0x3] %vm288_vm1, %v1197_v7  ;;  %367 = vst.msk [vmem:[#allocation2 + $0x298] sm:$0x3] %vm288_vm1, %v1197_v7 }
  0x42   : > { %373 = vst.msk [vmem:[#allocation2 + $0x2c8] sm:$0x3] %vm288_vm1, %v1197_v7  ;;  %379 = vst.msk [vmem:[#allocation2 + $0x2f8] sm:$0x3] %vm288_vm1, %v1197_v7 }
  0x43   : > { %385 = vst.msk [vmem:[#allocation2 + $0x328] sm:$0x3] %vm288_vm1, %v1197_v7  ;;  %391 = vst.msk [vmem:[#allocation2 + $0x358] sm:$0x3] %vm288_vm1, %v1197_v7 }
  0x44   : > { %393 = vst.msk [vmem:[#allocation3] sm:$0xff] %vm392_vm2, %v1197_v7  ;;  %394 = vst.msk [vmem:[#allocation3 + $0x8] sm:$0xff] %vm392_vm2, %v1197_v7 }
  0x45   : > { %397 = vst.msk [vmem:[#allocation3 + $0x18] sm:$0xff] %vm392_vm2, %v1197_v7  ;;  %398 = vst.msk [vmem:[#allocation3 + $0x20] sm:$0xff] %vm392_vm2, %v1197_v7 }
  0x46   : > { %400 = vst.msk [vmem:[#allocation3 + $0x30] sm:$0xff] %vm392_vm2, %v1197_v7  ;;  %401 = vst.msk [vmem:[#allocation3 + $0x38] sm:$0xff] %vm392_vm2, %v1197_v7 }
  0x47   : > { %403 = vst.msk [vmem:[#allocation3 + $0x48] sm:$0xff] %vm392_vm2, %v1197_v7  ;;  %404 = vst.msk [vmem:[#allocation3 + $0x50] sm:$0xff] %vm392_vm2, %v1197_v7 }
  0x48   : > { %406 = vst.msk [vmem:[#allocation3 + $0x60] sm:$0xff] %vm392_vm2, %v1197_v7  ;;  %407 = vst.msk [vmem:[#allocation3 + $0x68] sm:$0xff] %vm392_vm2, %v1197_v7 }
  0x49   : > { %409 = vst.msk [vmem:[#allocation3 + $0x78] sm:$0xff] %vm392_vm2, %v1197_v7  ;;  %410 = vst.msk [vmem:[#allocation3 + $0x80] sm:$0xff] %vm392_vm2, %v1197_v7 }
  0x4a   : > { %412 = vst.msk [vmem:[#allocation3 + $0x90] sm:$0xff] %vm392_vm2, %v1197_v7  ;;  %413 = vst.msk [vmem:[#allocation3 + $0x98] sm:$0xff] %vm392_vm2, %v1197_v7 }
  0x4b   : > { %415 = vst.msk [vmem:[#allocation3 + $0xa8] sm:$0xff] %vm392_vm2, %v1197_v7  ;;  %416 = vst.msk [vmem:[#allocation3 + $0xb0] sm:$0xff] %vm392_vm2, %v1197_v7 }
  0x4c   : > { %418 = vst.msk [vmem:[#allocation3 + $0xc0] sm:$0xff] %vm392_vm2, %v1197_v7  ;;  %419 = vst.msk [vmem:[#allocation3 + $0xc8] sm:$0xff] %vm392_vm2, %v1197_v7 }
  0x4d   : > { %421 = vst.msk [vmem:[#allocation3 + $0xd8] sm:$0xff] %vm392_vm2, %v1197_v7  ;;  %422 = vst.msk [vmem:[#allocation3 + $0xe0] sm:$0xff] %vm392_vm2, %v1197_v7 }
  0x4e   : > { %424 = vst.msk [vmem:[#allocation3 + $0xf0] sm:$0xff] %vm392_vm2, %v1197_v7  ;;  %425 = vst.msk [vmem:[#allocation3 + $0xf8] sm:$0xff] %vm392_vm2, %v1197_v7 }
  0x4f   : > { %427 = vst.msk [vmem:[#allocation3 + $0x108] sm:$0xff] %vm392_vm2, %v1197_v7  ;;  %428 = vst.msk [vmem:[#allocation3 + $0x110] sm:$0xff] %vm392_vm2, %v1197_v7 }
  0x50   : > { %430 = vst.msk [vmem:[#allocation3 + $0x120] sm:$0xff] %vm392_vm2, %v1197_v7  ;;  %431 = vst.msk [vmem:[#allocation3 + $0x128] sm:$0xff] %vm392_vm2, %v1197_v7 }
  0x51   : > { %433 = vst.msk [vmem:[#allocation3 + $0x138] sm:$0xff] %vm392_vm2, %v1197_v7  ;;  %434 = vst.msk [vmem:[#allocation3 + $0x140] sm:$0xff] %vm392_vm2, %v1197_v7 }
  0x52   : > { %436 = vst.msk [vmem:[#allocation3 + $0x150] sm:$0xff] %vm392_vm2, %v1197_v7  ;;  %437 = vst.msk [vmem:[#allocation3 + $0x158] sm:$0xff] %vm392_vm2, %v1197_v7 }
  0x53   : > { %439 = vst.msk [vmem:[#allocation3 + $0x168] sm:$0xff] %vm392_vm2, %v1197_v7  ;;  %440 = vst.msk [vmem:[#allocation3 + $0x170] sm:$0xff] %vm392_vm2, %v1197_v7 }
  0x54   : > { %442 = vst.msk [vmem:[#allocation3 + $0x180] sm:$0xff] %vm392_vm2, %v1197_v7  ;;  %443 = vst.msk [vmem:[#allocation3 + $0x188] sm:$0xff] %vm392_vm2, %v1197_v7 }
  0x55   : > { %445 = vst.msk [vmem:[#allocation3 + $0x198] sm:$0xff] %vm392_vm2, %v1197_v7  ;;  %446 = vst.msk [vmem:[#allocation3 + $0x1a0] sm:$0xff] %vm392_vm2, %v1197_v7 }
  0x56   : > { %396 = vst.msk [vmem:[#allocation3 + $0x10] sm:$0x3] %vm395_vm3, %v1197_v7  ;;  %399 = vst.msk [vmem:[#allocation3 + $0x28] sm:$0x3] %vm395_vm3, %v1197_v7 }
  0x57   : > { %402 = vst.msk [vmem:[#allocation3 + $0x40] sm:$0x3] %vm395_vm3, %v1197_v7  ;;  %405 = vst.msk [vmem:[#allocation3 + $0x58] sm:$0x3] %vm395_vm3, %v1197_v7 }
  0x58   : > { %408 = vst.msk [vmem:[#allocation3 + $0x70] sm:$0x3] %vm395_vm3, %v1197_v7  ;;  %411 = vst.msk [vmem:[#allocation3 + $0x88] sm:$0x3] %vm395_vm3, %v1197_v7 }
  0x59   : > { %414 = vst.msk [vmem:[#allocation3 + $0xa0] sm:$0x3] %vm395_vm3, %v1197_v7  ;;  %417 = vst.msk [vmem:[#allocation3 + $0xb8] sm:$0x3] %vm395_vm3, %v1197_v7 }
  0x5a   : > { %420 = vst.msk [vmem:[#allocation3 + $0xd0] sm:$0x3] %vm395_vm3, %v1197_v7  ;;  %423 = vst.msk [vmem:[#allocation3 + $0xe8] sm:$0x3] %vm395_vm3, %v1197_v7 }
  0x5b   : > { %426 = vst.msk [vmem:[#allocation3 + $0x100] sm:$0x3] %vm395_vm3, %v1197_v7  ;;  %429 = vst.msk [vmem:[#allocation3 + $0x118] sm:$0x3] %vm395_vm3, %v1197_v7 }
  0x5c   : > { %432 = vst.msk [vmem:[#allocation3 + $0x130] sm:$0x3] %vm395_vm3, %v1197_v7  ;;  %435 = vst.msk [vmem:[#allocation3 + $0x148] sm:$0x3] %vm395_vm3, %v1197_v7 }
  0x5d   : > { %438 = vst.msk [vmem:[#allocation3 + $0x160] sm:$0x3] %vm395_vm3, %v1197_v7  ;;  %441 = vst.msk [vmem:[#allocation3 + $0x178] sm:$0x3] %vm395_vm3, %v1197_v7 }
  0x5e   : > { %444 = vst.msk [vmem:[#allocation3 + $0x190] sm:$0x3] %vm395_vm3, %v1197_v7  ;;  %447 = vst.msk [vmem:[#allocation3 + $0x1a8] sm:$0x3] %vm395_vm3, %v1197_v7 }
  0x5f LB: >> { %492 = vmatprep.subr.mxu0 %v1284_v4  ;;  %1111 = vmatprep.subr.mxu1 %v1284_v4  ;;  %s1065_s24 = sshll.u32 %s1187_s27, 4  ;;  %v1198_v10 = vmov 0.0   ;;  %s984_s29 = smul.u32 48, %s1187_s27  ;;  %vm546_vm4 = vcmask 1041408   ;;  %vm561_vm5 = vcmask 130050   ;;  %s1187_s27 = sphi %s1596_s27, %s453_s27  }
  0x60   : >> { %493 = vmatpush1.msra.mxu0 %v1279_v3  ;;  %1113 = vmatpush1.msra.mxu1 %v1279_v3  ;;  %s455_s28 = scalar_lea.vmem %s1594_s26, %s1065_s24  ;;  %s453_s27 = sadd.s32 1, %s1187_s27  }
  0x61   : >> { %494 = vmatprep.subr.mxu0 %v1274_v2  ;;  %1112 = vmatprep.subr.mxu1 %v1274_v2  ;;  %v456_v11 = vld [vmem:[%s455_s28] sm:$0xff]  ;;  %v457_v12 = vld [vmem:[%s455_s28 + $0x8] sm:$0x3f]  ;;  %s985_s30 = scalar_lea.vmem [#allocation2], %s984_s29  ;;  %p450_p4 = scmp.ge.s32.totalorder %s453_s27, 14  }
  0x62   : >> { %495 = vmatpush1.msra.mxu0 %v1269_v1  ;;  %1114 = vmatpush1.msra.mxu1 %v1269_v1  ;;  %s1618_s7 = smov (%p450_p4), 0  }
  0x63   : >> { %528 = vmatprep.mubr.f32.mxu0 %v1198_v10  ;;  %534 = vmatprep.mubr.f32.mxu1 %v1198_v10 }
  0x64   : >> { %1066 = vmatmul.mubr.msk.f32.vlgmr.msra.gmra.mxu0 %vm283_vm0, %v456_v11  ;;  %1067 = vmatmul.mubr.msk.f32.vlgmr.msra.gmra.mxu1 %vm283_vm0, %v457_v12 }
 0x124   : >> { %v530_v13 = vpop.f32.mrf.mxu0  ;;  %v536_v14 = vpop.f32.mrf.mxu1 }
 0x125   : >> { %v547_v15 = vrot.slane %v530_v13, 6  ;;  %v549_v16 = vrot.slane %v536_v14, 6 }
 0x126   : >> { %v532_v17 = vpop.f32.mrf.mxu0  ;;  %v538_v18 = vpop.f32.mrf.mxu1  ;;  %452 = sbr.rel (!%p450_p4) target bundleno = 95 (0x5f), region = 109 }
 0x127   : >> { %1068 = vst [vmem:[%s985_s30 + $0x60] sm:$0xfc] %v547_v15  ;;  %v550_v19 = vsel %vm546_vm4, %v547_v15, %v549_v16  ;;  %v548_v20 = vrot.slane %v532_v17, 6  ;;  %v551_v21 = vrot.slane %v538_v18, 6 }
 0x128   : >> { %1070 = vst [vmem:[%s985_s30 + $0x70] sm:$0xff] %v550_v19 }
 0x129   : >> { %1069 = vst.msk [vmem:[%s985_s30 + $0x68] sm:$0xfc] %vm561_vm5, %v548_v20  ;;  %v552_v22 = vsel %vm546_vm4, %v548_v20, %v551_v21 }
 0x12a   : >> { %1071 = vst.msk [vmem:[%s985_s30 + $0x78] sm:$0xff] %vm283_vm0, %v552_v22 }
 0x12b LB: >> { %1104 = vmatprep.subr.mxu0 %v1431_v8  ;;  %s1099_s8 = smul.u32 48, %s1191_s7  ;;  %s1199_s10 = smov 80   ;;  %vm596_vm6 = vcmask 1045504   ;;  %vm582_vm7 = vcmask 1046528   ;;  %s1191_s7 = sphi %s1618_s7, %s570_s7  }
 0x12c   : >> { %1105 = vmatpush3.msra.mxu0 %v1431_v8  ;;  %s1200_s11 = smov 96   ;;  %s1201_s12 = smov 112  }
 0x12d   : >> { %1106 = vmatprep.subr.mxu0 %v1294_v6  ;;  %s1628_s9 = scalar_lea.vmem [#allocation2], %s1099_s8  ;;  %s1202_s13 = smov 64  }
 0x12e   : >> { %1107 = vmatpush3.msra.mxu0 %v1294_v6  ;;  %s1203_s14 = smov 48   ;;  %s1204_s15 = smov 32  }
 0x12f   : >> { %s1205_s16 = smov 16   ;;  %s995_s17 = smul.u32 24, %s1191_s7 }
 0x130   : >> { %s570_s7 = sadd.s32 1, %s1191_s7  }
 0x131   : >> { %v1074_v23 = vld [vmem:[%s1628_s9 + $0x40] sm:$0xff]  ;;  %v1073_v24 = vld [vmem:[%s1628_s9 + $0x30] sm:$0xff]  ;;  %v1079_v42 = vld [vmem:[%s1628_s9 + $0x78] sm:$0xff]  ;;  %s996_s18 = scalar_lea.vmem [#allocation3], %s995_s17  ;;  %p567_p5 = scmp.ge.s32.totalorder %s570_s7, 16  }
 0x132   : >> { %v1633_v25 = vld [vmem:[%s1628_s9] sm:$0xff]  ;;  %621 = vrot.lane.b32.xlu1 %v1074_v23, %s1199_s10  ;;  %619 = vrot.lane.b32.xlu0 %v1073_v24, %s1199_s10  ;;  %v1636_v26 = vld [vmem:[%s1628_s9 + $0x10] sm:$0xff]  ;;  %v629_v37 = vrot.slane %v1074_v23, 1  ;;  %v628_v38 = vrot.slane %v1073_v24, 1  ;;  %v642_v44 = vrot.slane %v1074_v23, 2  ;;  %v692_v45 = vrot.slane %v1079_v42, 2 }
 0x133   : >> { %v597_v27 = vrot.slane %v1633_v25, 2  ;;  %v598_v28 = vrot.slane %v1636_v26, 2  ;;  %v583_v29 = vrot.slane %v1633_v25, 1  ;;  %v584_v30 = vrot.slane %v1636_v26, 1  ;;  %v576_v31 = vld [vmem:[%s1628_s9 + $0x20] sm:$0x3] }
 0x134   : >> { %v600_v32 = vrot.slane %v576_v31, 2  ;;  %v586_v33 = vrot.slane %v576_v31, 1  ;;  %v1075_v34 = vld [vmem:[%s1628_s9 + $0x50] sm:$0x3]  ;;  %v1081_v43 = vld [vmem:[%s1628_s9 + $0x88] sm:$0x3]  ;;  %v630_v49 = vsel %vm582_vm7, %v628_v38, %v629_v37 }
 0x135   : >> { %v599_v35 = vsel %vm596_vm6, %v597_v27, %v598_v28  ;;  %v585_v36 = vsel %vm582_vm7, %v583_v29, %v584_v30  ;;  %v631_v41 = vrot.slane %v1075_v34, 1  ;;  %v694_v46 = vrot.slane %v1081_v43, 2  ;;  %v1077_v51 = vld [vmem:[%s1628_s9 + $0x68] sm:$0xff]  ;;  %v1078_v57 = vld [vmem:[%s1628_s9 + $0x70] sm:$0xff]  ;;  %v1076_v58 = vld [vmem:[%s1628_s9 + $0x60] sm:$0xff]  ;;  %s1674_s20 = smov (%p567_p5), 0  }
 0x136   : >> { %602 = vrot.lane.b32.xlu1 %v599_v35, %s1200_s11  ;;  %588 = vrot.lane.b32.xlu0 %v585_v36, %s1201_s12  ;;  %v601_v39 = vsel %vm596_vm6, %v598_v28, %v600_v32  ;;  %v587_v40 = vsel %vm582_vm7, %v584_v30, %v586_v33  ;;  %v641_v47 = vrot.slane %v1073_v24, 2  ;;  %v644_v50 = vrot.slane %v1075_v34, 2  ;;  %v1080_v59 = vld [vmem:[%s1628_s9 + $0x80] sm:$0x3] }
 0x137   : >> { %v632_v48 = vsel %vm582_vm7, %v629_v37, %v631_v41  ;;  %v695_v52 = vsel %vm596_vm6, %v692_v45, %v694_v46  ;;  %v691_v53 = vrot.slane %v1077_v51, 2  ;;  %v676_v60 = vrot.slane %v1078_v57, 1 }
 0x138   : >> { %v645_v55 = vsel %vm596_vm6, %v642_v44, %v644_v50  ;;  %v643_v56 = vsel %vm596_vm6, %v641_v47, %v642_v44  ;;  %v675_v61 = vrot.slane %v1076_v58, 1  ;;  %v678_v62 = vrot.slane %v1080_v59, 1 }
 0x139   : >> { %v693_v54 = vsel %vm596_vm6, %v691_v53, %v692_v45 }
 0x13a   : >> { %604 = vrot.lane.b32.xlu1 %v601_v39, %s1200_s11  ;;  %590 = vrot.lane.b32.xlu0 %v587_v40, %s1201_s12  ;;  %v679_v63 = vsel %vm582_vm7, %v676_v60, %v678_v62  ;;  %v677_v0 = vsel %vm582_vm7, %v675_v61, %v676_v60 }
 0x13e   : >> { %635 = vrot.lane.b32.xlu1 %v632_v48, %s1202_s13  ;;  %633 = vrot.lane.b32.xlu0 %v630_v49, %s1202_s13 }
 0x142   : >> { %648 = vrot.lane.b32.xlu1 %v645_v55, %s1203_s14  ;;  %646 = vrot.lane.b32.xlu0 %v643_v56, %s1203_s14 }
 0x146   : >> { %668 = vrot.lane.b32.xlu1 %v1078_v57, %s1204_s15  ;;  %666 = vrot.lane.b32.xlu0 %v1076_v58, %s1204_s15 }
 0x14a   : >> { %682 = vrot.lane.b32.xlu1 %v679_v63, %s1205_s16  ;;  %680 = vrot.lane.b32.xlu0 %v677_v0, %s1205_s16 }
 0x1a4   : >> { %v622_v1 = vpop.permute.xlu1 %621  ;;  %v620_v2 = vpop.permute.xlu0 %619 }
 0x1a8   : >> { %v603_v3 = vpop.permute.xlu1 %602  ;;  %v589_v4 = vpop.permute.xlu0 %588 }
 0x1a9   : >> { %v594_v11 = vadd.f32 %v589_v4, %v1633_v25 }
 0x1ab   : >> { %v608_v16 = vadd.f32 %v603_v3, %v594_v11 }
 0x1ac   : >> { %v605_v7 = vpop.permute.xlu1 %604  ;;  %v591_v10 = vpop.permute.xlu0 %590 }
 0x1ad   : >> { %v595_v12 = vadd.f32 %v591_v10, %v1636_v26  ;;  %v625_v21 = vadd.f32 %v620_v2, %v608_v16 }
 0x1af   : >> { %v609_v13 = vadd.f32 %v605_v7, %v595_v12 }
 0x1b0   : >> { %v636_v14 = vpop.permute.xlu1 %635  ;;  %v634_v15 = vpop.permute.xlu0 %633 }
 0x1b1   : >> { %v626_v17 = vadd.f32 %v622_v1, %v609_v13  ;;  %v639_v22 = vadd.f32 %v634_v15, %v625_v21 }
 0x1b3   : >> { %v640_v20 = vadd.f32 %v636_v14, %v626_v17 }
 0x1b4   : >> { %v649_v18 = vpop.permute.xlu1 %648  ;;  %v647_v19 = vpop.permute.xlu0 %646 }
 0x1b5   : >> { %v653_v27 = vadd.f32 %v649_v18, %v640_v20  ;;  %v652_v28 = vadd.f32 %v647_v19, %v639_v22 }
 0x1b8   : >> { %v669_v23 = vpop.permute.xlu1 %668  ;;  %v667_v24 = vpop.permute.xlu0 %666 }
 0x1b9   : >> { %v673_v29 = vadd.f32 %v669_v23, %v653_v27  ;;  %v672_v30 = vadd.f32 %v667_v24, %v652_v28 }
 0x1bc   : >> { %v683_v25 = vpop.permute.xlu1 %682  ;;  %v681_v31 = vpop.permute.xlu0 %680 }
 0x1bd   : >> { %v687_v26 = vadd.f32 %v683_v25, %v673_v29  ;;  %v686_v32 = vadd.f32 %v681_v31, %v672_v30 }
 0x1bf   : >> { %v699_v33 = vadd.f32 %v695_v52, %v687_v26  ;;  %v698_v34 = vadd.f32 %v693_v54, %v686_v32 }
 0x1c1   : >> { %v707_v35 = vadd.f32 %v1289_v5, %v699_v33  ;;  %v706_v36 = vadd.f32 %v1289_v5, %v698_v34 }
 0x1c3   : >> { %v709_v37 = vmax.f32 %v707_v35, 0.0  ;;  %v708_v38 = vmax.f32 %v706_v36, 0.0 }
 0x1c5   : >> { %1108 = vmatprep.mubr.msk.f32.mxu0 %vm283_vm0, %v708_v38 }
 0x1c6   : >> { %1109 = vmatmul.mubr.msk.f32.vlgmr.msra.gmra.mxu0 %vm283_vm0, %v709_v37 }
 0x285   : > { %569 = sbr.rel (!%p567_p5) target bundleno = 299 (0x12b), region = 120 }
 0x286   : >> { %v1110_v39 = vpop.f32.mrf.mxu0 }
 0x287   : >> { %1086 = vst.msk [vmem:[%s996_s18 + $0x21] sm:$0xff] %vm392_vm2, %v1110_v39 }
 0x288   : >> { %v782_v40 = vpop.f32.mrf.mxu0 }
 0x289   : >> { %1085 = vst.msk [vmem:[%s996_s18 + $0x19] sm:$0xff] %vm392_vm2, %v782_v40 }
 0x28a LB: >> { %s801_s21 = smul.u32 24, %s1195_s20  ;;  %s1206_s25 = smov 125   ;;  %vm942_vm8 = vcmask 7168   ;;  %s1195_s20 = sphi %s1674_s20, %s800_s20  }
 0x28b   : >> { %s1207_s26 = smov 126   ;;  %s1208_s27 = smov 127  }
 0x28c   : >> { %s1680_s4 = scalar_lea.vmem [#allocation3], %s801_s21  ;;  %s1209_s24 = smov 124  }
 0x28d   : >> { %s1210_s28 = smov 123   ;;  %s1211_s29 = smov 122  }
 0x28e   : >> { %s1212_s30 = smov 121   ;;  %s1213_s7 = smov 120  }
 0x28f   : >> { %s1094_s8 = sshll.u32 %s1195_s20, 4  ;;  %s800_s20 = sadd.s32 1, %s1195_s20  }
 0x290   : >> { %v1088_v41 = vld [vmem:[%s1680_s4 + $0x20] sm:$0xff]  ;;  %v1087_v42 = vld [vmem:[%s1680_s4 + $0x18] sm:$0xff]  ;;  %v1688_v5 = vld [vmem:[%s1680_s4 + $0x8] sm:$0xff]  ;;  %s934_s9 = scalar_lea.vmem %s1584_s19, %s1094_s8  ;;  %s941_s10 = scalar_lea.vmem %s1589_s22, %s1094_s8 }
 0x291   : >> { %v1685_v43 = vld [vmem:[%s1680_s4] sm:$0xff]  ;;  %849 = vrot.lane.b32.xlu1 %v1088_v41, %s1206_s25  ;;  %847 = vrot.lane.b32.xlu0 %v1087_v42, %s1206_s25  ;;  %v805_v44 = vld [vmem:[%s1680_s4 + $0x10] sm:$0x3]  ;;  %v827_v45 = vrot.slane %v1688_v5, 2  ;;  %v813_v46 = vrot.slane %v1688_v5, 1  ;;  %v857_v52 = vrot.slane %v1088_v41, 1 }
 0x292   : >> { %v826_v6 = vrot.slane %v1685_v43, 2  ;;  %v812_v8 = vrot.slane %v1685_v43, 1  ;;  %v829_v47 = vrot.slane %v805_v44, 2  ;;  %v815_v48 = vrot.slane %v805_v44, 1  ;;  %v1089_v49 = vld [vmem:[%s1680_s4 + $0x28] sm:$0x3] }
 0x293   : >> { %v859_v55 = vrot.slane %v1089_v49, 1  ;;  %v856_v56 = vrot.slane %v1087_v42, 1  ;;  %v870_v57 = vrot.slane %v1088_v41, 2  ;;  %v872_v60 = vrot.slane %v1089_v49, 2  ;;  %v1091_v0 = vld [vmem:[%s1680_s4 + $0x38] sm:$0xff]  ;;  %v1090_v1 = vld [vmem:[%s1680_s4 + $0x30] sm:$0xff] }
 0x294   : >> { %v828_v50 = vsel %vm596_vm6, %v826_v6, %v827_v45  ;;  %v814_v51 = vsel %vm582_vm7, %v812_v8, %v813_v46  ;;  %v830_v53 = vsel %vm596_vm6, %v827_v45, %v829_v47  ;;  %v816_v54 = vsel %vm582_vm7, %v813_v46, %v815_v48  ;;  %v1092_v2 = vld [vmem:[%s1680_s4 + $0x40] sm:$0x3]  ;;  %v936_v46 = vld [vmem:[%s934_s9 + $0x8] sm:$0xff]  ;;  %p797_p6 = scmp.ge.s32.totalorder %s800_s20, 16  }
 0x295   : >> { %831 = vrot.lane.b32.xlu1 %v828_v50, %s1207_s26  ;;  %817 = vrot.lane.b32.xlu0 %v814_v51, %s1208_s27  ;;  %v860_v58 = vsel %vm582_vm7, %v857_v52, %v859_v55  ;;  %v858_v59 = vsel %vm582_vm7, %v856_v56, %v857_v52  ;;  %v869_v61 = vrot.slane %v1087_v42, 2  ;;  %v873_v62 = vsel %vm596_vm6, %v870_v57, %v872_v60  ;;  %v935_v47 = vld [vmem:[%s934_s9] sm:$0xff] }
 0x296   : >> { %v900_v3 = vrot.slane %v1091_v0, 1  ;;  %v902_v4 = vrot.slane %v1092_v2, 1  ;;  %v899_v7 = vrot.slane %v1090_v1, 1  ;;  %v913_v10 = vrot.slane %v1091_v0, 2 }
 0x297   : >> { %v871_v63 = vsel %vm596_vm6, %v869_v61, %v870_v57  ;;  %v915_v13 = vrot.slane %v1092_v2, 2  ;;  %v912_v14 = vrot.slane %v1090_v1, 2 }
 0x298   : >> { %v903_v11 = vsel %vm582_vm7, %v900_v3, %v902_v4  ;;  %v901_v12 = vsel %vm582_vm7, %v899_v7, %v900_v3 }
 0x299   : >> { %833 = vrot.lane.b32.xlu1 %v830_v53, %s1207_s26  ;;  %819 = vrot.lane.b32.xlu0 %v816_v54, %s1208_s27  ;;  %v916_v15 = vsel %vm596_vm6, %v913_v10, %v915_v13  ;;  %v914_v16 = vsel %vm596_vm6, %v912_v14, %v913_v10 }
 0x29d   : >> { %863 = vrot.lane.b32.xlu1 %v860_v58, %s1209_s24  ;;  %861 = vrot.lane.b32.xlu0 %v858_v59, %s1209_s24 }
 0x2a1   : >> { %876 = vrot.lane.b32.xlu1 %v873_v62, %s1210_s28  ;;  %874 = vrot.lane.b32.xlu0 %v871_v63, %s1210_s28 }
 0x2a5   : >> { %892 = vrot.lane.b32.xlu1 %v1091_v0, %s1211_s29  ;;  %890 = vrot.lane.b32.xlu0 %v1090_v1, %s1211_s29 }
 0x2a9   : >> { %906 = vrot.lane.b32.xlu1 %v903_v11, %s1212_s30  ;;  %904 = vrot.lane.b32.xlu0 %v901_v12, %s1212_s30 }
 0x2ad   : >> { %919 = vrot.lane.b32.xlu1 %v916_v15, %s1213_s7  ;;  %917 = vrot.lane.b32.xlu0 %v914_v16, %s1213_s7 }
 0x303   : >> { %v850_v17 = vpop.permute.xlu1 %849  ;;  %v848_v18 = vpop.permute.xlu0 %847 }
 0x307   : >> { %v832_v19 = vpop.permute.xlu1 %831  ;;  %v818_v20 = vpop.permute.xlu0 %817 }
 0x308   : >> { %v823_v24 = vadd.f32 %v818_v20, %v1685_v43 }
 0x30a   : >> { %v837_v30 = vadd.f32 %v832_v19, %v823_v24 }
 0x30b   : >> { %v834_v21 = vpop.permute.xlu1 %833  ;;  %v820_v22 = vpop.permute.xlu0 %819 }
 0x30c   : >> { %v824_v23 = vadd.f32 %v820_v22, %v1688_v5  ;;  %v853_v33 = vadd.f32 %v848_v18, %v837_v30 }
 0x30e   : >> { %v838_v27 = vadd.f32 %v834_v21, %v824_v23 }
 0x30f   : >> { %v864_v28 = vpop.permute.xlu1 %863  ;;  %v862_v29 = vpop.permute.xlu0 %861 }
 0x310   : >> { %v854_v25 = vadd.f32 %v850_v17, %v838_v27  ;;  %v867_v36 = vadd.f32 %v862_v29, %v853_v33 }
 0x312   : >> { %v868_v32 = vadd.f32 %v864_v28, %v854_v25 }
 0x313   : >> { %v877_v31 = vpop.permute.xlu1 %876  ;;  %v875_v26 = vpop.permute.xlu0 %874 }
 0x314   : >> { %v881_v37 = vadd.f32 %v877_v31, %v868_v32  ;;  %v880_v38 = vadd.f32 %v875_v26, %v867_v36 }
 0x317   : >> { %v893_v34 = vpop.permute.xlu1 %892  ;;  %v891_v35 = vpop.permute.xlu0 %890 }
 0x318   : >> { %v897_v41 = vadd.f32 %v893_v34, %v881_v37  ;;  %v896_v42 = vadd.f32 %v891_v35, %v880_v38 }
 0x31b   : >> { %v907_v39 = vpop.permute.xlu1 %906  ;;  %v905_v40 = vpop.permute.xlu0 %904 }
 0x31c   : >> { %v911_v43 = vadd.f32 %v907_v39, %v897_v41  ;;  %v910_v5 = vadd.f32 %v905_v40, %v896_v42 }
 0x31f   : >> { %v920_v6 = vpop.permute.xlu1 %919  ;;  %v918_v8 = vpop.permute.xlu0 %917 }
 0x320   : >> { %v924_v44 = vadd.f32 %v920_v6, %v911_v43  ;;  %v923_v45 = vadd.f32 %v918_v8, %v910_v5 }
 0x322   : >> { %v932_v48 = vadd.f32 %v1433_v9, %v924_v44  ;;  %v931_v49 = vadd.f32 %v1433_v9, %v923_v45 }
 0x324   : >> { %v938_v50 = vadd.f32 %v936_v46, %v932_v48  ;;  %v937_v51 = vadd.f32 %v935_v47, %v931_v49  ;;  %799 = sbr.rel (!%p797_p6) target bundleno = 650 (0x28a), region = 131 }
 0x326   : >> { %v940_v52 = vmax.f32 %v938_v50, 0.0  ;;  %v939_v53 = vmax.f32 %v937_v51, 0.0 }
 0x328   : >> { %944 = vst.msk [vmem:[%s941_s10 + $0x8] sm:$0xff] %vm942_vm8, %v940_v52  ;;  %943 = vst.msk [vmem:[%s941_s10] sm:$0xff] %vm942_vm8, %v939_v53 }
 0x329 PF: > { %s18_s23 = sadd.s32 1, %s1183_s23  }
 0x32a   : > { %p15_p7 = scmp.ge.s32.totalorder %s18_s23, 4  }
 0x32c   :  { %17 = sbr.rel (!%p15_p7) target bundleno = 3 (0x3), region = 142 }

// kernel: ynet_forward.13
= control target key start
LH: loop header
LB: loop body
LE: loop exit
PB: predicated region body
PF: predicated region fallthrough
CT: control target
= control target key end

     0   :  { %s2965_s0 = inlined_call_operand.vmem [shape: f32[2,16,16], index: 0, kind: input, shape index: {}]   ;;  %s2966_s1 = inlined_call_operand.vmem [shape: f32[2,16,16], index: 1, kind: input, shape index: {}]   ;;  %s2967_s2 = inlined_call_operand.vmem [shape: f32[64,16], index: 2, kind: input, shape index: {}]   ;;  %s2968_s3 = inlined_call_operand.vmem [shape: f32[64,16], index: 3, kind: input, shape index: {}]   ;;  %s2969_s4 = inlined_call_operand.vmem [shape: f32[9,1], index: 4, kind: input, shape index: {}]   ;;  %s2970_s5 = inlined_call_operand.<no memory space> [shape: f32[1,1], index: 5, kind: input, shape index: {}]   ;;  %s2971_s6 = inlined_call_operand.vmem [shape: f32[9,1], index: 6, kind: input, shape index: {}]   ;;  %s2972_s8 = inlined_call_operand.hbm [shape: f32[2,64,64], index: 8, kind: output, shape index: {}]   ;;  %s2973_s7 = inlined_call_operand.<no memory space> [shape: f32[1,1], index: 7, kind: input, shape index: {}]  }
   0x1   :  { %v13_v0 = vstv %s2970_s5  ;;  %v15_v1 = vstv %s2973_s7 }
   0x2   :  { %14 = vst [vmem:[#allocation4] sm:$0x1] %v13_v0  ;;  %16 = vst [vmem:[#allocation5] sm:$0x1] %v15_v1 }
   0x3   :  { %17 = vsyncpa [#allocation7], 0 }
   0x4   :  { %19 = vsyncpa [#allocation7 + $0x1], 0  ;;  %s2195_s9 = smov 0   ;;  %s2197_s10 = smov 0  }
   0x5   :  { %s2199_s11 = smov 0   ;;  %s2201_s12 = smov 0  }
   0x6 LB: > { %s2216_s5 = sadd.s32 4294967295, %s2134_s12   ;;  %s1784_s7 = sadd.s32 4294967294, %s2134_s12   ;;  %s2134_s12 = sphi %s2201_s12, %s2979_s12   ;;  %s2130_s11 = sphi %s2199_s11, %s2978_s11   ;;  %s2126_s10 = sphi %s2197_s10, %s2977_s10   ;;  %s2122_s9 = sphi %s2195_s9, %s2976_s9  }
   0x7   : > { %s2220_s13 = sadd.s32 1, %s2134_s12   ;;  %s210_s14 = sadd.s32 1, %s2130_s11 }
   0x8   : > { %s207_s15 = ssub.s32 %s2134_s12, %s2220_s13  ;;  %p220_p0 = scmp.ne.s32.totalorder %s2130_s11, %s2126_s10 }
   0x9   : > { %p208_p1 = scmp.eq.s32.totalorder %s207_s15, 0  ;;  %p221_p2 = scmp.eq.s32.totalorder %s2216_s5, 1 }
   0xa   : > { %p226_p3 = scmp.ne.s32.totalorder %s2126_s10, %s2122_s9  ;;  %p227_p4 = scmp.eq.s32.totalorder %s1784_s7, 1 }
   0xb   : > { %s2231_s16 = scalar_select %p208_p1, %s2130_s11, %s210_s14  }
   0xc   : > { %p2233_p5 = por %p221_p2, %p220_p0  ;;  %p2237_p6 = por %p227_p4, %p226_p3 }
   0xd   : > { %p1787_p7 = scmp.ge.s32.totalorder %s2134_s12, 1  ;;  %p279_p8 = scmp.lt.s32.totalorder %s2134_s12, 3 }
   0xf   : > { %p280_p9 = pnand %p1787_p7, %p279_p8 }
  0x10   : > { %p318_p10 = scmp.lt.s32.totalorder (!%p280_p9), %s2216_s5, 1  ;;  %s2137_s26 = smov (!%p280_p9), 1  }
  0x11   : > { %283 = sbr.rel (%p280_p9) target bundleno = 1056 (0x420), region = 52  ;;  %s2139_s23 = smov (!%p280_p9), 126  }
  0x12   : > { %s2140_s27 = smov (!%p280_p9), 127  }
  0x16   : > { %v344_v2 = vld [vmem:[%s2969_s4] sm:$0xff]  ;;  %vm348_vm0 = vcmask 146432   ;;  %s2248_s21 = scalar_select %p318_p10, %s2216_s5, 1  ;;  %v2136_v8 = vmov 0.0   ;;  %vm351_vm1 = vcmask 140288   ;;  %v2138_v14 = vmov 0  }
  0x17   : > { %1991 = vpush %v344_v2  ;;  %v377_v3 = vrot.slane %v344_v2, 1  ;;  %v393_v4 = vrot.slane %v344_v2, 2  ;;  %v409_v5 = vrot.slane %v344_v2, 3  ;;  %v429_v6 = vrot.slane %v344_v2, 4  ;;  %v345_v12 = vld [vmem:[%s2969_s4 + $0x8] sm:$0x1]  ;;  %2073 = vset.pattern.permute.xlu0 %v2138_v14 }
  0x18   : > { %v452_v7 = vrot.slane %v344_v2, 5  ;;  %349 = vst.msk [vmem:[#allocation2] sm:$0xff] %vm348_vm0, %v2136_v8  ;;  %350 = vst.msk [vmem:[#allocation2 + $0x8] sm:$0xff] %vm348_vm0, %v2136_v8  ;;  %s1848_s22 = sshll.u32 %s2248_s21, 4  ;;  %v475_v9 = vrot.slane %v344_v2, 6  ;;  %v495_v10 = vrot.slane %v344_v2, 7 }
  0x19   : > { %1993 = vpush %v377_v3  ;;  %s322_s25 = scalar_lea.vmem %s2965_s0, %s1848_s22  ;;  %vm363_vm2 = vcmask 138248   ;;  %vm419_vm3 = vcmask 1046528   ;;  %vm485_vm4 = vcmask 1045504   ;;  %v1793_v61 = vld [vmem:[#allocation4] ss:$0 sm:$0xff]  ;;  %vm555_vm5 = vcmask 130048  }
  0x1a   : > { %1995 = vpush %v393_v4  ;;  %v353_v11 = vld [vmem:[%s322_s25] sm:$0xff]  ;;  %v354_v13 = vld [vmem:[%s322_s25 + $0x8] sm:$0xff]  ;;  %vm838_vm6 = vcmask 539648   ;;  %vm847_vm7 = vcmask 533504   ;;  %vm881_vm8 = vcmask 531464   ;;  %vm1687_vm9 = vcmask 523264  }
  0x1b   : > { %352 = vst.msk [vmem:[#allocation2 + $0x10] sm:$0x3] %vm351_vm1, %v2136_v8  ;;  %357 = vrot.lane.b32.xlu0 %v353_v11, %s2137_s26 }
  0x1c   : > { %1997 = vpush %v409_v5 }
  0x1d   : > { %1999 = vpush %v429_v6 }
  0x1e   : > { %2001 = vpush %v452_v7 }
  0x1f   : > { %2003 = vpush %v475_v9  ;;  %359 = vrot.lane.b32.xlu0 %v354_v13, %s2137_s26 }
  0x20   : > { %2005 = vpush %v495_v10  ;;  %v1818_v10 = vld [vmem:[#allocation5] ss:$0 sm:$0xff] }
  0x21   : > { %2007 = vpush %v345_v12 }
  0x22   : > { %840 = vst.msk [vmem:[#allocation3 + $0x8] sm:$0xff] %vm838_vm6, %v2136_v8  ;;  %841 = vst.msk [vmem:[#allocation3 + $0x10] sm:$0xff] %vm838_vm6, %v2136_v8 }
  0x23   : > { %839 = vst.msk [vmem:[#allocation3] sm:$0xff] %vm838_vm6, %v2136_v8  ;;  %842 = vst.msk [vmem:[#allocation3 + $0x18] sm:$0xff] %vm838_vm6, %v2136_v8 }
  0x24   : > { %843 = vst.msk [vmem:[#allocation3 + $0x20] sm:$0xff] %vm838_vm6, %v2136_v8  ;;  %844 = vst.msk [vmem:[#allocation3 + $0x28] sm:$0xff] %vm838_vm6, %v2136_v8 }
  0x25   : > { %845 = vst.msk [vmem:[#allocation3 + $0x30] sm:$0xff] %vm838_vm6, %v2136_v8  ;;  %846 = vst.msk [vmem:[#allocation3 + $0x38] sm:$0xff] %vm838_vm6, %v2136_v8 }
  0x26   : > { %848 = vst.msk [vmem:[#allocation3 + $0x40] sm:$0x3] %vm847_vm7, %v2136_v8 }
  0x48   : > { %s1992_s29 = spop %1991 }
  0x49   : > { %v371_v17 = vstv %s1992_s29 }
  0x4a   : > { %s2264_s30 = spop %1993 }
  0x4b   : > { %s2266_s7 = spop %1995  ;;  %v379_v43 = vstv %s2264_s30 }
  0x4c   : > { %v395_v25 = vstv %s2266_s7 }
  0x4d   : > { %s1998_s14 = spop %1997 }
  0x4e   : > { %s2000_s15 = spop %1999  ;;  %v411_v18 = vstv %s1998_s14  ;;  %s327_s14 = scalar_lea.vmem %s2966_s1, %s1848_s22 }
  0x4f   : > { %s2002_s19 = spop %2001  ;;  %v431_v27 = vstv %s2000_s15  ;;  %s1850_s22 = sshll.u32 %s2216_s5, 10 }
  0x50   : > { %s2004_s20 = spop %2003  ;;  %v454_v34 = vstv %s2002_s19 }
  0x51   : > { %v477_v19 = vstv %s2004_s20  ;;  %s2279_s24 = spop %2005 }
  0x52   : > { %s2008_s25 = spop %2007  ;;  %v497_v4 = vstv %s2279_s24 }
  0x53   : > { %v520_v54 = vstv %s2008_s25 }
  0x8d   : > { %v358_v15 = vpop.permute.xlu0 %357 }
  0x8e   : > { %364 = vst.msk [vmem:[#allocation2 + $0x1] sm:$0xff] %vm363_vm2, %v358_v15 }
  0x91   : > { %v360_v16 = vpop.permute.xlu0 %359 }
  0x92   : > { %365 = vst.msk [vmem:[#allocation2 + $0x9] sm:$0xff] %vm363_vm2, %v360_v16 }
  0x95   : > { %v2268_v20 = vld [vmem:[#allocation2] sm:$0xff] }
  0x96   : > { %v2271_v21 = vmul.f32 %v371_v17, %v2268_v20  ;;  %v413_v22 = vmul.f32 %v411_v18, %v2268_v20  ;;  %v479_v23 = vmul.f32 %v477_v19, %v2268_v20  ;;  %v381_v53 = vmul.f32 %v379_v43, %v2268_v20 }
  0x97   : > { %v433_v62 = vmul.f32 %v431_v27, %v2268_v20  ;;  %v397_v63 = vmul.f32 %v395_v25, %v2268_v20  ;;  %v456_v3 = vmul.f32 %v454_v34, %v2268_v20  ;;  %v499_v15 = vmul.f32 %v497_v4, %v2268_v20 }
  0x98   : > { %v420_v50 = vrot.slane %v413_v22, 1  ;;  %v486_v51 = vrot.slane %v479_v23, 2 }
  0x99   : > { %v367_v24 = vld [vmem:[#allocation2 + $0x8] sm:$0xff]  ;;  %v368_v26 = vld [vmem:[#allocation2 + $0x10] sm:$0x3]  ;;  %v439_v2 = vrot.slane %v433_v62, 1  ;;  %v462_v11 = vrot.slane %v456_v3, 1  ;;  %v339_v3 = vld [vmem:[%s2968_s3 + $0x18] sm:$0xff] }
  0x9a   : > { %v2276_v28 = vmul.f32 %v371_v17, %v367_v24  ;;  %v398_v29 = vmul.f32 %v395_v25, %v367_v24  ;;  %v414_v30 = vmul.f32 %v411_v18, %v367_v24  ;;  %v415_v31 = vmul.f32 %v411_v18, %v368_v26  ;;  %v341_v62 = vld [vmem:[%s2968_s3 + $0x28] sm:$0xff] }
  0x9b   : > { %v434_v32 = vmul.f32 %v431_v27, %v367_v24  ;;  %v435_v33 = vmul.f32 %v431_v27, %v368_v26  ;;  %v457_v35 = vmul.f32 %v454_v34, %v367_v24  ;;  %v458_v36 = vmul.f32 %v454_v34, %v368_v26 }
  0x9c   : > { %v480_v37 = vmul.f32 %v477_v19, %v367_v24  ;;  %v481_v38 = vmul.f32 %v477_v19, %v368_v26  ;;  %403 = vrot.lane.b32.xlu0 %v398_v29, %s2139_s23  ;;  %v421_v41 = vrot.slane %v414_v30, 1  ;;  %v423_v42 = vrot.slane %v415_v31, 1  ;;  %v328_v19 = vld [vmem:[%s2967_s2] sm:$0xff] }
  0x9d   : > { %v440_v39 = vrot.slane %v434_v32, 1  ;;  %v442_v40 = vrot.slane %v435_v33, 1  ;;  %v463_v46 = vrot.slane %v457_v35, 1  ;;  %v465_v47 = vrot.slane %v458_v36, 1  ;;  %1907 = vmatprep.mubr.msk.f32.mxu1 %vm555_vm5, %v328_v19  ;;  %1951 = vmatprep.mubr.msk.f32.mxu0 %vm555_vm5, %v328_v19 }
  0x9e   : > { %v487_v44 = vrot.slane %v480_v37, 2  ;;  %v489_v45 = vrot.slane %v481_v38, 2  ;;  %v382_v48 = vmul.f32 %v379_v43, %v367_v24  ;;  %v424_v52 = vsel %vm419_vm3, %v421_v41, %v423_v42 }
  0x9f   : > { %v443_v49 = vsel %vm419_vm3, %v440_v39, %v442_v40  ;;  %v422_v55 = vsel %vm419_vm3, %v420_v50, %v421_v41  ;;  %v523_v57 = vmul.f32 %v520_v54, %v367_v24  ;;  %v524_v58 = vmul.f32 %v520_v54, %v368_v26 }
  0xa0   : > { %446 = vrot.lane.b32.xlu0 %v443_v49, %s2140_s27  ;;  %387 = vrot.lane.b32.xlu1 %v382_v48, %s2140_s27  ;;  %v490_v56 = vsel %vm485_vm4, %v487_v44, %v489_v45  ;;  %v466_v59 = vsel %vm419_vm3, %v463_v46, %v465_v47  ;;  %v488_v60 = vsel %vm485_vm4, %v486_v51, %v487_v44  ;;  %v505_v17 = vrot.slane %v499_v15, 2 }
  0xa1   : > { %v529_v0 = vrot.slane %v523_v57, 2  ;;  %v531_v1 = vrot.slane %v524_v58, 2  ;;  %v500_v6 = vmul.f32 %v497_v4, %v367_v24  ;;  %v501_v7 = vmul.f32 %v497_v4, %v368_v26  ;;  %v343_v57 = vld [vmem:[%s2968_s3 + $0x38] sm:$0xff]  ;;  %v330_v58 = vld [vmem:[%s2967_s2 + $0x10] sm:$0xff] }
  0xa2   : > { %v441_v9 = vsel %vm419_vm3, %v439_v2, %v440_v39  ;;  %v464_v14 = vsel %vm419_vm3, %v462_v11, %v463_v46  ;;  %v522_v18 = vmul.f32 %v520_v54, %v2268_v20  ;;  %v335_v2 = vld [vmem:[%s2967_s2 + $0x38] sm:$0xff]  ;;  %v338_v4 = vld [vmem:[%s2968_s3 + $0x10] sm:$0xff] }
  0xa3   : > { %v532_v5 = vsel %vm485_vm4, %v529_v0, %v531_v1  ;;  %v506_v12 = vrot.slane %v500_v6, 2  ;;  %v508_v13 = vrot.slane %v501_v7, 2  ;;  %v340_v1 = vld [vmem:[%s2968_s3 + $0x20] sm:$0xff]  ;;  %v1444_v7 = vld [vmem:[%s327_s14 + $0x8] sm:$0xff] }
  0xa4   : > { %469 = vrot.lane.b32.xlu0 %v466_v59, %s2139_s23  ;;  %385 = vrot.lane.b32.xlu1 %v381_v53, %s2140_s27  ;;  %v528_v23 = vrot.slane %v522_v18, 2  ;;  %v342_v59 = vld [vmem:[%s2968_s3 + $0x30] sm:$0xff]  ;;  %v336_v6 = vld [vmem:[%s2968_s3] sm:$0xff] }
  0xa5   : > { %v509_v16 = vsel %vm485_vm4, %v506_v12, %v508_v13  ;;  %v507_v22 = vsel %vm485_vm4, %v505_v17, %v506_v12  ;;  %1947 = vmatprep.subr.mxu0 %v1444_v7  ;;  %v346_v18 = vld [vmem:[%s2971_s6] sm:$0xff] }
  0xa6   : > { %v530_v24 = vsel %vm485_vm4, %v528_v23, %v529_v0  ;;  %v334_v0 = vld [vmem:[%s2967_s2 + $0x30] sm:$0xff]  ;;  %1948 = vmatpush3.msra.mxu0 %v1444_v7  ;;  %2009 = vpush %v346_v18  ;;  %v919_v19 = vrot.slane %v346_v18, 1  ;;  %v1023_v23 = vrot.slane %v346_v18, 3 }
  0xa8   : > { %548 = vperm.xlu0 %2073, %v1793_v61   ;;  %401 = vrot.lane.b32.xlu1 %v397_v63, %s2139_s23  ;;  %v332_v61 = vld [vmem:[%s2967_s2 + $0x20] sm:$0xff]  ;;  %v333_v63 = vld [vmem:[%s2967_s2 + $0x28] sm:$0xff]  ;;  %2011 = vpush %v919_v19 }
  0xac   : > { %535 = vrot.lane.b32.xlu0 %v532_v5, %s2139_s23  ;;  %444 = vrot.lane.b32.xlu1 %v441_v9, %s2140_s27  ;;  %v337_v5 = vld [vmem:[%s2968_s3 + $0x8] sm:$0xff]  ;;  %v1443_v9 = vld [vmem:[%s327_s14] sm:$0xff] }
  0xad   : > { %1949 = vmatprep.subr.mxu0 %v1443_v9 }
  0xae   : > { %1950 = vmatpush3.msra.mxu0 %v1443_v9 }
  0xaf   : > { %1963 = vmatprep.subr.msk.mxu0 %vm555_vm5, %v343_v57 }
  0xb0   : > { %1424 = vperm.xlu0 %2073, %v1818_v10   ;;  %467 = vrot.lane.b32.xlu1 %v464_v14, %s2139_s23 }
  0xb4   : > { %512 = vrot.lane.b32.xlu1 %v509_v16, %s2140_s27 }
  0xb8   : > { %510 = vrot.lane.b32.xlu1 %v507_v22, %s2140_s27  ;;  %v971_v22 = vrot.slane %v346_v18, 2 }
  0xba   : > { %2013 = vpush %v971_v22 }
  0xbb   : > { %2015 = vpush %v1023_v23 }
  0xbc   : > { %533 = vrot.lane.b32.xlu1 %v530_v24, %s2139_s23  ;;  %v1078_v24 = vrot.slane %v346_v18, 4 }
  0xbe   : > { %2017 = vpush %v1078_v24 }
  0xd7   : > { %s2454_s20 = spop %2009 }
  0xd9   : > { %s2012_s24 = spop %2011 }
  0xeb   : > { %s2014_s25 = spop %2013 }
  0xec   : > { %s2458_s28 = spop %2015 }
  0xef   : > { %s2018_s29 = spop %2017 }
 0x10e   : > { %v404_v25 = vpop.permute.xlu0 %403 }
 0x112   : > { %v388_v20 = vpop.permute.xlu1 %387  ;;  %v447_v26 = vpop.permute.xlu0 %446 }
 0x113   : > { %v392_v27 = vadd.f32 %v388_v20, %v2276_v28  ;;  %v1149_v20 = vrot.slane %v346_v18, 5 }
 0x115   : > { %v408_v29 = vadd.f32 %v404_v25, %v392_v27  ;;  %2019 = vpush %v1149_v20 }
 0x116   : > { %v386_v30 = vpop.permute.xlu1 %385  ;;  %v470_v32 = vpop.permute.xlu0 %469 }
 0x117   : > { %v428_v31 = vadd.f32 %v424_v52, %v408_v29  ;;  %v391_v34 = vadd.f32 %v386_v30, %v2271_v21  ;;  %v1275_v29 = vrot.slane %v346_v18, 7  ;;  %v347_v30 = vld [vmem:[%s2971_s6 + $0x8] sm:$0x1] }
 0x119   : > { %v451_v33 = vadd.f32 %v447_v26, %v428_v31  ;;  %v1220_v26 = vrot.slane %v346_v18, 6 }
 0x11a   : > { %v402_v35 = vpop.permute.xlu1 %401 }
 0x11b   : > { %v474_v36 = vadd.f32 %v470_v32, %v451_v33  ;;  %v407_v37 = vadd.f32 %v402_v35, %v391_v34  ;;  %2021 = vpush %v1220_v26 }
 0x11c   : > { %2023 = vpush %v1275_v29 }
 0x11d   : > { %v427_v38 = vadd.f32 %v422_v55, %v407_v37  ;;  %v494_v39 = vadd.f32 %v490_v56, %v474_v36  ;;  %v329_v56 = vld [vmem:[%s2967_s2 + $0x8] sm:$0xff]  ;;  %2025 = vpush %v347_v30 }
 0x11e   : > { %v445_v40 = vpop.permute.xlu1 %444  ;;  %1952 = vmatmul.mubr.msk.f32.vlgmr.msra.gmra.mxu0 %vm555_vm5, %v329_v56 }
 0x11f   : > { %v450_v41 = vadd.f32 %v445_v40, %v427_v38  ;;  %1954 = vmatprep.mubr.msk.f32.mxu0 %vm555_vm5, %v330_v58  ;;  %1964 = vmatpush3.xpose.msk.msra.mxu0 %vm555_vm5, %v343_v57 }
 0x120   : > { %1965 = vmatprep.subr.msk.mxu0 %vm555_vm5, %v342_v59 }
 0x122   : > { %v468_v42 = vpop.permute.xlu1 %467 }
 0x123   : > { %v549_v43 = vpop.permute.xlu0 %548  ;;  %v473_v44 = vadd.f32 %v468_v42, %v450_v41  ;;  %1966 = vmatpush3.xpose.msk.msra.mxu0 %vm555_vm5, %v342_v59 }
 0x124   : > { %1967 = vmatprep.subr.msk.mxu0 %vm555_vm5, %v341_v62 }
 0x125   : > { %v493_v45 = vadd.f32 %v488_v60, %v473_v44  ;;  %v331_v60 = vld [vmem:[%s2967_s2 + $0x18] sm:$0xff] }
 0x126   : > { %v513_v46 = vpop.permute.xlu1 %512  ;;  %1955 = vmatmul.mubr.msk.f32.gmra.mxu0 %vm555_vm5, %v331_v60 }
 0x127   : > { %v536_v28 = vpop.permute.xlu0 %535  ;;  %v517_v47 = vadd.f32 %v513_v46, %v494_v39  ;;  %1957 = vmatprep.mubr.msk.f32.mxu0 %vm555_vm5, %v332_v61  ;;  %1968 = vmatpush3.xpose.msk.msra.mxu0 %vm555_vm5, %v341_v62 }
 0x128   : > { %1969 = vmatprep.subr.msk.mxu0 %vm555_vm5, %v340_v1 }
 0x129   : > { %v540_v48 = vadd.f32 %v536_v28, %v517_v47 }
 0x12a   : > { %v511_v49 = vpop.permute.xlu1 %510  ;;  %1958 = vmatmul.mubr.msk.f32.gmra.mxu0 %vm555_vm5, %v333_v63 }
 0x12b   : > { %v552_v50 = vadd.f32 %v549_v43, %v540_v48  ;;  %v516_v51 = vadd.f32 %v511_v49, %v493_v45  ;;  %1960 = vmatprep.mubr.msk.f32.mxu0 %vm555_vm5, %v334_v0  ;;  %1970 = vmatpush3.xpose.msk.msra.mxu0 %vm555_vm5, %v340_v1  ;;  %v2456_v44 = vpop.permute.xlu0 %1424  ;;  %v2466_v49 = vstv %s2012_s24  ;;  %s2915_s24 = scalar_lea.hbm %s2972_s8, %s1850_s22 }
 0x12c   : > { %1971 = vmatprep.subr.msk.mxu0 %vm555_vm5, %v339_v3 }
 0x12d   : > { %v554_v52 = vmax.f32 %v552_v50, 0.0  ;;  %v2469_v50 = vstv %s2018_s29 }
 0x12e   : > { %v534_v21 = vpop.permute.xlu1 %533  ;;  %1961 = vmatmul.mubr.msk.f32.gmra.mxu0 %vm555_vm5, %v335_v2 }
 0x12f   : > { %v539_v53 = vadd.f32 %v534_v21, %v516_v51  ;;  %1903 = vmatprep.subr.mxu1 %v554_v52  ;;  %1972 = vmatpush3.xpose.msk.msra.mxu0 %vm555_vm5, %v339_v3 }
 0x130   : > { %1904 = vmatpush3.msra.mxu1 %v554_v52  ;;  %1973 = vmatprep.subr.msk.mxu0 %vm555_vm5, %v338_v4  ;;  %v2473_v52 = vstv %s2014_s25 }
 0x131   : > { %v551_v54 = vadd.f32 %v549_v43, %v539_v53 }
 0x133   : > { %v553_v55 = vmax.f32 %v551_v54, 0.0  ;;  %1974 = vmatpush3.xpose.msk.msra.mxu0 %vm555_vm5, %v338_v4 }
 0x134   : > { %1975 = vmatprep.subr.msk.mxu0 %vm555_vm5, %v337_v5 }
 0x135   : > { %1905 = vmatprep.subr.mxu1 %v553_v55 }
 0x136   : > { %1906 = vmatpush3.msra.mxu1 %v553_v55 }
 0x137   : > { %1908 = vmatmul.mubr.msk.f32.vlgmr.msra.gmra.mxu1 %vm555_vm5, %v329_v56  ;;  %1919 = vmatprep.subr.msk.mxu1 %vm555_vm5, %v343_v57 }
 0x138   : > { %1910 = vmatprep.mubr.msk.f32.mxu1 %vm555_vm5, %v330_v58  ;;  %1920 = vmatpush3.xpose.msk.msra.mxu1 %vm555_vm5, %v343_v57 }
 0x139   : > { %1921 = vmatprep.subr.msk.mxu1 %vm555_vm5, %v342_v59  ;;  %1976 = vmatpush3.xpose.msk.msra.mxu0 %vm555_vm5, %v337_v5 }
 0x13a   : > { %1977 = vmatprep.subr.msk.mxu0 %vm555_vm5, %v336_v6 }
 0x13b   : > { %1911 = vmatmul.mubr.msk.f32.gmra.mxu1 %vm555_vm5, %v331_v60 }
 0x13c   : > { %1913 = vmatprep.mubr.msk.f32.mxu1 %vm555_vm5, %v332_v61  ;;  %1922 = vmatpush3.xpose.msk.msra.mxu1 %vm555_vm5, %v342_v59 }
 0x13d   : > { %1923 = vmatprep.subr.msk.mxu1 %vm555_vm5, %v341_v62  ;;  %1978 = vmatpush3.xpose.msk.msra.mxu0 %vm555_vm5, %v336_v6 }
 0x13f   : > { %1914 = vmatmul.mubr.msk.f32.gmra.mxu1 %vm555_vm5, %v333_v63 }
 0x140   : > { %1916 = vmatprep.mubr.msk.f32.mxu1 %vm555_vm5, %v334_v0  ;;  %1924 = vmatpush3.xpose.msk.msra.mxu1 %vm555_vm5, %v341_v62 }
 0x141   : > { %1925 = vmatprep.subr.msk.mxu1 %vm555_vm5, %v340_v1 }
 0x143   : > { %1917 = vmatmul.mubr.msk.f32.gmra.mxu1 %vm555_vm5, %v335_v2 }
 0x144   : > { %1926 = vmatpush3.xpose.msk.msra.mxu1 %vm555_vm5, %v340_v1 }
 0x145   : > { %1927 = vmatprep.subr.msk.mxu1 %vm555_vm5, %v339_v3 }
 0x146   : > { %s2020_s30 = spop %2019 }
 0x147   : > { %v2479_v55 = vstv %s2020_s30 }
 0x148   : > { %1928 = vmatpush3.xpose.msk.msra.mxu1 %vm555_vm5, %v339_v3 }
 0x149   : > { %1929 = vmatprep.subr.msk.mxu1 %vm555_vm5, %v338_v4 }
 0x14c   : > { %1930 = vmatpush3.xpose.msk.msra.mxu1 %vm555_vm5, %v338_v4  ;;  %s2462_s7 = spop %2021 }
 0x14d   : > { %1931 = vmatprep.subr.msk.mxu1 %vm555_vm5, %v337_v5 }
 0x150   : > { %1932 = vmatpush3.xpose.msk.msra.mxu1 %vm555_vm5, %v337_v5 }
 0x151   : > { %1933 = vmatprep.subr.msk.mxu1 %vm555_vm5, %v336_v6 }
 0x154   : > { %1934 = vmatpush3.xpose.msk.msra.mxu1 %vm555_vm5, %v336_v6 }
 0x1de   : > { %v1953_v25 = vpop.f32.mrf.mxu0 }
 0x1e0   : > { %v1511_v27 = vpop.f32.mrf.mxu0 }
 0x1e1   : > { %1979 = vmatprep.mubr.msk.f32.mxu0 %vm555_vm5, %v1511_v27 }
 0x1e2   : > { %1980 = vmatmul.mubr.msk.f32.vlgmr.msra.gmra.mxu0 %vm555_vm5, %v1953_v25 }
 0x1e6   : > { %v1956_v31 = vpop.f32.mrf.mxu0 }
 0x1e8   : > { %v1521_v32 = vpop.f32.mrf.mxu0 }
 0x1e9   : > { %1982 = vmatprep.mubr.msk.f32.mxu0 %vm555_vm5, %v1521_v32 }
 0x1ea   : > { %1983 = vmatmul.mubr.msk.f32.gmra.mxu0 %vm555_vm5, %v1956_v31  ;;  %v1959_v33 = vpop.f32.mrf.mxu0 }
 0x1ec   : > { %v1531_v34 = vpop.f32.mrf.mxu0 }
 0x1ed   : > { %1985 = vmatprep.mubr.msk.f32.mxu0 %vm555_vm5, %v1531_v34 }
 0x1ee   : > { %1986 = vmatmul.mubr.msk.f32.gmra.mxu0 %vm555_vm5, %v1959_v33  ;;  %v1962_v40 = vpop.f32.mrf.mxu0 }
 0x1f0   : > { %v1541_v42 = vpop.f32.mrf.mxu0 }
 0x1f1   : > { %1988 = vmatprep.mubr.msk.f32.mxu0 %vm555_vm5, %v1541_v42 }
 0x1f2   : > { %1989 = vmatmul.mubr.msk.f32.gmra.mxu0 %vm555_vm5, %v1962_v40 }
 0x1f7   : > { %v1909_v10 = vpop.f32.mrf.mxu1 }
 0x1f9   : > { %v646_v11 = vpop.f32.mrf.mxu1 }
 0x1fa   : > { %1935 = vmatprep.mubr.msk.f32.mxu1 %vm555_vm5, %v646_v11 }
 0x1fb   : > { %v1912_v12 = vpop.f32.mrf.mxu1  ;;  %1936 = vmatmul.mubr.msk.f32.vlgmr.msra.gmra.mxu1 %vm555_vm5, %v1909_v10 }
 0x1fd   : > { %v656_v13 = vpop.f32.mrf.mxu1 }
 0x1fe   : > { %1938 = vmatprep.mubr.msk.f32.mxu1 %vm555_vm5, %v656_v13 }
 0x1ff   : > { %v1915_v14 = vpop.f32.mrf.mxu1  ;;  %1939 = vmatmul.mubr.msk.f32.gmra.mxu1 %vm555_vm5, %v1912_v12 }
 0x201   : > { %v666_v15 = vpop.f32.mrf.mxu1 }
 0x202   : > { %1941 = vmatprep.mubr.msk.f32.mxu1 %vm555_vm5, %v666_v15 }
 0x203   : > { %v1918_v16 = vpop.f32.mrf.mxu1  ;;  %1942 = vmatmul.mubr.msk.f32.gmra.mxu1 %vm555_vm5, %v1915_v14 }
 0x205   : > { %v676_v17 = vpop.f32.mrf.mxu1 }
 0x206   : > { %1944 = vmatprep.mubr.msk.f32.mxu1 %vm555_vm5, %v676_v17 }
 0x207   : > { %1945 = vmatmul.mubr.msk.f32.gmra.mxu1 %vm555_vm5, %v1918_v16 }
 0x2bb   : > { %v1937_v35 = vpop.f32.mrf.mxu1 }
 0x2bc   : > { %859 = vrot.lane.b32.xlu1 %v1937_v35, %s2137_s26 }
 0x2bd   : > { %v799_v36 = vpop.f32.mrf.mxu1 }
 0x2be   : > { %857 = vrot.lane.b32.xlu0 %v799_v36, %s2137_s26 }
 0x2bf   : > { %v1940_v37 = vpop.f32.mrf.mxu1 }
 0x2c0   : > { %863 = vrot.lane.b32.xlu1 %v1940_v37, %s2137_s26 }
 0x2c1   : > { %v809_v38 = vpop.f32.mrf.mxu1 }
 0x2c2   : > { %861 = vrot.lane.b32.xlu0 %v809_v38, %s2137_s26 }
 0x2c3   : > { %v1943_v39 = vpop.f32.mrf.mxu1 }
 0x2c4   : > { %867 = vrot.lane.b32.xlu1 %v1943_v39, %s2137_s26 }
 0x2c5   : > { %v819_v41 = vpop.f32.mrf.mxu1 }
 0x2c6   : > { %865 = vrot.lane.b32.xlu0 %v819_v41, %s2137_s26 }
 0x2c7   : > { %v1946_v8 = vpop.f32.mrf.mxu1 }
 0x2c8   : > { %871 = vrot.lane.b32.xlu1 %v1946_v8, %s2137_s26  ;;  %v2569_v8 = vstv %s2454_s20 }
 0x2c9   : > { %v829_v43 = vpop.f32.mrf.mxu1 }
 0x2ca   : > { %869 = vrot.lane.b32.xlu0 %v829_v43, %s2137_s26  ;;  %s2024_s26 = spop %2023 }
 0x2cb   : > { %s2026_s14 = spop %2025  ;;  %v2471_v51 = vstv %s2024_s26 }
 0x2cc   : > { %v2481_v56 = vstv %s2026_s14 }
 0x32e   : > { %v860_v45 = vpop.permute.xlu1 %859 }
 0x32f   : > { %883 = vst.msk [vmem:[#allocation3 + $0x9] sm:$0xff] %vm881_vm8, %v860_v45 }
 0x330   : > { %v858_v46 = vpop.permute.xlu0 %857 }
 0x331   : > { %882 = vst.msk [vmem:[#allocation3 + $0x1] sm:$0xff] %vm881_vm8, %v858_v46 }
 0x332   : > { %v864_v28 = vpop.permute.xlu1 %863 }
 0x333   : > { %885 = vst.msk [vmem:[#allocation3 + $0x19] sm:$0xff] %vm881_vm8, %v864_v28  ;;  %v2578_v28 = vstv %s2458_s28  ;;  %s2141_s28 = smov [#allocation6]  }
 0x334   : > { %v862_v47 = vpop.permute.xlu0 %861  ;;  %s2078_s29 = sshll.u32 %s2141_s28, 4  ;;  %s2079_s29 = int_to_ptr.vmem [resolvable:$false] %s2078_s29 }
 0x335   : > { %884 = vst.msk [vmem:[#allocation3 + $0x11] sm:$0xff] %vm881_vm8, %v862_v47  ;;  %v2581_v47 = vstv %s2462_s7  ;;  %s2080_s30 = scalar_lea.vmem %s2079_s29, 2048 }
 0x336   : > { %v868_v48 = vpop.permute.xlu1 %867 }
 0x337   : > { %887 = vst.msk [vmem:[#allocation3 + $0x29] sm:$0xff] %vm881_vm8, %v868_v48 }
 0x338   : > { %v866_v21 = vpop.permute.xlu0 %865  ;;  %v2475_v53 = vld [vmem:[#allocation3 + $0x8] sm:$0xff]  ;;  %v2477_v54 = vld [vmem:[#allocation3] sm:$0xff] }
 0x339   : > { %886 = vst.msk [vmem:[#allocation3 + $0x21] sm:$0xff] %vm881_vm8, %v866_v21  ;;  %v924_v57 = vmul.f32 %v2466_v49, %v2475_v53  ;;  %v923_v58 = vmul.f32 %v2466_v49, %v2477_v54  ;;  %v1279_v60 = vmul.f32 %v2471_v51, %v2477_v54  ;;  %v2492_v61 = vmul.f32 %v2471_v51, %v2475_v53 }
 0x33a   : > { %v872_v59 = vpop.permute.xlu1 %871  ;;  %v1082_v62 = vmul.f32 %v2469_v50, %v2477_v54  ;;  %v1083_v63 = vmul.f32 %v2469_v50, %v2475_v53  ;;  %v976_v1 = vmul.f32 %v2473_v52, %v2475_v53  ;;  %v975_v2 = vmul.f32 %v2473_v52, %v2477_v54 }
 0x33b   : > { %889 = vst.msk [vmem:[#allocation3 + $0x39] sm:$0xff] %vm881_vm8, %v872_v59  ;;  %941 = vrot.lane.b32.xlu1 %v924_v57, %s2140_s27  ;;  %939 = vrot.lane.b32.xlu0 %v923_v58, %s2140_s27  ;;  %v1297_v3 = vrot.slane %v1279_v60, 2  ;;  %v1350_v4 = vmul.f32 %v2481_v56, %v2477_v54  ;;  %v1351_v5 = vmul.f32 %v2481_v56, %v2475_v53  ;;  %v1298_v7 = vrot.slane %v2492_v61, 2 }
 0x33c   : > { %v870_v0 = vpop.permute.xlu0 %869  ;;  %v1153_v6 = vmul.f32 %v2479_v55, %v2477_v54  ;;  %v1100_v9 = vrot.slane %v1082_v62, 1  ;;  %v1101_v10 = vrot.slane %v1083_v63, 1  ;;  %v1154_v11 = vmul.f32 %v2479_v55, %v2475_v53  ;;  %v2523_v22 = vld [vmem:[#allocation3 + $0x18] sm:$0xff]  ;;  %v2525_v23 = vld [vmem:[#allocation3 + $0x10] sm:$0xff] }
 0x33d   : > { %888 = vst.msk [vmem:[#allocation3 + $0x31] sm:$0xff] %vm881_vm8, %v870_v0  ;;  %v1368_v12 = vrot.slane %v1350_v4, 2  ;;  %v1369_v13 = vrot.slane %v1351_v5, 2  ;;  %v1299_v14 = vsel %vm485_vm4, %v1297_v3, %v1298_v7  ;;  %v926_v24 = vmul.f32 %v2466_v49, %v2523_v22 }
 0x33e   : > { %v1102_v15 = vsel %vm419_vm3, %v1100_v9, %v1101_v10  ;;  %v1171_v16 = vrot.slane %v1153_v6, 1  ;;  %v1172_v17 = vrot.slane %v1154_v11, 1  ;;  %v925_v25 = vmul.f32 %v2466_v49, %v2525_v23 }
 0x33f   : > { %993 = vrot.lane.b32.xlu1 %v976_v1, %s2139_s23  ;;  %991 = vrot.lane.b32.xlu0 %v975_v2, %s2139_s23  ;;  %v1370_v18 = vsel %vm485_vm4, %v1368_v12, %v1369_v13  ;;  %v1084_v20 = vmul.f32 %v2469_v50, %v2525_v23  ;;  %v2537_v26 = vmul.f32 %v2469_v50, %v2523_v22 }
 0x340   : > { %v1173_v19 = vsel %vm419_vm3, %v1171_v16, %v1172_v17  ;;  %v1155_v27 = vmul.f32 %v2479_v55, %v2525_v23  ;;  %v2545_v29 = vmul.f32 %v2479_v55, %v2523_v22  ;;  %v1281_v30 = vmul.f32 %v2471_v51, %v2525_v23  ;;  %v2575_v46 = vld [vmem:[#allocation3 + $0x28] sm:$0xff]  ;;  %v2585_v48 = vld [vmem:[#allocation3 + $0x20] sm:$0xff] }
 0x341   : > { %v2551_v31 = vmul.f32 %v2471_v51, %v2523_v22  ;;  %v978_v32 = vmul.f32 %v2473_v52, %v2523_v22  ;;  %v977_v33 = vmul.f32 %v2473_v52, %v2525_v23  ;;  %v1352_v34 = vmul.f32 %v2481_v56, %v2525_v23 }
 0x342   : > { %v1103_v35 = vrot.slane %v1084_v20, 1  ;;  %v1105_v36 = vrot.slane %v2537_v26, 1  ;;  %v1174_v37 = vrot.slane %v1155_v27, 1  ;;  %v1176_v38 = vrot.slane %v2545_v29, 1 }
 0x343   : > { %1314 = vrot.lane.b32.xlu1 %v1299_v14, %s2140_s27  ;;  %1117 = vrot.lane.b32.xlu0 %v1102_v15, %s2140_s27  ;;  %v1300_v39 = vrot.slane %v1281_v30, 2  ;;  %v1302_v40 = vrot.slane %v2551_v31, 2  ;;  %v2566_v41 = vmul.f32 %v2481_v56, %v2523_v22  ;;  %v1371_v42 = vrot.slane %v1352_v34, 2 }
 0x344   : > { %v1104_v43 = vsel %vm419_vm3, %v1101_v10, %v1103_v35  ;;  %v1106_v45 = vsel %vm419_vm3, %v1103_v35, %v1105_v36  ;;  %v1175_v21 = vsel %vm419_vm3, %v1172_v17, %v1174_v37  ;;  %v1177_v57 = vsel %vm419_vm3, %v1174_v37, %v1176_v38  ;;  %v2678_v37 = vld [vmem:[#allocation3 + $0x30] sm:$0xff] }
 0x345   : > { %v1303_v58 = vsel %vm485_vm4, %v1300_v39, %v1302_v40  ;;  %v1373_v59 = vrot.slane %v2566_v41, 2  ;;  %v1301_v60 = vsel %vm485_vm4, %v1298_v7, %v1300_v39  ;;  %v1372_v61 = vsel %vm485_vm4, %v1369_v13, %v1371_v42 }
 0x346   : > { %v928_v62 = vmul.f32 %v2466_v49, %v2575_v46  ;;  %v2601_v63 = vmul.f32 %v2569_v8, %v2475_v53  ;;  %v927_v0 = vmul.f32 %v2466_v49, %v2585_v48  ;;  %v2607_v1 = vmul.f32 %v2473_v52, %v2575_v46 }
 0x347   : > { %1385 = vrot.lane.b32.xlu1 %v1370_v18, %s2139_s23  ;;  %1188 = vrot.lane.b32.xlu0 %v1173_v19, %s2139_s23  ;;  %v2611_v2 = vmul.f32 %v2569_v8, %v2477_v54  ;;  %v1027_v3 = vmul.f32 %v2578_v28, %v2477_v54  ;;  %v2619_v4 = vmul.f32 %v2473_v52, %v2585_v48 }
 0x348   : > { %v1028_v5 = vmul.f32 %v2578_v28, %v2475_v53  ;;  %v1224_v6 = vmul.f32 %v2581_v47, %v2477_v54  ;;  %v1374_v7 = vsel %vm485_vm4, %v1371_v42, %v1373_v59  ;;  %v2630_v9 = vmul.f32 %v2469_v50, %v2585_v48 }
 0x349   : > { %v1045_v10 = vrot.slane %v1027_v3, 1  ;;  %v1225_v11 = vmul.f32 %v2581_v47, %v2475_v53  ;;  %v2636_v12 = vmul.f32 %v2469_v50, %v2575_v46  ;;  %v2640_v13 = vmul.f32 %v2479_v55, %v2585_v48 }
 0x34a   : > { %v1046_v54 = vrot.slane %v1028_v5, 1  ;;  %v1242_v14 = vrot.slane %v1224_v6, 2  ;;  %v2644_v16 = vmul.f32 %v2569_v8, %v2523_v22  ;;  %v2648_v17 = vmul.f32 %v2569_v8, %v2525_v23 }
 0x34b   : > { %945 = vrot.lane.b32.xlu1 %v926_v24, %s2140_s27  ;;  %943 = vrot.lane.b32.xlu0 %v925_v25, %s2140_s27  ;;  %v1243_v15 = vrot.slane %v1225_v11, 2  ;;  %v1029_v53 = vmul.f32 %v2578_v28, %v2525_v23  ;;  %v1030_v19 = vmul.f32 %v2578_v28, %v2523_v22  ;;  %v1226_v24 = vmul.f32 %v2581_v47, %v2525_v23 }
 0x34c   : > { %v2655_v18 = vsel %vm419_vm3, %v1045_v10, %v1046_v54  ;;  %v1227_v27 = vmul.f32 %v2581_v47, %v2523_v22  ;;  %v2668_v30 = vmul.f32 %v2569_v8, %v2575_v46  ;;  %v2674_v35 = vmul.f32 %v2569_v8, %v2585_v48 }
 0x34d   : > { %v2662_v25 = vsel %vm485_vm4, %v1242_v14, %v1243_v15  ;;  %v1048_v20 = vrot.slane %v1029_v53, 1  ;;  %v1245_v34 = vrot.slane %v1226_v24, 2  ;;  %v1031_v23 = vmul.f32 %v2578_v28, %v2585_v48 }
 0x34e   : > { %v1247_v22 = vrot.slane %v1227_v27, 2  ;;  %v1032_v42 = vmul.f32 %v2578_v28, %v2575_v46  ;;  %v2711_v11 = vmul.f32 %v2569_v8, %v2678_v37 }
 0x34f   : > { %997 = vrot.lane.b32.xlu1 %v978_v32, %s2139_s23  ;;  %995 = vrot.lane.b32.xlu0 %v977_v33, %s2139_s23  ;;  %v2670_v32 = vld [vmem:[#allocation3 + $0x38] sm:$0xff]  ;;  %v1050_v33 = vrot.slane %v1030_v19, 1  ;;  %v2681_v39 = vsel %vm419_vm3, %v1046_v54, %v1048_v20  ;;  %v1033_v54 = vmul.f32 %v2578_v28, %v2678_v37 }
 0x350   : > { %v2700_v3 = vsel %vm485_vm4, %v1245_v34, %v1247_v22  ;;  %v1054_v5 = vrot.slane %v1032_v42, 1  ;;  %v1034_v53 = vmul.f32 %v2578_v28, %v2670_v32  ;;  %v1231_v27 = vmul.f32 %v2581_v47, %v2670_v32 }
 0x351   : > { %v1056_v24 = vrot.slane %v1033_v54, 1  ;;  %v1284_v54 = vmul.f32 %v2471_v51, %v2575_v46  ;;  %v930_v31 = vmul.f32 %v2466_v49, %v2670_v32  ;;  %v982_v41 = vmul.f32 %v2473_v52, %v2670_v32 }
 0x352   : > { %v1255_v42 = vrot.slane %v1231_v27, 2 }
 0x353   : > { %1119 = vrot.lane.b32.xlu1 %v1104_v43, %s2140_s27  ;;  %1121 = vrot.lane.b32.xlu0 %v1106_v45, %s2140_s27  ;;  %v1228_v43 = vmul.f32 %v2581_v47, %v2585_v48  ;;  %v2689_v45 = vld [vmem:[#allocation3 + $0x40] sm:$0x3] }
 0x354   : > { %v1035_v19 = vmul.f32 %v2578_v28, %v2689_v45 }
 0x355   : > { %v1249_v6 = vrot.slane %v1228_v43, 2  ;;  %v1109_v43 = vrot.slane %v2636_v12, 1 }
 0x356   : > { %v1060_v28 = vrot.slane %v1035_v19, 1  ;;  %v1354_v19 = vmul.f32 %v2481_v56, %v2585_v48 }
 0x357   : > { %1190 = vrot.lane.b32.xlu1 %v1175_v21, %s2139_s23  ;;  %1192 = vrot.lane.b32.xlu0 %v1177_v57, %s2139_s23  ;;  %v2692_v21 = vsel %vm419_vm3, %v1048_v20, %v1050_v33  ;;  %v2695_v57 = vsel %vm485_vm4, %v1243_v15, %v1245_v34  ;;  %v2719_v15 = vsel %vm485_vm4, %v1247_v22, %v1249_v6  ;;  %v1058_v34 = vrot.slane %v1034_v53, 1 }
 0x358   : > { %v1230_v20 = vmul.f32 %v2581_v47, %v2678_v37 }
 0x35a   : > { %v1253_v22 = vrot.slane %v1230_v20, 2  ;;  %v1306_v20 = vrot.slane %v1284_v54, 2 }
 0x35b   : > { %1318 = vrot.lane.b32.xlu1 %v1303_v58, %s2140_s27  ;;  %1316 = vrot.lane.b32.xlu0 %v1301_v60, %s2140_s27  ;;  %v1052_v58 = vrot.slane %v1031_v23, 1  ;;  %v1229_v60 = vmul.f32 %v2581_v47, %v2575_v46  ;;  %v2742_v23 = vsel %vm419_vm3, %v1054_v5, %v1056_v24 }
 0x35d   : > { %v1251_v10 = vrot.slane %v1229_v60, 2  ;;  %v2716_v14 = vsel %vm419_vm3, %v1052_v58, %v1054_v5  ;;  %v2749_v60 = vsel %vm419_vm3, %v1058_v34, %v1060_v28  ;;  %v1283_v5 = vmul.f32 %v2471_v51, %v2585_v48 }
 0x35e   : > { %v1089_v28 = vmul.f32 %v2469_v50, %v2670_v32 }
 0x35f   : > { %1389 = vrot.lane.b32.xlu1 %v1374_v7, %s2139_s23  ;;  %1387 = vrot.lane.b32.xlu0 %v1372_v61, %s2139_s23  ;;  %v2704_v61 = vmul.f32 %v2569_v8, %v2670_v32  ;;  %v2707_v7 = vsel %vm419_vm3, %v1050_v33, %v1052_v58  ;;  %v2728_v8 = vsel %vm485_vm4, %v1249_v6, %v1251_v10 }
 0x360   : > { %v2736_v33 = vmul.f32 %v2479_v55, %v2575_v46  ;;  %v2746_v58 = vsel %vm419_vm3, %v1056_v24, %v1058_v34  ;;  %v2780_v24 = vmul.f32 %v2481_v56, %v2575_v46  ;;  %v1375_v46 = vrot.slane %v1354_v19, 2 }
 0x361   : > { %v1088_v34 = vmul.f32 %v2469_v50, %v2678_v37 }
 0x362   : > { %v1180_v53 = vrot.slane %v2736_v33, 1  ;;  %v1377_v33 = vrot.slane %v2780_v24, 2 }
 0x363   : > { %949 = vrot.lane.b32.xlu1 %v928_v62, %s2140_s27  ;;  %947 = vrot.lane.b32.xlu0 %v927_v0, %s2140_s27  ;;  %v1232_v62 = vmul.f32 %v2581_v47, %v2689_v45  ;;  %v1107_v0 = vrot.slane %v2630_v9, 1  ;;  %v2756_v47 = vsel %vm485_vm4, %v1251_v10, %v1253_v22  ;;  %v2759_v9 = vsel %vm485_vm4, %v1253_v22, %v1255_v42 }
 0x364   : > { %v1178_v10 = vrot.slane %v2640_v13, 1  ;;  %v1304_v13 = vrot.slane %v1283_v5, 2  ;;  %v1378_v29 = vsel %vm485_vm4, %v1375_v46, %v1377_v33  ;;  %v1160_v22 = vmul.f32 %v2479_v55, %v2670_v32 }
 0x365   : > { %v1257_v6 = vrot.slane %v1232_v62, 2  ;;  %v1111_v62 = vrot.slane %v1088_v34, 1 }
 0x366   : > { %v1179_v26 = vsel %vm419_vm3, %v1176_v38, %v1178_v10  ;;  %v1307_v27 = vsel %vm485_vm4, %v1304_v13, %v1306_v20  ;;  %v1305_v48 = vsel %vm485_vm4, %v1302_v40, %v1304_v13  ;;  %v1376_v38 = vsel %vm485_vm4, %v1373_v59, %v1375_v46 }
 0x367   : > { %1001 = vrot.lane.b32.xlu1 %v2607_v1, %s2139_s23  ;;  %999 = vrot.lane.b32.xlu0 %v2619_v4, %s2139_s23  ;;  %v2762_v12 = vsel %vm485_vm4, %v1255_v42, %v1257_v6  ;;  %v1108_v1 = vsel %vm419_vm3, %v1105_v36, %v1107_v0  ;;  %v1110_v4 = vsel %vm419_vm3, %v1107_v0, %v1109_v43  ;;  %v1113_v0 = vrot.slane %v1089_v28, 1 }
 0x368   : > { %v1181_v36 = vsel %vm419_vm3, %v1178_v10, %v1180_v53  ;;  %v929_v40 = vmul.f32 %v2466_v49, %v2678_v37  ;;  %v981_v59 = vmul.f32 %v2473_v52, %v2678_v37  ;;  %v1159_v49 = vmul.f32 %v2479_v55, %v2678_v37 }
 0x369   : > { %v1090_v42 = vmul.f32 %v2469_v50, %v2689_v45  ;;  %v1285_v6 = vmul.f32 %v2471_v51, %v2678_v37  ;;  %v1112_v52 = vsel %vm419_vm3, %v1109_v43, %v1111_v62  ;;  %v1114_v5 = vsel %vm419_vm3, %v1111_v62, %v1113_v0 }
 0x36a   : > { %v1182_v54 = vrot.slane %v1159_v49, 1  ;;  %v1286_v50 = vmul.f32 %v2471_v51, %v2670_v32  ;;  %v1161_v43 = vmul.f32 %v2479_v55, %v2689_v45 }
 0x36b   : > { %1123 = vrot.lane.b32.xlu1 %v1108_v1, %s2140_s27  ;;  %1125 = vrot.lane.b32.xlu0 %v1110_v4, %s2140_s27  ;;  %v1184_v1 = vrot.slane %v1160_v22, 1  ;;  %v1115_v4 = vrot.slane %v1090_v42, 1  ;;  %v1308_v24 = vrot.slane %v1285_v6, 2 }
 0x36c   : > { %v1186_v46 = vrot.slane %v1161_v43, 1 }
 0x36d   : > { %v1116_v10 = vsel %vm419_vm3, %v1113_v0, %v1115_v4  ;;  %v1185_v19 = vsel %vm419_vm3, %v1182_v54, %v1184_v1  ;;  %v1309_v13 = vsel %vm485_vm4, %v1306_v20, %v1308_v24 }
 0x36f   : > { %1194 = vrot.lane.b32.xlu1 %v1179_v26, %s2139_s23  ;;  %1196 = vrot.lane.b32.xlu0 %v1181_v36, %s2139_s23  ;;  %v1287_v26 = vmul.f32 %v2471_v51, %v2689_v45  ;;  %v1183_v36 = vsel %vm419_vm3, %v1180_v53, %v1182_v54  ;;  %v1357_v51 = vmul.f32 %v2481_v56, %v2670_v32 }
 0x373   : > { %1322 = vrot.lane.b32.xlu1 %v1307_v27, %s2140_s27  ;;  %1320 = vrot.lane.b32.xlu0 %v1305_v48, %s2140_s27  ;;  %v1310_v27 = vrot.slane %v1286_v50, 2  ;;  %v1356_v48 = vmul.f32 %v2481_v56, %v2678_v37  ;;  %v1358_v37 = vmul.f32 %v2481_v56, %v2689_v45 }
 0x375   : > { %v1311_v53 = vsel %vm485_vm4, %v1308_v24, %v1310_v27  ;;  %v1383_v34 = vrot.slane %v1358_v37, 2  ;;  %v1981_v24 = vpop.f32.mrf.mxu0 }
 0x377   : > { %1393 = vrot.lane.b32.xlu1 %v1378_v29, %s2139_s23  ;;  %1391 = vrot.lane.b32.xlu0 %v1376_v38, %s2139_s23  ;;  %v1312_v29 = vrot.slane %v1287_v26, 2  ;;  %v1187_v38 = vsel %vm419_vm3, %v1184_v1, %v1186_v46 }
 0x379   : > { %v1313_v55 = vsel %vm485_vm4, %v1310_v27, %v1312_v29 }
 0x37b   : > { %953 = vrot.lane.b32.xlu1 %v930_v31, %s2140_s27  ;;  %951 = vrot.lane.b32.xlu0 %v929_v40, %s2140_s27  ;;  %v1379_v31 = vrot.slane %v1356_v48, 2  ;;  %v1381_v40 = vrot.slane %v1357_v51, 2  ;;  %v1640_v48 = vpop.f32.mrf.mxu0 }
 0x37d   : > { %v1380_v20 = vsel %vm485_vm4, %v1377_v33, %v1379_v31  ;;  %v1382_v28 = vsel %vm485_vm4, %v1379_v31, %v1381_v40  ;;  %v1384_v32 = vsel %vm485_vm4, %v1381_v40, %v1383_v34 }
 0x37f   : > { %1005 = vrot.lane.b32.xlu1 %v982_v41, %s2139_s23  ;;  %1003 = vrot.lane.b32.xlu0 %v981_v59, %s2139_s23 }
 0x383   : > { %1127 = vrot.lane.b32.xlu1 %v1112_v52, %s2140_s27  ;;  %1129 = vrot.lane.b32.xlu0 %v1114_v5, %s2140_s27 }
 0x387   : > { %1131 = vrot.lane.b32.xlu1 %v1116_v10, %s2140_s27  ;;  %1200 = vrot.lane.b32.xlu0 %v1185_v19, %s2139_s23 }
 0x38b   : > { %1198 = vrot.lane.b32.xlu1 %v1183_v36, %s2139_s23  ;;  %1324 = vrot.lane.b32.xlu0 %v1309_v13, %s2140_s27 }
 0x38f   : > { %1202 = vrot.lane.b32.xlu1 %v1187_v38, %s2139_s23  ;;  %1328 = vrot.lane.b32.xlu0 %v1313_v55, %s2140_s27 }
 0x393   : > { %1326 = vrot.lane.b32.xlu1 %v1311_v53, %s2140_s27  ;;  %1395 = vrot.lane.b32.xlu0 %v1380_v20, %s2139_s23 }
 0x397   : > { %1397 = vrot.lane.b32.xlu1 %v1382_v28, %s2139_s23  ;;  %1399 = vrot.lane.b32.xlu0 %v1384_v32, %s2139_s23  ;;  %s315_s23 = sand.u32 1, %s2126_s10  }
 0x398   : > { %s1788_s27 = sshll.u32 %s315_s23, 6  ;;  %s2925_s5 = scalar_lea.sflag [#allocation7], %s315_s23 }
 0x399   : > { %s2874_s21 = scalar_lea.vmem [#allocation6], %s1788_s27 }
 0x39a   : > { %s1710_s15 = sshll.u32 %s2874_s21, 4  ;;  %s2917_s15 = int_to_ptr.vmem [resolvable:$true] %s1710_s15 }
 0x39b   : > { %s2074_s25 = scalar_lea.vmem %s2917_s15, 1024  ;;  %p2081_p0 = scmp.lt.s32.totalorder %s2917_s15, %s2079_s29 }
 0x39c   : > { %p2075_p11 = scmp.ne.s32.totalorder %s2917_s15, %s2074_s25  ;;  %p2082_p1 = scmp.lt.s32.totalorder %s2080_s30, %s2074_s25 }
 0x39e   : > { %p2076_p12 = pnand %p2075_p11, %p2233_p5  ;;  %p2083_p2 = por %p2082_p1, %p2081_p0 }
 0x3a0   : > { %p2077_p13 = pneg %p2076_p12 }
 0x3a2   : > { %p2084_p3 = pnand %p2083_p2, %p2077_p13 }
 0x3ad   : > { %v942_v41 = vpop.permute.xlu1 %941  ;;  %v940_v56 = vpop.permute.xlu0 %939 }
 0x3ae   : > { %v964_v45 = vadd.f32 %v942_v41, %v2601_v63  ;;  %v963_v33 = vadd.f32 %v940_v56, %v2611_v2  ;;  %v1984_v41 = vpop.f32.mrf.mxu0 }
 0x3b1   : > { %v994_v59 = vpop.permute.xlu1 %993  ;;  %v992_v62 = vpop.permute.xlu0 %991 }
 0x3b2   : > { %v1016_v0 = vadd.f32 %v994_v59, %v964_v45  ;;  %v1015_v49 = vadd.f32 %v992_v62, %v963_v33 }
 0x3b4   : > { %v1070_v22 = vadd.f32 %v2655_v18, %v1015_v49  ;;  %v1071_v42 = vadd.f32 %v2681_v39, %v1016_v0  ;;  %v1650_v49 = vpop.f32.mrf.mxu0 }
 0x3b5   : > { %v1315_v6 = vpop.permute.xlu1 %1314  ;;  %v1118_v52 = vpop.permute.xlu0 %1117 }
 0x3b6   : > { %v1141_v5 = vadd.f32 %v1118_v52, %v1070_v22 }
 0x3b9   : > { %v1386_v54 = vpop.permute.xlu1 %1385  ;;  %v1189_v1 = vpop.permute.xlu0 %1188 }
 0x3ba   : > { %v1212_v4 = vadd.f32 %v1189_v1, %v1141_v5 }
 0x3bc   : > { %v1267_v63 = vadd.f32 %v2662_v25, %v1212_v4 }
 0x3bd   : > { %v946_v10 = vpop.permute.xlu1 %945  ;;  %v944_v2 = vpop.permute.xlu0 %943 }
 0x3be   : > { %v1338_v19 = vadd.f32 %v1315_v6, %v1267_v63  ;;  %v966_v50 = vadd.f32 %v946_v10, %v2644_v16  ;;  %v965_v18 = vadd.f32 %v944_v2, %v2648_v17 }
 0x3c0   : > { %v1409_v43 = vadd.f32 %v1386_v54, %v1338_v19 }
 0x3c1   : > { %v998_v39 = vpop.permute.xlu1 %997  ;;  %v996_v26 = vpop.permute.xlu0 %995 }
 0x3c2   : > { %v1018_v36 = vadd.f32 %v998_v39, %v966_v50  ;;  %v1017_v13 = vadd.f32 %v996_v26, %v965_v18  ;;  %v1427_v27 = vadd.f32 %v2456_v44, %v1409_v43 }
 0x3c4   : > { %v1435_v25 = vmax.f32 %v1427_v27, 0.0  ;;  %v1072_v46 = vadd.f32 %v2692_v21, %v1017_v13  ;;  %v1073_v29 = vadd.f32 %v2707_v7, %v1018_v36 }
 0x3c5   : > { %v1120_v38 = vpop.permute.xlu1 %1119  ;;  %v1122_v16 = vpop.permute.xlu0 %1121 }
 0x3c6   : > { %v1679_v55 = vadd.f32 %v1640_v48, %v1435_v25  ;;  %v1142_v17 = vadd.f32 %v1120_v38, %v1071_v42  ;;  %v1143_v31 = vadd.f32 %v1122_v16, %v1072_v46  ;;  %v1987_v38 = vpop.f32.mrf.mxu0 }
 0x3c8   : > { %1688 = vst.msk [vmem:[%s2874_s21] sm:$0xff] %vm1687_vm9, %v1679_v55 }
 0x3c9   : > { %v1191_v51 = vpop.permute.xlu1 %1190  ;;  %v1193_v37 = vpop.permute.xlu0 %1192 }
 0x3ca   : > { %v1213_v53 = vadd.f32 %v1191_v51, %v1142_v17  ;;  %v1214_v20 = vadd.f32 %v1193_v37, %v1143_v31  ;;  %v1660_v31 = vpop.f32.mrf.mxu0 }
 0x3cc   : > { %v1269_v40 = vadd.f32 %v2700_v3, %v1214_v20  ;;  %v1268_v21 = vadd.f32 %v2695_v57, %v1213_v53 }
 0x3cd   : > { %v1319_v7 = vpop.permute.xlu1 %1318  ;;  %v1317_v34 = vpop.permute.xlu0 %1316 }
 0x3ce   : > { %v1340_v28 = vadd.f32 %v1319_v7, %v1269_v40  ;;  %v1339_v32 = vadd.f32 %v1317_v34, %v1268_v21 }
 0x3d1   : > { %v1390_v56 = vpop.permute.xlu1 %1389  ;;  %v1388_v45 = vpop.permute.xlu0 %1387 }
 0x3d2   : > { %v1411_v33 = vadd.f32 %v1390_v56, %v1340_v28  ;;  %v1410_v59 = vadd.f32 %v1388_v45, %v1339_v32 }
 0x3d4   : > { %v1429_v62 = vadd.f32 %v2456_v44, %v1411_v33  ;;  %v1428_v0 = vadd.f32 %v2456_v44, %v1410_v59 }
 0x3d5   : > { %v950_v22 = vpop.permute.xlu1 %949  ;;  %v948_v3 = vpop.permute.xlu0 %947 }
 0x3d6   : > { %v1436_v42 = vmax.f32 %v1428_v0, 0.0  ;;  %v1437_v57 = vmax.f32 %v1429_v62, 0.0  ;;  %v968_v52 = vadd.f32 %v950_v22, %v2668_v30  ;;  %v967_v5 = vadd.f32 %v948_v3, %v2674_v35 }
 0x3d8   : > { %v1680_v6 = vadd.f32 %v1981_v24, %v1436_v42  ;;  %v1681_v54 = vadd.f32 %v1650_v49, %v1437_v57 }
 0x3d9   : > { %v1002_v1 = vpop.permute.xlu1 %1001  ;;  %v1000_v4 = vpop.permute.xlu0 %999 }
 0x3da   : > { %1689 = vst.msk [vmem:[%s2874_s21 + $0x8] sm:$0xff] %vm1687_vm9, %v1680_v6  ;;  %1690 = vst.msk [vmem:[%s2874_s21 + $0x10] sm:$0xff] %vm1687_vm9, %v1681_v54  ;;  %v1020_v63 = vadd.f32 %v1002_v1, %v968_v52  ;;  %v1019_v10 = vadd.f32 %v1000_v4, %v967_v5 }
 0x3dc   : > { %v1074_v2 = vadd.f32 %v2716_v14, %v1019_v10  ;;  %v1075_v19 = vadd.f32 %v2742_v23, %v1020_v63 }
 0x3dd   : > { %v1124_v50 = vpop.permute.xlu1 %1123  ;;  %v1126_v18 = vpop.permute.xlu0 %1125 }
 0x3de   : > { %v1144_v24 = vadd.f32 %v1124_v50, %v1073_v29  ;;  %v1145_v43 = vadd.f32 %v1126_v18, %v1074_v2 }
 0x3e1   : > { %v1195_v30 = vpop.permute.xlu1 %1194  ;;  %v1197_v39 = vpop.permute.xlu0 %1196 }
 0x3e2   : > { %v1215_v35 = vadd.f32 %v1195_v30, %v1144_v24  ;;  %v1216_v26 = vadd.f32 %v1197_v39, %v1145_v43  ;;  %v1990_v43 = vpop.f32.mrf.mxu0 }
 0x3e4   : > { %v1271_v36 = vadd.f32 %v2728_v8, %v1216_v26  ;;  %v1270_v13 = vadd.f32 %v2719_v15, %v1215_v35 }
 0x3e5   : > { %v1323_v27 = vpop.permute.xlu1 %1322  ;;  %v1321_v48 = vpop.permute.xlu0 %1320 }
 0x3e6   : > { %v1342_v25 = vadd.f32 %v1323_v27, %v1271_v36  ;;  %v1341_v46 = vadd.f32 %v1321_v48, %v1270_v13  ;;  %v1670_v36 = vpop.f32.mrf.mxu0 }
 0x3e9   : > { %v1394_v14 = vpop.permute.xlu1 %1393  ;;  %v1392_v16 = vpop.permute.xlu0 %1391 }
 0x3ea   : > { %v1413_v23 = vadd.f32 %v1394_v14, %v1342_v25  ;;  %v1412_v29 = vadd.f32 %v1392_v16, %v1341_v46 }
 0x3ec   : > { %v1431_v55 = vadd.f32 %v2456_v44, %v1413_v23  ;;  %v1430_v17 = vadd.f32 %v2456_v44, %v1412_v29 }
 0x3ed   : > { %v954_v51 = vpop.permute.xlu1 %953  ;;  %v952_v8 = vpop.permute.xlu0 %951 }
 0x3ee   : > { %v1438_v37 = vmax.f32 %v1430_v17, 0.0  ;;  %v1439_v15 = vmax.f32 %v1431_v55, 0.0  ;;  %v970_v20 = vadd.f32 %v954_v51, %v2704_v61  ;;  %v969_v40 = vadd.f32 %v952_v8, %v2711_v11 }
 0x3f0   : > { %v1682_v53 = vadd.f32 %v1984_v41, %v1438_v37  ;;  %v1683_v21 = vadd.f32 %v1660_v31, %v1439_v15 }
 0x3f1   : > { %v1006_v7 = vpop.permute.xlu1 %1005  ;;  %v1004_v34 = vpop.permute.xlu0 %1003 }
 0x3f2   : > { %1691 = vst.msk [vmem:[%s2874_s21 + $0x18] sm:$0xff] %vm1687_vm9, %v1682_v53  ;;  %1692 = vst.msk [vmem:[%s2874_s21 + $0x20] sm:$0xff] %vm1687_vm9, %v1683_v21  ;;  %v1022_v28 = vadd.f32 %v1006_v7, %v970_v20  ;;  %v1021_v32 = vadd.f32 %v1004_v34, %v969_v40 }
 0x3f4   : > { %v1076_v56 = vadd.f32 %v2746_v58, %v1021_v32  ;;  %v1077_v45 = vadd.f32 %v2749_v60, %v1022_v28 }
 0x3f5   : > { %v1128_v33 = vpop.permute.xlu1 %1127  ;;  %v1130_v59 = vpop.permute.xlu0 %1129 }
 0x3f6   : > { %v1147_v41 = vadd.f32 %v1130_v59, %v1076_v56  ;;  %v1146_v11 = vadd.f32 %v1128_v33, %v1075_v19 }
 0x3f9   : > { %v1132_v62 = vpop.permute.xlu1 %1131  ;;  %v1201_v61 = vpop.permute.xlu0 %1200 }
 0x3fa   : > { %v1218_v0 = vadd.f32 %v1201_v61, %v1147_v41  ;;  %v1148_v57 = vadd.f32 %v1132_v62, %v1077_v45 }
 0x3fc   : > { %v1273_v49 = vadd.f32 %v2759_v9, %v1218_v0 }
 0x3fd   : > { %v1199_v22 = vpop.permute.xlu1 %1198  ;;  %v1325_v3 = vpop.permute.xlu0 %1324 }
 0x3fe   : > { %v1217_v42 = vadd.f32 %v1199_v22, %v1146_v11 }
 0x400   : > { %v1272_v6 = vadd.f32 %v2756_v47, %v1217_v42 }
 0x401   : > { %v1203_v52 = vpop.permute.xlu1 %1202  ;;  %v1329_v5 = vpop.permute.xlu0 %1328 }
 0x402   : > { %v1219_v58 = vadd.f32 %v1203_v52, %v1148_v57  ;;  %v1343_v54 = vadd.f32 %v1325_v3, %v1272_v6 }
 0x404   : > { %v1274_v60 = vadd.f32 %v2762_v12, %v1219_v58 }
 0x405   : > { %v1327_v1 = vpop.permute.xlu1 %1326  ;;  %v1396_v4 = vpop.permute.xlu0 %1395 }
 0x406   : > { %v1414_v63 = vadd.f32 %v1396_v4, %v1343_v54  ;;  %v1345_v10 = vadd.f32 %v1329_v5, %v1274_v60  ;;  %v1344_v9 = vadd.f32 %v1327_v1, %v1273_v49 }
 0x408   : > { %v1432_v2 = vadd.f32 %v2456_v44, %v1414_v63 }
 0x409   : > { %v1398_v19 = vpop.permute.xlu1 %1397  ;;  %v1400_v50 = vpop.permute.xlu0 %1399 }
 0x40a   : > { %v1440_v18 = vmax.f32 %v1432_v2, 0.0  ;;  %v1415_v47 = vadd.f32 %v1398_v19, %v1344_v9  ;;  %v1416_v24 = vadd.f32 %v1400_v50, %v1345_v10 }
 0x40c   : > { %v1684_v12 = vadd.f32 %v1987_v38, %v1440_v18  ;;  %v1433_v30 = vadd.f32 %v2456_v44, %v1415_v47  ;;  %v1434_v39 = vadd.f32 %v2456_v44, %v1416_v24 }
 0x40e   : > { %1693 = vst.msk [vmem:[%s2874_s21 + $0x28] sm:$0xff] %vm1687_vm9, %v1684_v12  ;;  %v1442_v35 = vmax.f32 %v1434_v39, 0.0  ;;  %v1441_v26 = vmax.f32 %v1433_v30, 0.0 }
 0x410   : > { %v1686_v13 = vadd.f32 %v1990_v43, %v1442_v35  ;;  %v1685_v44 = vadd.f32 %v1670_v36, %v1441_v26 }
 0x412   : > { %1695 = vst.msk [vmem:[%s2874_s21 + $0x38] sm:$0xff] %vm1687_vm9, %v1686_v13  ;;  %1694 = vst.msk [vmem:[%s2874_s21 + $0x30] sm:$0xff] %vm1687_vm9, %v1685_v44 }
 0x413   : > { %2087 = shalt.err (!%p2084_p3)
}
 0x414   : > { %s2088_s7 = scalar_lea.hbm %s2915_s24, 1024  ;;  %s2092_s23 = scalar_lea.hbm %s2972_s8, 2048 }
 0x415   : > { %p2089_p4 = scmp.ne.s32.totalorder %s2915_s24, %s2088_s7  ;;  %p2093_p9 = scmp.lt.s32.totalorder %s2915_s24, %s2972_s8 }
 0x416   : > { %p2094_p10 = scmp.lt.s32.totalorder %s2092_s23, %s2088_s7 }
 0x417   : > { %p2090_p7 = pnand %p2089_p4, %p2233_p5 }
 0x418   : > { %p2095_p11 = por %p2094_p10, %p2093_p9 }
 0x419   : > { %p2091_p8 = pneg %p2090_p7 }
 0x41b   : > { %p2096_p12 = pnand %p2095_p11, %p2091_p8 }
 0x41d   : > { %2099 = shalt.err (!%p2096_p12)
}
 0x41e   : > { %s2142_s22 = smov 128   ;;  %s2143_s19 = smov 8  }
 0x41f   : > { %2027 = dma.vmem_to_hbm [thread:$0]  (%p2233_p5), %s2917_s15, 1024, %s2915_s24, %s2925_s5, %s2142_s22, %s2142_s22, %s2143_s19  }
 0x420 PF: > { %p2033_p13 = scmp.ge.s32.totalorder %s2134_s12, 2  ;;  %s1725_s20 = sand.u32 1, %s2122_s9  }
 0x421   : > { %s1726_s25 = scalar_lea.sflag [#allocation7], %s1725_s20 }
 0x422   : > { %p2030_p0 = pnand %p2033_p13, %p2237_p6 }
 0x424   : > { %p2031_p1 = pneg %p2030_p0 }
 0x426   : > { %2117 = dma.done.wait (%p2031_p1), %s1726_s25, 1024  }
 0x427   : > { %2119 = vsyncadd (%p2031_p1), %s1726_s25, 4294966272  ;;  %p22_p2 = scmp.ge.s32.totalorder %s2220_s13, 4   ;;  %s2976_s9 = smov %s2126_s10 }
 0x428   : > { %s2977_s10 = smov %s2130_s11  ;;  %s2978_s11 = smov %s2231_s16 }
 0x429   : > { %s2979_s12 = smov %s2220_s13  ;;  %24 = sbr.rel (!%p22_p2) target bundleno = 6 (0x6), region = 90 }
 0x42e   :  { %1731 = vsyncpa [#allocation7], 1 }
 0x42f   :  { %1733 = vsyncpa [#allocation7 + $0x1], 1 }

</bundles_post_ra>
